<compile_context>
chip_gen: v5e
topology: v5e:2x2
jax: 0.10.0
libtpu: 0.0.40
codegen_flags: <defaults>
</compile_context>

<pallas_src>
import jax
import jax.numpy as jnp
from jax import lax
from jax.experimental import pallas as pl
from jax.experimental.pallas import tpu as pltpu

INPUT = 128
HIDDEN = 64
NG = 4 * HIDDEN          # 256 gate columns per direction
NG2 = 2 * NG             # 512 gate columns for both directions


# ---------------------------------------------------------------------------
# Phase 1: time-independent projection (x @ Wih for both dirs, bias, mask)
# ---------------------------------------------------------------------------
def _proj_kernel(x_ref, wg_ref, bg_ref, w1_ref, b1_ref, g_ref, m_ref):
    x = x_ref[...]                                             # (TM, 128)
    g = jnp.dot(x, wg_ref[...], preferred_element_type=jnp.float32) + bg_ref[...]
    g_ref[...] = g.astype(g_ref.dtype)                         # (TM, 512)
    m = jax.nn.sigmoid(
        jnp.dot(x, w1_ref[...], preferred_element_type=jnp.float32) + b1_ref[...])
    m_ref[...] = m.astype(m_ref.dtype)                         # (TM, 1)


def _project(x2d, wg, bg, w1t, b1, proj_dtype=jnp.float32):
    # x2d: (M, 128).  proj_dtype=jnp.bfloat16 gives ~3x MXU throughput at a small
    # accuracy cost; kept f32 by default to match the f32 PyTorch module exactly.
    M, K = x2d.shape
    if proj_dtype != jnp.float32:
        x2d, wg, w1t = (a.astype(proj_dtype) for a in (x2d, wg, w1t))

    if M % 8 == 0 and M <= 512:
        TM = M                       # small problems: one tile, no padding
    else:
        TM = 256
    Mp = pl.cdiv(M, TM) * TM
    if Mp != M:
        x2d = jnp.pad(x2d, ((0, Mp - M), (0, 0)))

    gates, mask = pl.pallas_call(
        _proj_kernel,
        out_shape=(jax.ShapeDtypeStruct((Mp, NG2), jnp.float32),
                   jax.ShapeDtypeStruct((Mp, 1), jnp.float32)),
        grid_spec=pltpu.PrefetchScalarGridSpec(
            num_scalar_prefetch=0,
            grid=(Mp // TM,),
            in_specs=[
                pl.BlockSpec((TM, K), lambda i: (i, 0)),       # x rows
                pl.BlockSpec((K, NG2), lambda i: (0, 0)),      # [Wih_f^T | Wih_b^T]
                pl.BlockSpec((1, NG2), lambda i: (0, 0)),      # folded LSTM biases
                pl.BlockSpec((K, 1), lambda i: (0, 0)),        # W1^T
                pl.BlockSpec((1, 1), lambda i: (0, 0)),        # b1
            ],
            out_specs=[
                pl.BlockSpec((TM, NG2), lambda i: (i, 0)),
                pl.BlockSpec((TM, 1), lambda i: (i, 0)),
            ],
        ),
        compiler_params=pltpu.CompilerParams(
            dimension_semantics=("parallel",)),
    )(x2d, wg, bg, w1t, b1)
    return gates[:M], mask[:M]


# ---------------------------------------------------------------------------
# Phase 2: time-blocked bidirectional recurrence
# ---------------------------------------------------------------------------
def _gate_update(gates, c):
    # gates: (B, 256) in PyTorch order [i, f, g, o]; c: (B, 64)
    sg = jax.nn.sigmoid(gates)        # one EUP pass over all gates (g lanes are free filler)
    i = sg[:, 0 * HIDDEN:1 * HIDDEN]
    f = sg[:, 1 * HIDDEN:2 * HIDDEN]
    g = jnp.tanh(gates[:, 2 * HIDDEN:3 * HIDDEN])
    o = sg[:, 3 * HIDDEN:4 * HIDDEN]
    c_new = f * c + i * g
    h_new = o * jnp.tanh(c_new)
    return h_new, c_new


def _bilstm_kernel(gf_ref, gb_ref, wrec_ref, outf_ref, outb_ref, hn_ref,
                   hf_s, cf_s, hb_s, cb_s):
    c = pl.program_id(0)
    nc = pl.num_programs(0)
    tb = gf_ref.shape[0]

    @pl.when(c == 0)
    def _():
        hf_s[...] = jnp.zeros_like(hf_s)
        cf_s[...] = jnp.zeros_like(cf_s)
        hb_s[...] = jnp.zeros_like(hb_s)
        cb_s[...] = jnp.zeros_like(cb_s)

    wrec = wrec_ref[...]              # (128, 512) block-diag [Whh_f^T ; Whh_b^T], hoisted

    def step(j, carry):
        hf, cf, hb, cb = carry
        h_cat = jnp.concatenate([hf, hb], axis=-1)                        # (B, 128)
        rec = jnp.dot(h_cat, wrec, preferred_element_type=jnp.float32)    # (B, 512)
        gates_f = rec[:, :NG] + gf_ref[j]            # fwd x-gates, forward time order
        gates_b = rec[:, NG:] + gb_ref[tb - 1 - j]   # bwd x-gates, reversed within chunk
        hf, cf = _gate_update(gates_f, cf)
        hb, cb = _gate_update(gates_b, cb)
        outf_ref[j] = hf.astype(outf_ref.dtype)
        outb_ref[tb - 1 - j] = hb.astype(outb_ref.dtype)
        return hf, cf, hb, cb

    carry = (hf_s[...], cf_s[...], hb_s[...], cb_s[...])
    hf, cf, hb, cb = lax.fori_loop(0, tb, step, carry, unroll=min(8, tb))
    hf_s[...] = hf
    cf_s[...] = cf
    hb_s[...] = hb
    cb_s[...] = cb

    @pl.when(c == nc - 1)
    def _():
        hn_ref[0] = hf.astype(hn_ref.dtype)
        hn_ref[1] = hb.astype(hn_ref.dtype)


def _bilstm(gates, wrec):
    # gates: (T, B, 512) = [fwd 256 | bwd 256] per time step; wrec: (128, 512).
    T, B, _ = gates.shape
    TB = min(T, 128)
    while T % TB:                     # largest divisor of T that is <= 128
        TB -= 1
    C = T // TB

    # TODO(synk): on v7x (2 TensorCores) the fwd/bwd chains could be split across
    # cores via a leading "parallel" grid axis of size 2; kept fused here (1 TC on
    # v5e/v6e) so both directions share one (B,128)@(128,512) MXU op per step.
    grid_spec = pltpu.PrefetchScalarGridSpec(
        num_scalar_prefetch=0,
        grid=(C,),
        in_specs=[
            pl.BlockSpec((TB, B, NG), lambda c: (c, 0, 0)),           # fwd x-gates
            pl.BlockSpec((TB, B, NG), lambda c: (C - 1 - c, 0, 1)),   # bwd x-gates (rev chunks)
            pl.BlockSpec((2 * HIDDEN, NG2), lambda c: (0, 0)),        # block-diag Whh
        ],
        out_specs=[
            pl.BlockSpec((TB, B, HIDDEN), lambda c: (c, 0, 0)),          # fwd outputs
            pl.BlockSpec((TB, B, HIDDEN), lambda c: (C - 1 - c, 0, 0)),  # bwd outputs
            pl.BlockSpec((2, B, HIDDEN), lambda c: (0, 0, 0)),           # hn
        ],
        scratch_shapes=[pltpu.VMEM((B, HIDDEN), jnp.float32)] * 4,       # hf, cf, hb, cb
    )
    return pl.pallas_call(
        _bilstm_kernel,
        out_shape=(
            jax.ShapeDtypeStruct((T, B, HIDDEN), jnp.float32),
            jax.ShapeDtypeStruct((T, B, HIDDEN), jnp.float32),
            jax.ShapeDtypeStruct((2, B, HIDDEN), jnp.float32),
        ),
        grid_spec=grid_spec,
        compiler_params=pltpu.CompilerParams(
            dimension_semantics=("arbitrary",)),
    )(gates, gates, wrec)


# ---------------------------------------------------------------------------
# Forward pass (matches DetectorHead.forward)
# ---------------------------------------------------------------------------
def detector_head_forward(x, lengths, params, proj_dtype=jnp.float32):
    # x: (T, B, 128) float32, seq-major like nn.LSTM default.  lengths unused.
    del lengths
    T, B, C = x.shape
    assert C == INPUT
    wproj, bproj, w1t, b1, wrec = params

    gates2d, mask2d = _project(x.reshape(T * B, C), wproj, bproj, w1t, b1, proj_dtype)
    gates = gates2d.reshape(T, B, NG2)
    mask = mask2d.reshape(T, B, 1)

    out_f, out_b, hn = _bilstm(gates, wrec)
    # One lane-concat of the two halves (single fused XLA copy); the kernels
    # themselves only emit lane-dense (TB,B,64) slabs per chunk.
    output = jnp.concatenate([out_f, out_b], axis=-1)          # (T, B, 128)
    return output, mask, hn


# ---------------------------------------------------------------------------
# Parameters (PyTorch-equivalent shapes, pre-packed for the kernels)
# ---------------------------------------------------------------------------
def init_params(key):
    ks = jax.random.split(key, 10)
    s = 1.0 / jnp.sqrt(HIDDEN)
    u = lambda k, shape: jax.random.uniform(k, shape, jnp.float32, -s, s)
    w_ih_f = u(ks[0], (4 * HIDDEN, INPUT))
    w_hh_f = u(ks[1], (4 * HIDDEN, HIDDEN))
    b_ih_f = u(ks[2], (4 * HIDDEN,))
    b_hh_f = u(ks[3], (4 * HIDDEN,))
    w_ih_b = u(ks[4], (4 * HIDDEN, INPUT))
    w_hh_b = u(ks[5], (4 * HIDDEN, HIDDEN))
    b_ih_b = u(ks[6], (4 * HIDDEN,))
    b_hh_b = u(ks[7], (4 * HIDDEN,))
    sl = 1.0 / jnp.sqrt(INPUT)
    w1 = jax.random.uniform(ks[8], (1, INPUT), jnp.float32, -sl, sl)
    b1 = jax.random.uniform(ks[9], (1,), jnp.float32, -sl, sl)

    # Packed for the kernels:
    wproj = jnp.concatenate([w_ih_f.T, w_ih_b.T], axis=1)                  # (128, 512)
    bproj = jnp.concatenate([b_ih_f + b_hh_f, b_ih_b + b_hh_b])[None, :]   # (1, 512)
    wrec = jnp.zeros((2 * HIDDEN, NG2), jnp.float32)                       # block-diag
    wrec = wrec.at[:HIDDEN, :NG].set(w_hh_f.T)
    wrec = wrec.at[HIDDEN:, NG:].set(w_hh_b.T)
    return (wproj, bproj, w1.T, b1[None, :], wrec)


# ---------------------------------------------------------------------------
# Pure-JAX reference (same math as torch.nn.LSTM, gate order i,f,g,o)
# ---------------------------------------------------------------------------
def _ref_lstm(xs, wih_t, whh_t, b):
    _, B, _ = xs.shape

    def step(carry, x_t):
        h, c = carry
        gates = x_t @ wih_t + h @ whh_t + b
        i = jax.nn.sigmoid(gates[:, 0 * HIDDEN:1 * HIDDEN])
        f = jax.nn.sigmoid(gates[:, 1 * HIDDEN:2 * HIDDEN])
        g = jnp.tanh(gates[:, 2 * HIDDEN:3 * HIDDEN])
        o = jax.nn.sigmoid(gates[:, 3 * HIDDEN:4 * HIDDEN])
        c = f * c + i * g
        h = o * jnp.tanh(c)
        return (h, c), h

    init = (jnp.zeros((B, HIDDEN), jnp.float32), jnp.zeros((B, HIDDEN), jnp.float32))
    (h_last, _), hs = lax.scan(step, init, xs)
    return hs, h_last


def reference_forward(x, params):
    wproj, bproj, w1t, b1, wrec = params
    wihf_t, wihb_t = wproj[:, :NG], wproj[:, NG:]
    bf, bb = bproj[:, :NG], bproj[:, NG:]
    whhf_t = wrec[:HIDDEN, :NG]
    whhb_t = wrec[HIDDEN:, NG:]

    out_f, hn_f = _ref_lstm(x, wihf_t, whhf_t, bf)
    out_b_rev, hn_b = _ref_lstm(x[::-1], wihb_t, whhb_t, bb)
    out_b = out_b_rev[::-1]
    output = jnp.concatenate([out_f, out_b], axis=-1)
    mask = jax.nn.sigmoid(x @ w1t + b1)
    hn = jnp.stack([hn_f, hn_b], axis=0)
    return output, mask, hn


if __name__ == "__main__":
    key = jax.random.PRNGKey(0)
    kx, kp = jax.random.split(key)

    T, B = 8, 2
    x = jax.random.normal(kx, (T, B, INPUT), jnp.float32)
    lengths = jnp.full((B,), T, jnp.int32)   # unused, mirrors the PyTorch signature
    params = init_params(kp)

    fwd = jax.jit(detector_head_forward)
    output, mask, hn = fwd(x, lengths, params)
    jax.block_until_ready((output, mask, hn))

    ref_out, ref_mask, ref_hn = reference_forward(x, params)
    assert output.shape == (T, B, 2 * HIDDEN)
    assert mask.shape == (T, B, 1)
    assert hn.shape == (2, B, HIDDEN)
    assert jnp.allclose(output, ref_out, atol=1e-4, rtol=1e-4)
    assert jnp.allclose(mask, ref_mask, atol=1e-4, rtol=1e-4)
    assert jnp.allclose(hn, ref_hn, atol=1e-4, rtol=1e-4)

    print("KERNEL_OK")
</pallas_src>

<mosaic_0001>
module attributes {stable_mosaic.version = 11 : i64} {
  func.func @_proj_kernel(%arg0: i32, %arg1: memref<16x128xf32, #tpu.memory_space<vmem>>, %arg2: memref<128x512xf32, #tpu.memory_space<vmem>>, %arg3: memref<1x512xf32, #tpu.memory_space<vmem>>, %arg4: memref<128x1xf32, #tpu.memory_space<vmem>>, %arg5: memref<1x1xf32, #tpu.memory_space<vmem>>, %arg6: memref<16x512xf32, #tpu.memory_space<vmem>>, %arg7: memref<16x1xf32, #tpu.memory_space<vmem>>) attributes {dimension_semantics = [#tpu.dimension_semantics<parallel>], iteration_bounds = array<i64: 1>, scalar_prefetch = 0 : i64, scratch_operands = 0 : i64, tpu.core_type = #tpu.core_type<tc>, window_params = [{transform_indices = @transform_0, window_bounds = array<i64: 16, 128>}, {pipeline_mode = #tpu.pipeline_mode<synchronous>, transform_indices = @transform_1, window_bounds = array<i64: 128, 512>}, {pipeline_mode = #tpu.pipeline_mode<synchronous>, transform_indices = @transform_2, window_bounds = array<i64: 1, 512>}, {pipeline_mode = #tpu.pipeline_mode<synchronous>, transform_indices = @transform_3, window_bounds = array<i64: 128, 1>}, {pipeline_mode = #tpu.pipeline_mode<synchronous>, transform_indices = @transform_4, window_bounds = array<i64: 1, 1>}, {transform_indices = @transform_5, window_bounds = array<i64: 16, 512>}, {transform_indices = @transform_6, window_bounds = array<i64: 16, 1>}]} {
    %c0 = arith.constant 0 : index
    %c0_0 = arith.constant 0 : index
    %0 = vector.load %arg1[%c0, %c0_0] : memref<16x128xf32, #tpu.memory_space<vmem>>, vector<16x128xf32>
    %c0_1 = arith.constant 0 : index
    %c0_2 = arith.constant 0 : index
    %1 = vector.load %arg2[%c0_1, %c0_2] : memref<128x512xf32, #tpu.memory_space<vmem>>, vector<128x512xf32>
    %cst = arith.constant dense<0.000000e+00> : vector<16x512xf32>
    %2 = tpu.matmul %0, %1, %cst {dimension_numbers = #tpu.dot_dimension_numbers<[1], [0], [0], [1], [0, 0, 1, 1], [], []>} : vector<16x128xf32>, vector<128x512xf32>, vector<16x512xf32> -> vector<16x512xf32>
    %c0_3 = arith.constant 0 : index
    %c0_4 = arith.constant 0 : index
    %3 = vector.load %arg3[%c0_3, %c0_4] : memref<1x512xf32, #tpu.memory_space<vmem>>, vector<1x512xf32>
    %4 = vector.broadcast %3 : vector<1x512xf32> to vector<16x512xf32>
    %5 = arith.addf %2, %4 : vector<16x512xf32>
    %c0_5 = arith.constant 0 : index
    %c0_6 = arith.constant 0 : index
    %6 = vector.load %arg6[%c0_5, %c0_6] : memref<16x512xf32, #tpu.memory_space<vmem>>, vector<16x512xf32>
    tpu.vector_store %arg6[%c0_5, %c0_6], %5 {strides = array<i32>} : memref<16x512xf32, #tpu.memory_space<vmem>>, vector<16x512xf32>,
    %c0_7 = arith.constant 0 : index
    %c0_8 = arith.constant 0 : index
    %7 = vector.load %arg4[%c0_7, %c0_8] : memref<128x1xf32, #tpu.memory_space<vmem>>, vector<128x1xf32>
    %cst_9 = arith.constant dense<0.000000e+00> : vector<16x1xf32>
    %8 = tpu.matmul %0, %7, %cst_9 {dimension_numbers = #tpu.dot_dimension_numbers<[1], [0], [0], [1], [0, 0, 1, 1], [], []>} : vector<16x128xf32>, vector<128x1xf32>, vector<16x1xf32> -> vector<16x1xf32>
    %c0_10 = arith.constant 0 : index
    %c0_11 = arith.constant 0 : index
    %9 = vector.load %arg5[%c0_10, %c0_11] : memref<1x1xf32, #tpu.memory_space<vmem>>, vector<1x1xf32>
    %10 = vector.broadcast %9 : vector<1x1xf32> to vector<16x1xf32>
    %11 = arith.addf %8, %10 : vector<16x1xf32>
    %12 = arith.negf %11 : vector<16x1xf32>
    %13 = math.exp %12 : vector<16x1xf32>
    %cst_12 = arith.constant 1.000000e+00 : f32
    %14 = vector.broadcast %cst_12 : f32 to vector<16x1xf32>
    %15 = arith.addf %14, %13 : vector<16x1xf32>
    %16 = arith.divf %14, %15 : vector<16x1xf32>
    %c0_13 = arith.constant 0 : index
    %c0_14 = arith.constant 0 : index
    %17 = vector.load %arg7[%c0_13, %c0_14] : memref<16x1xf32, #tpu.memory_space<vmem>>, vector<16x1xf32>
    tpu.vector_store %arg7[%c0_13, %c0_14], %16 {strides = array<i32>} : memref<16x1xf32, #tpu.memory_space<vmem>>, vector<16x1xf32>,
    return
  }
  func.func @transform_0(%arg0: i32) -> (i32, i32) {
    %c0_i32 = arith.constant 0 : i32
    %c0_i32_0 = arith.constant 0 : i32
    return %arg0, %c0_i32 : i32, i32
  }
  func.func @transform_1(%arg0: i32) -> (i32, i32) {
    %c0_i32 = arith.constant 0 : i32
    %c0_i32_0 = arith.constant 0 : i32
    %c0_i32_1 = arith.constant 0 : i32
    return %c0_i32, %c0_i32_0 : i32, i32
  }
  func.func @transform_2(%arg0: i32) -> (i32, i32) {
    %c0_i32 = arith.constant 0 : i32
    %c0_i32_0 = arith.constant 0 : i32
    %c0_i32_1 = arith.constant 0 : i32
    return %c0_i32, %c0_i32_0 : i32, i32
  }
  func.func @transform_3(%arg0: i32) -> (i32, i32) {
    %c0_i32 = arith.constant 0 : i32
    %c0_i32_0 = arith.constant 0 : i32
    %c0_i32_1 = arith.constant 0 : i32
    return %c0_i32, %c0_i32_0 : i32, i32
  }
  func.func @transform_4(%arg0: i32) -> (i32, i32) {
    %c0_i32 = arith.constant 0 : i32
    %c0_i32_0 = arith.constant 0 : i32
    %c0_i32_1 = arith.constant 0 : i32
    return %c0_i32, %c0_i32_0 : i32, i32
  }
  func.func @transform_5(%arg0: i32) -> (i32, i32) {
    %c0_i32 = arith.constant 0 : i32
    %c0_i32_0 = arith.constant 0 : i32
    return %arg0, %c0_i32 : i32, i32
  }
  func.func @transform_6(%arg0: i32) -> (i32, i32) {
    %c0_i32 = arith.constant 0 : i32
    %c0_i32_0 = arith.constant 0 : i32
    return %arg0, %c0_i32 : i32, i32
  }
}

module attributes {stable_mosaic.version = 11 : i64} {
  func.func @_bilstm_kernel(%arg0: i32, %arg1: memref<8x2x256xf32, #tpu.memory_space<vmem>>, %arg2: memref<8x2x256xf32, #tpu.memory_space<vmem>>, %arg3: memref<128x512xf32, #tpu.memory_space<vmem>>, %arg4: memref<8x2x64xf32, #tpu.memory_space<vmem>>, %arg5: memref<8x2x64xf32, #tpu.memory_space<vmem>>, %arg6: memref<2x2x64xf32, #tpu.memory_space<vmem>>, %arg7: memref<2x64xf32, #tpu.memory_space<vmem>>, %arg8: memref<2x64xf32, #tpu.memory_space<vmem>>, %arg9: memref<2x64xf32, #tpu.memory_space<vmem>>, %arg10: memref<2x64xf32, #tpu.memory_space<vmem>>) attributes {dimension_semantics = [#tpu.dimension_semantics<arbitrary>], iteration_bounds = array<i64: 1>, scalar_prefetch = 0 : i64, scratch_operands = 4 : i64, tpu.core_type = #tpu.core_type<tc>, window_params = [{transform_indices = @transform_0, window_bounds = array<i64: 8, 2, 256>}, {transform_indices = @transform_1, window_bounds = array<i64: 8, 2, 256>}, {pipeline_mode = #tpu.pipeline_mode<synchronous>, transform_indices = @transform_2, window_bounds = array<i64: 128, 512>}, {transform_indices = @transform_3, window_bounds = array<i64: 8, 2, 64>}, {transform_indices = @transform_4, window_bounds = array<i64: 8, 2, 64>}, {pipeline_mode = #tpu.pipeline_mode<synchronous>, transform_indices = @transform_5, window_bounds = array<i64: 2, 2, 64>}]} {
    %c0_i32 = arith.constant 0 : i32
    %0 = arith.cmpi eq, %arg0, %c0_i32 : i32
    %1 = arith.extui %0 : i1 to i32
    %c0_i32_0 = arith.constant 0 : i32
    %2 = arith.cmpi ne, %1, %c0_i32_0 : i32
    scf.if %2 {
      %cst_124 = arith.constant 0.000000e+00 : f32
      %431 = vector.broadcast %cst_124 : f32 to vector<2x64xf32>
      %c0_125 = arith.constant 0 : index
      %c0_126 = arith.constant 0 : index
      %432 = vector.load %arg7[%c0_125, %c0_126] : memref<2x64xf32, #tpu.memory_space<vmem>>, vector<2x64xf32>
      tpu.vector_store %arg7[%c0_125, %c0_126], %431 {strides = array<i32>} : memref<2x64xf32, #tpu.memory_space<vmem>>, vector<2x64xf32>,
      %cst_127 = arith.constant 0.000000e+00 : f32
      %433 = vector.broadcast %cst_127 : f32 to vector<2x64xf32>
      %c0_128 = arith.constant 0 : index
      %c0_129 = arith.constant 0 : index
      %434 = vector.load %arg8[%c0_128, %c0_129] : memref<2x64xf32, #tpu.memory_space<vmem>>, vector<2x64xf32>
      tpu.vector_store %arg8[%c0_128, %c0_129], %433 {strides = array<i32>} : memref<2x64xf32, #tpu.memory_space<vmem>>, vector<2x64xf32>,
      %cst_130 = arith.constant 0.000000e+00 : f32
      %435 = vector.broadcast %cst_130 : f32 to vector<2x64xf32>
      %c0_131 = arith.constant 0 : index
      %c0_132 = arith.constant 0 : index
      %436 = vector.load %arg9[%c0_131, %c0_132] : memref<2x64xf32, #tpu.memory_space<vmem>>, vector<2x64xf32>
      tpu.vector_store %arg9[%c0_131, %c0_132], %435 {strides = array<i32>} : memref<2x64xf32, #tpu.memory_space<vmem>>, vector<2x64xf32>,
      %cst_133 = arith.constant 0.000000e+00 : f32
      %437 = vector.broadcast %cst_133 : f32 to vector<2x64xf32>
      %c0_134 = arith.constant 0 : index
      %c0_135 = arith.constant 0 : index
      %438 = vector.load %arg10[%c0_134, %c0_135] : memref<2x64xf32, #tpu.memory_space<vmem>>, vector<2x64xf32>
      tpu.vector_store %arg10[%c0_134, %c0_135], %437 {strides = array<i32>} : memref<2x64xf32, #tpu.memory_space<vmem>>, vector<2x64xf32>,
    } else {
    }
    %c0 = arith.constant 0 : index
    %c0_1 = arith.constant 0 : index
    %3 = vector.load %arg3[%c0, %c0_1] : memref<128x512xf32, #tpu.memory_space<vmem>>, vector<128x512xf32>
    %c0_2 = arith.constant 0 : index
    %c0_3 = arith.constant 0 : index
    %4 = vector.load %arg7[%c0_2, %c0_3] : memref<2x64xf32, #tpu.memory_space<vmem>>, vector<2x64xf32>
    %c0_4 = arith.constant 0 : index
    %c0_5 = arith.constant 0 : index
    %5 = vector.load %arg8[%c0_4, %c0_5] : memref<2x64xf32, #tpu.memory_space<vmem>>, vector<2x64xf32>
    %c0_6 = arith.constant 0 : index
    %c0_7 = arith.constant 0 : index
    %6 = vector.load %arg9[%c0_6, %c0_7] : memref<2x64xf32, #tpu.memory_space<vmem>>, vector<2x64xf32>
    %c0_8 = arith.constant 0 : index
    %c0_9 = arith.constant 0 : index
    %7 = vector.load %arg10[%c0_8, %c0_9] : memref<2x64xf32, #tpu.memory_space<vmem>>, vector<2x64xf32>
    %c0_i32_10 = arith.constant 0 : i32
    %8 = tpu.concatenate %4, %6 in 1 : vector<2x64xf32>, vector<2x64xf32> -> vector<2x128xf32>
    %cst = arith.constant dense<0.000000e+00> : vector<2x512xf32>
    %9 = tpu.matmul %8, %3, %cst {dimension_numbers = #tpu.dot_dimension_numbers<[1], [0], [0], [1], [0, 0, 1, 1], [], []>} : vector<2x128xf32>, vector<128x512xf32>, vector<2x512xf32> -> vector<2x512xf32>
    %10 = vector.extract_strided_slice %9 {offsets = [0, 0], sizes = [2, 256], strides = [1, 1]} : vector<2x512xf32> to vector<2x256xf32>
    %11 = arith.index_cast %c0_i32_10 : i32 to index
    %c0_11 = arith.constant 0 : index
    %c0_12 = arith.constant 0 : index
    %12 = vector.load %arg1[%11, %c0_11, %c0_12] : memref<8x2x256xf32, #tpu.memory_space<vmem>>, vector<1x2x256xf32>
    %13 = vector.shape_cast %12 : vector<1x2x256xf32> to vector<2x256xf32>
    %14 = arith.addf %10, %13 : vector<2x256xf32>
    %15 = vector.extract_strided_slice %9 {offsets = [0, 256], sizes = [2, 256], strides = [1, 1]} : vector<2x512xf32> to vector<2x256xf32>
    %c7_i32 = arith.constant 7 : i32
    %16 = arith.subi %c7_i32, %c0_i32_10 : i32
    %17 = arith.index_cast %16 : i32 to index
    %c0_13 = arith.constant 0 : index
    %c0_14 = arith.constant 0 : index
    %18 = vector.load %arg2[%17, %c0_13, %c0_14] : memref<8x2x256xf32, #tpu.memory_space<vmem>>, vector<1x2x256xf32>
    %19 = vector.shape_cast %18 : vector<1x2x256xf32> to vector<2x256xf32>
    %20 = arith.addf %15, %19 : vector<2x256xf32>
    %21 = arith.negf %14 : vector<2x256xf32>
    %22 = math.exp %21 : vector<2x256xf32>
    %cst_15 = arith.constant 1.000000e+00 : f32
    %23 = vector.broadcast %cst_15 : f32 to vector<2x256xf32>
    %24 = arith.addf %23, %22 : vector<2x256xf32>
    %25 = arith.divf %23, %24 : vector<2x256xf32>
    %26 = vector.extract_strided_slice %25 {offsets = [0, 0], sizes = [2, 64], strides = [1, 1]} : vector<2x256xf32> to vector<2x64xf32>
    %27 = vector.extract_strided_slice %25 {offsets = [0, 64], sizes = [2, 64], strides = [1, 1]} : vector<2x256xf32> to vector<2x64xf32>
    %28 = vector.extract_strided_slice %14 {offsets = [0, 128], sizes = [2, 64], strides = [1, 1]} : vector<2x256xf32> to vector<2x64xf32>
    %29 = math.tanh %28 : vector<2x64xf32>
    %30 = vector.extract_strided_slice %25 {offsets = [0, 192], sizes = [2, 64], strides = [1, 1]} : vector<2x256xf32> to vector<2x64xf32>
    %31 = arith.mulf %27, %5 : vector<2x64xf32>
    %32 = arith.mulf %26, %29 : vector<2x64xf32>
    %33 = arith.addf %31, %32 : vector<2x64xf32>
    %34 = math.tanh %33 : vector<2x64xf32>
    %35 = arith.mulf %30, %34 : vector<2x64xf32>
    %36 = arith.negf %20 : vector<2x256xf32>
    %37 = math.exp %36 : vector<2x256xf32>
    %cst_16 = arith.constant 1.000000e+00 : f32
    %38 = vector.broadcast %cst_16 : f32 to vector<2x256xf32>
    %39 = arith.addf %38, %37 : vector<2x256xf32>
    %40 = arith.divf %38, %39 : vector<2x256xf32>
    %41 = vector.extract_strided_slice %40 {offsets = [0, 0], sizes = [2, 64], strides = [1, 1]} : vector<2x256xf32> to vector<2x64xf32>
    %42 = vector.extract_strided_slice %40 {offsets = [0, 64], sizes = [2, 64], strides = [1, 1]} : vector<2x256xf32> to vector<2x64xf32>
    %43 = vector.extract_strided_slice %20 {offsets = [0, 128], sizes = [2, 64], strides = [1, 1]} : vector<2x256xf32> to vector<2x64xf32>
    %44 = math.tanh %43 : vector<2x64xf32>
    %45 = vector.extract_strided_slice %40 {offsets = [0, 192], sizes = [2, 64], strides = [1, 1]} : vector<2x256xf32> to vector<2x64xf32>
    %46 = arith.mulf %42, %7 : vector<2x64xf32>
    %47 = arith.mulf %41, %44 : vector<2x64xf32>
    %48 = arith.addf %46, %47 : vector<2x64xf32>
    %49 = math.tanh %48 : vector<2x64xf32>
    %50 = arith.mulf %45, %49 : vector<2x64xf32>
    %51 = arith.index_cast %c0_i32_10 : i32 to index
    %c0_17 = arith.constant 0 : index
    %c0_18 = arith.constant 0 : index
    %52 = vector.load %arg4[%51, %c0_17, %c0_18] : memref<8x2x64xf32, #tpu.memory_space<vmem>>, vector<1x2x64xf32>
    %53 = vector.shape_cast %52 : vector<1x2x64xf32> to vector<2x64xf32>
    %54 = vector.shape_cast %35 : vector<2x64xf32> to vector<1x2x64xf32>
    tpu.vector_store %arg4[%51, %c0_17, %c0_18], %54 {strides = array<i32>} : memref<8x2x64xf32, #tpu.memory_space<vmem>>, vector<1x2x64xf32>,
    %c7_i32_19 = arith.constant 7 : i32
    %55 = arith.subi %c7_i32_19, %c0_i32_10 : i32
    %56 = arith.index_cast %55 : i32 to index
    %c0_20 = arith.constant 0 : index
    %c0_21 = arith.constant 0 : index
    %57 = vector.load %arg5[%56, %c0_20, %c0_21] : memref<8x2x64xf32, #tpu.memory_space<vmem>>, vector<1x2x64xf32>
    %58 = vector.shape_cast %57 : vector<1x2x64xf32> to vector<2x64xf32>
    %59 = vector.shape_cast %50 : vector<2x64xf32> to vector<1x2x64xf32>
    tpu.vector_store %arg5[%56, %c0_20, %c0_21], %59 {strides = array<i32>} : memref<8x2x64xf32, #tpu.memory_space<vmem>>, vector<1x2x64xf32>,
    %c1_i32 = arith.constant 1 : i32
    %60 = tpu.concatenate %35, %50 in 1 : vector<2x64xf32>, vector<2x64xf32> -> vector<2x128xf32>
    %cst_22 = arith.constant dense<0.000000e+00> : vector<2x512xf32>
    %61 = tpu.matmul %60, %3, %cst_22 {dimension_numbers = #tpu.dot_dimension_numbers<[1], [0], [0], [1], [0, 0, 1, 1], [], []>} : vector<2x128xf32>, vector<128x512xf32>, vector<2x512xf32> -> vector<2x512xf32>
    %62 = vector.extract_strided_slice %61 {offsets = [0, 0], sizes = [2, 256], strides = [1, 1]} : vector<2x512xf32> to vector<2x256xf32>
    %63 = arith.index_cast %c1_i32 : i32 to index
    %c0_23 = arith.constant 0 : index
    %c0_24 = arith.constant 0 : index
    %64 = vector.load %arg1[%63, %c0_23, %c0_24] : memref<8x2x256xf32, #tpu.memory_space<vmem>>, vector<1x2x256xf32>
    %65 = vector.shape_cast %64 : vector<1x2x256xf32> to vector<2x256xf32>
    %66 = arith.addf %62, %65 : vector<2x256xf32>
    %67 = vector.extract_strided_slice %61 {offsets = [0, 256], sizes = [2, 256], strides = [1, 1]} : vector<2x512xf32> to vector<2x256xf32>
    %c7_i32_25 = arith.constant 7 : i32
    %68 = arith.subi %c7_i32_25, %c1_i32 : i32
    %69 = arith.index_cast %68 : i32 to index
    %c0_26 = arith.constant 0 : index
    %c0_27 = arith.constant 0 : index
    %70 = vector.load %arg2[%69, %c0_26, %c0_27] : memref<8x2x256xf32, #tpu.memory_space<vmem>>, vector<1x2x256xf32>
    %71 = vector.shape_cast %70 : vector<1x2x256xf32> to vector<2x256xf32>
    %72 = arith.addf %67, %71 : vector<2x256xf32>
    %73 = arith.negf %66 : vector<2x256xf32>
    %74 = math.exp %73 : vector<2x256xf32>
    %cst_28 = arith.constant 1.000000e+00 : f32
    %75 = vector.broadcast %cst_28 : f32 to vector<2x256xf32>
    %76 = arith.addf %75, %74 : vector<2x256xf32>
    %77 = arith.divf %75, %76 : vector<2x256xf32>
    %78 = vector.extract_strided_slice %77 {offsets = [0, 0], sizes = [2, 64], strides = [1, 1]} : vector<2x256xf32> to vector<2x64xf32>
    %79 = vector.extract_strided_slice %77 {offsets = [0, 64], sizes = [2, 64], strides = [1, 1]} : vector<2x256xf32> to vector<2x64xf32>
    %80 = vector.extract_strided_slice %66 {offsets = [0, 128], sizes = [2, 64], strides = [1, 1]} : vector<2x256xf32> to vector<2x64xf32>
    %81 = math.tanh %80 : vector<2x64xf32>
    %82 = vector.extract_strided_slice %77 {offsets = [0, 192], sizes = [2, 64], strides = [1, 1]} : vector<2x256xf32> to vector<2x64xf32>
    %83 = arith.mulf %79, %33 : vector<2x64xf32>
    %84 = arith.mulf %78, %81 : vector<2x64xf32>
    %85 = arith.addf %83, %84 : vector<2x64xf32>
    %86 = math.tanh %85 : vector<2x64xf32>
    %87 = arith.mulf %82, %86 : vector<2x64xf32>
    %88 = arith.negf %72 : vector<2x256xf32>
    %89 = math.exp %88 : vector<2x256xf32>
    %cst_29 = arith.constant 1.000000e+00 : f32
    %90 = vector.broadcast %cst_29 : f32 to vector<2x256xf32>
    %91 = arith.addf %90, %89 : vector<2x256xf32>
    %92 = arith.divf %90, %91 : vector<2x256xf32>
    %93 = vector.extract_strided_slice %92 {offsets = [0, 0], sizes = [2, 64], strides = [1, 1]} : vector<2x256xf32> to vector<2x64xf32>
    %94 = vector.extract_strided_slice %92 {offsets = [0, 64], sizes = [2, 64], strides = [1, 1]} : vector<2x256xf32> to vector<2x64xf32>
    %95 = vector.extract_strided_slice %72 {offsets = [0, 128], sizes = [2, 64], strides = [1, 1]} : vector<2x256xf32> to vector<2x64xf32>
    %96 = math.tanh %95 : vector<2x64xf32>
    %97 = vector.extract_strided_slice %92 {offsets = [0, 192], sizes = [2, 64], strides = [1, 1]} : vector<2x256xf32> to vector<2x64xf32>
    %98 = arith.mulf %94, %48 : vector<2x64xf32>
    %99 = arith.mulf %93, %96 : vector<2x64xf32>
    %100 = arith.addf %98, %99 : vector<2x64xf32>
    %101 = math.tanh %100 : vector<2x64xf32>
    %102 = arith.mulf %97, %101 : vector<2x64xf32>
    %103 = arith.index_cast %c1_i32 : i32 to index
    %c0_30 = arith.constant 0 : index
    %c0_31 = arith.constant 0 : index
    %104 = vector.load %arg4[%103, %c0_30, %c0_31] : memref<8x2x64xf32, #tpu.memory_space<vmem>>, vector<1x2x64xf32>
    %105 = vector.shape_cast %104 : vector<1x2x64xf32> to vector<2x64xf32>
    %106 = vector.shape_cast %87 : vector<2x64xf32> to vector<1x2x64xf32>
    tpu.vector_store %arg4[%103, %c0_30, %c0_31], %106 {strides = array<i32>} : memref<8x2x64xf32, #tpu.memory_space<vmem>>, vector<1x2x64xf32>,
    %c7_i32_32 = arith.constant 7 : i32
    %107 = arith.subi %c7_i32_32, %c1_i32 : i32
    %108 = arith.index_cast %107 : i32 to index
    %c0_33 = arith.constant 0 : index
    %c0_34 = arith.constant 0 : index
    %109 = vector.load %arg5[%108, %c0_33, %c0_34] : memref<8x2x64xf32, #tpu.memory_space<vmem>>, vector<1x2x64xf32>
    %110 = vector.shape_cast %109 : vector<1x2x64xf32> to vector<2x64xf32>
    %111 = vector.shape_cast %102 : vector<2x64xf32> to vector<1x2x64xf32>
    tpu.vector_store %arg5[%108, %c0_33, %c0_34], %111 {strides = array<i32>} : memref<8x2x64xf32, #tpu.memory_space<vmem>>, vector<1x2x64xf32>,
    %c2_i32 = arith.constant 2 : i32
    %112 = tpu.concatenate %87, %102 in 1 : vector<2x64xf32>, vector<2x64xf32> -> vector<2x128xf32>
    %cst_35 = arith.constant dense<0.000000e+00> : vector<2x512xf32>
    %113 = tpu.matmul %112, %3, %cst_35 {dimension_numbers = #tpu.dot_dimension_numbers<[1], [0], [0], [1], [0, 0, 1, 1], [], []>} : vector<2x128xf32>, vector<128x512xf32>, vector<2x512xf32> -> vector<2x512xf32>
    %114 = vector.extract_strided_slice %113 {offsets = [0, 0], sizes = [2, 256], strides = [1, 1]} : vector<2x512xf32> to vector<2x256xf32>
    %115 = arith.index_cast %c2_i32 : i32 to index
    %c0_36 = arith.constant 0 : index
    %c0_37 = arith.constant 0 : index
    %116 = vector.load %arg1[%115, %c0_36, %c0_37] : memref<8x2x256xf32, #tpu.memory_space<vmem>>, vector<1x2x256xf32>
    %117 = vector.shape_cast %116 : vector<1x2x256xf32> to vector<2x256xf32>
    %118 = arith.addf %114, %117 : vector<2x256xf32>
    %119 = vector.extract_strided_slice %113 {offsets = [0, 256], sizes = [2, 256], strides = [1, 1]} : vector<2x512xf32> to vector<2x256xf32>
    %c7_i32_38 = arith.constant 7 : i32
    %120 = arith.subi %c7_i32_38, %c2_i32 : i32
    %121 = arith.index_cast %120 : i32 to index
    %c0_39 = arith.constant 0 : index
    %c0_40 = arith.constant 0 : index
    %122 = vector.load %arg2[%121, %c0_39, %c0_40] : memref<8x2x256xf32, #tpu.memory_space<vmem>>, vector<1x2x256xf32>
    %123 = vector.shape_cast %122 : vector<1x2x256xf32> to vector<2x256xf32>
    %124 = arith.addf %119, %123 : vector<2x256xf32>
    %125 = arith.negf %118 : vector<2x256xf32>
    %126 = math.exp %125 : vector<2x256xf32>
    %cst_41 = arith.constant 1.000000e+00 : f32
    %127 = vector.broadcast %cst_41 : f32 to vector<2x256xf32>
    %128 = arith.addf %127, %126 : vector<2x256xf32>
    %129 = arith.divf %127, %128 : vector<2x256xf32>
    %130 = vector.extract_strided_slice %129 {offsets = [0, 0], sizes = [2, 64], strides = [1, 1]} : vector<2x256xf32> to vector<2x64xf32>
    %131 = vector.extract_strided_slice %129 {offsets = [0, 64], sizes = [2, 64], strides = [1, 1]} : vector<2x256xf32> to vector<2x64xf32>
    %132 = vector.extract_strided_slice %118 {offsets = [0, 128], sizes = [2, 64], strides = [1, 1]} : vector<2x256xf32> to vector<2x64xf32>
    %133 = math.tanh %132 : vector<2x64xf32>
    %134 = vector.extract_strided_slice %129 {offsets = [0, 192], sizes = [2, 64], strides = [1, 1]} : vector<2x256xf32> to vector<2x64xf32>
    %135 = arith.mulf %131, %85 : vector<2x64xf32>
    %136 = arith.mulf %130, %133 : vector<2x64xf32>
    %137 = arith.addf %135, %136 : vector<2x64xf32>
    %138 = math.tanh %137 : vector<2x64xf32>
    %139 = arith.mulf %134, %138 : vector<2x64xf32>
    %140 = arith.negf %124 : vector<2x256xf32>
    %141 = math.exp %140 : vector<2x256xf32>
    %cst_42 = arith.constant 1.000000e+00 : f32
    %142 = vector.broadcast %cst_42 : f32 to vector<2x256xf32>
    %143 = arith.addf %142, %141 : vector<2x256xf32>
    %144 = arith.divf %142, %143 : vector<2x256xf32>
    %145 = vector.extract_strided_slice %144 {offsets = [0, 0], sizes = [2, 64], strides = [1, 1]} : vector<2x256xf32> to vector<2x64xf32>
    %146 = vector.extract_strided_slice %144 {offsets = [0, 64], sizes = [2, 64], strides = [1, 1]} : vector<2x256xf32> to vector<2x64xf32>
    %147 = vector.extract_strided_slice %124 {offsets = [0, 128], sizes = [2, 64], strides = [1, 1]} : vector<2x256xf32> to vector<2x64xf32>
    %148 = math.tanh %147 : vector<2x64xf32>
    %149 = vector.extract_strided_slice %144 {offsets = [0, 192], sizes = [2, 64], strides = [1, 1]} : vector<2x256xf32> to vector<2x64xf32>
    %150 = arith.mulf %146, %100 : vector<2x64xf32>
    %151 = arith.mulf %145, %148 : vector<2x64xf32>
    %152 = arith.addf %150, %151 : vector<2x64xf32>
    %153 = math.tanh %152 : vector<2x64xf32>
    %154 = arith.mulf %149, %153 : vector<2x64xf32>
    %155 = arith.index_cast %c2_i32 : i32 to index
    %c0_43 = arith.constant 0 : index
    %c0_44 = arith.constant 0 : index
    %156 = vector.load %arg4[%155, %c0_43, %c0_44] : memref<8x2x64xf32, #tpu.memory_space<vmem>>, vector<1x2x64xf32>
    %157 = vector.shape_cast %156 : vector<1x2x64xf32> to vector<2x64xf32>
    %158 = vector.shape_cast %139 : vector<2x64xf32> to vector<1x2x64xf32>
    tpu.vector_store %arg4[%155, %c0_43, %c0_44], %158 {strides = array<i32>} : memref<8x2x64xf32, #tpu.memory_space<vmem>>, vector<1x2x64xf32>,
    %c7_i32_45 = arith.constant 7 : i32
    %159 = arith.subi %c7_i32_45, %c2_i32 : i32
    %160 = arith.index_cast %159 : i32 to index
    %c0_46 = arith.constant 0 : index
    %c0_47 = arith.constant 0 : index
    %161 = vector.load %arg5[%160, %c0_46, %c0_47] : memref<8x2x64xf32, #tpu.memory_space<vmem>>, vector<1x2x64xf32>
    %162 = vector.shape_cast %161 : vector<1x2x64xf32> to vector<2x64xf32>
    %163 = vector.shape_cast %154 : vector<2x64xf32> to vector<1x2x64xf32>
    tpu.vector_store %arg5[%160, %c0_46, %c0_47], %163 {strides = array<i32>} : memref<8x2x64xf32, #tpu.memory_space<vmem>>, vector<1x2x64xf32>,
    %c3_i32 = arith.constant 3 : i32
    %164 = tpu.concatenate %139, %154 in 1 : vector<2x64xf32>, vector<2x64xf32> -> vector<2x128xf32>
    %cst_48 = arith.constant dense<0.000000e+00> : vector<2x512xf32>
    %165 = tpu.matmul %164, %3, %cst_48 {dimension_numbers = #tpu.dot_dimension_numbers<[1], [0], [0], [1], [0, 0, 1, 1], [], []>} : vector<2x128xf32>, vector<128x512xf32>, vector<2x512xf32> -> vector<2x512xf32>
    %166 = vector.extract_strided_slice %165 {offsets = [0, 0], sizes = [2, 256], strides = [1, 1]} : vector<2x512xf32> to vector<2x256xf32>
    %167 = arith.index_cast %c3_i32 : i32 to index
    %c0_49 = arith.constant 0 : index
    %c0_50 = arith.constant 0 : index
    %168 = vector.load %arg1[%167, %c0_49, %c0_50] : memref<8x2x256xf32, #tpu.memory_space<vmem>>, vector<1x2x256xf32>
    %169 = vector.shape_cast %168 : vector<1x2x256xf32> to vector<2x256xf32>
    %170 = arith.addf %166, %169 : vector<2x256xf32>
    %171 = vector.extract_strided_slice %165 {offsets = [0, 256], sizes = [2, 256], strides = [1, 1]} : vector<2x512xf32> to vector<2x256xf32>
    %c7_i32_51 = arith.constant 7 : i32
    %172 = arith.subi %c7_i32_51, %c3_i32 : i32
    %173 = arith.index_cast %172 : i32 to index
    %c0_52 = arith.constant 0 : index
    %c0_53 = arith.constant 0 : index
    %174 = vector.load %arg2[%173, %c0_52, %c0_53] : memref<8x2x256xf32, #tpu.memory_space<vmem>>, vector<1x2x256xf32>
    %175 = vector.shape_cast %174 : vector<1x2x256xf32> to vector<2x256xf32>
    %176 = arith.addf %171, %175 : vector<2x256xf32>
    %177 = arith.negf %170 : vector<2x256xf32>
    %178 = math.exp %177 : vector<2x256xf32>
    %cst_54 = arith.constant 1.000000e+00 : f32
    %179 = vector.broadcast %cst_54 : f32 to vector<2x256xf32>
    %180 = arith.addf %179, %178 : vector<2x256xf32>
    %181 = arith.divf %179, %180 : vector<2x256xf32>
    %182 = vector.extract_strided_slice %181 {offsets = [0, 0], sizes = [2, 64], strides = [1, 1]} : vector<2x256xf32> to vector<2x64xf32>
    %183 = vector.extract_strided_slice %181 {offsets = [0, 64], sizes = [2, 64], strides = [1, 1]} : vector<2x256xf32> to vector<2x64xf32>
    %184 = vector.extract_strided_slice %170 {offsets = [0, 128], sizes = [2, 64], strides = [1, 1]} : vector<2x256xf32> to vector<2x64xf32>
    %185 = math.tanh %184 : vector<2x64xf32>
    %186 = vector.extract_strided_slice %181 {offsets = [0, 192], sizes = [2, 64], strides = [1, 1]} : vector<2x256xf32> to vector<2x64xf32>
    %187 = arith.mulf %183, %137 : vector<2x64xf32>
    %188 = arith.mulf %182, %185 : vector<2x64xf32>
    %189 = arith.addf %187, %188 : vector<2x64xf32>
    %190 = math.tanh %189 : vector<2x64xf32>
    %191 = arith.mulf %186, %190 : vector<2x64xf32>
    %192 = arith.negf %176 : vector<2x256xf32>
    %193 = math.exp %192 : vector<2x256xf32>
    %cst_55 = arith.constant 1.000000e+00 : f32
    %194 = vector.broadcast %cst_55 : f32 to vector<2x256xf32>
    %195 = arith.addf %194, %193 : vector<2x256xf32>
    %196 = arith.divf %194, %195 : vector<2x256xf32>
    %197 = vector.extract_strided_slice %196 {offsets = [0, 0], sizes = [2, 64], strides = [1, 1]} : vector<2x256xf32> to vector<2x64xf32>
    %198 = vector.extract_strided_slice %196 {offsets = [0, 64], sizes = [2, 64], strides = [1, 1]} : vector<2x256xf32> to vector<2x64xf32>
    %199 = vector.extract_strided_slice %176 {offsets = [0, 128], sizes = [2, 64], strides = [1, 1]} : vector<2x256xf32> to vector<2x64xf32>
    %200 = math.tanh %199 : vector<2x64xf32>
    %201 = vector.extract_strided_slice %196 {offsets = [0, 192], sizes = [2, 64], strides = [1, 1]} : vector<2x256xf32> to vector<2x64xf32>
    %202 = arith.mulf %198, %152 : vector<2x64xf32>
    %203 = arith.mulf %197, %200 : vector<2x64xf32>
    %204 = arith.addf %202, %203 : vector<2x64xf32>
    %205 = math.tanh %204 : vector<2x64xf32>
    %206 = arith.mulf %201, %205 : vector<2x64xf32>
    %207 = arith.index_cast %c3_i32 : i32 to index
    %c0_56 = arith.constant 0 : index
    %c0_57 = arith.constant 0 : index
    %208 = vector.load %arg4[%207, %c0_56, %c0_57] : memref<8x2x64xf32, #tpu.memory_space<vmem>>, vector<1x2x64xf32>
    %209 = vector.shape_cast %208 : vector<1x2x64xf32> to vector<2x64xf32>
    %210 = vector.shape_cast %191 : vector<2x64xf32> to vector<1x2x64xf32>
    tpu.vector_store %arg4[%207, %c0_56, %c0_57], %210 {strides = array<i32>} : memref<8x2x64xf32, #tpu.memory_space<vmem>>, vector<1x2x64xf32>,
    %c7_i32_58 = arith.constant 7 : i32
    %211 = arith.subi %c7_i32_58, %c3_i32 : i32
    %212 = arith.index_cast %211 : i32 to index
    %c0_59 = arith.constant 0 : index
    %c0_60 = arith.constant 0 : index
    %213 = vector.load %arg5[%212, %c0_59, %c0_60] : memref<8x2x64xf32, #tpu.memory_space<vmem>>, vector<1x2x64xf32>
    %214 = vector.shape_cast %213 : vector<1x2x64xf32> to vector<2x64xf32>
    %215 = vector.shape_cast %206 : vector<2x64xf32> to vector<1x2x64xf32>
    tpu.vector_store %arg5[%212, %c0_59, %c0_60], %215 {strides = array<i32>} : memref<8x2x64xf32, #tpu.memory_space<vmem>>, vector<1x2x64xf32>,
    %c4_i32 = arith.constant 4 : i32
    %216 = tpu.concatenate %191, %206 in 1 : vector<2x64xf32>, vector<2x64xf32> -> vector<2x128xf32>
    %cst_61 = arith.constant dense<0.000000e+00> : vector<2x512xf32>
    %217 = tpu.matmul %216, %3, %cst_61 {dimension_numbers = #tpu.dot_dimension_numbers<[1], [0], [0], [1], [0, 0, 1, 1], [], []>} : vector<2x128xf32>, vector<128x512xf32>, vector<2x512xf32> -> vector<2x512xf32>
    %218 = vector.extract_strided_slice %217 {offsets = [0, 0], sizes = [2, 256], strides = [1, 1]} : vector<2x512xf32> to vector<2x256xf32>
    %219 = arith.index_cast %c4_i32 : i32 to index
    %c0_62 = arith.constant 0 : index
    %c0_63 = arith.constant 0 : index
    %220 = vector.load %arg1[%219, %c0_62, %c0_63] : memref<8x2x256xf32, #tpu.memory_space<vmem>>, vector<1x2x256xf32>
    %221 = vector.shape_cast %220 : vector<1x2x256xf32> to vector<2x256xf32>
    %222 = arith.addf %218, %221 : vector<2x256xf32>
    %223 = vector.extract_strided_slice %217 {offsets = [0, 256], sizes = [2, 256], strides = [1, 1]} : vector<2x512xf32> to vector<2x256xf32>
    %c7_i32_64 = arith.constant 7 : i32
    %224 = arith.subi %c7_i32_64, %c4_i32 : i32
    %225 = arith.index_cast %224 : i32 to index
    %c0_65 = arith.constant 0 : index
    %c0_66 = arith.constant 0 : index
    %226 = vector.load %arg2[%225, %c0_65, %c0_66] : memref<8x2x256xf32, #tpu.memory_space<vmem>>, vector<1x2x256xf32>
    %227 = vector.shape_cast %226 : vector<1x2x256xf32> to vector<2x256xf32>
    %228 = arith.addf %223, %227 : vector<2x256xf32>
    %229 = arith.negf %222 : vector<2x256xf32>
    %230 = math.exp %229 : vector<2x256xf32>
    %cst_67 = arith.constant 1.000000e+00 : f32
    %231 = vector.broadcast %cst_67 : f32 to vector<2x256xf32>
    %232 = arith.addf %231, %230 : vector<2x256xf32>
    %233 = arith.divf %231, %232 : vector<2x256xf32>
    %234 = vector.extract_strided_slice %233 {offsets = [0, 0], sizes = [2, 64], strides = [1, 1]} : vector<2x256xf32> to vector<2x64xf32>
    %235 = vector.extract_strided_slice %233 {offsets = [0, 64], sizes = [2, 64], strides = [1, 1]} : vector<2x256xf32> to vector<2x64xf32>
    %236 = vector.extract_strided_slice %222 {offsets = [0, 128], sizes = [2, 64], strides = [1, 1]} : vector<2x256xf32> to vector<2x64xf32>
    %237 = math.tanh %236 : vector<2x64xf32>
    %238 = vector.extract_strided_slice %233 {offsets = [0, 192], sizes = [2, 64], strides = [1, 1]} : vector<2x256xf32> to vector<2x64xf32>
    %239 = arith.mulf %235, %189 : vector<2x64xf32>
    %240 = arith.mulf %234, %237 : vector<2x64xf32>
    %241 = arith.addf %239, %240 : vector<2x64xf32>
    %242 = math.tanh %241 : vector<2x64xf32>
    %243 = arith.mulf %238, %242 : vector<2x64xf32>
    %244 = arith.negf %228 : vector<2x256xf32>
    %245 = math.exp %244 : vector<2x256xf32>
    %cst_68 = arith.constant 1.000000e+00 : f32
    %246 = vector.broadcast %cst_68 : f32 to vector<2x256xf32>
    %247 = arith.addf %246, %245 : vector<2x256xf32>
    %248 = arith.divf %246, %247 : vector<2x256xf32>
    %249 = vector.extract_strided_slice %248 {offsets = [0, 0], sizes = [2, 64], strides = [1, 1]} : vector<2x256xf32> to vector<2x64xf32>
    %250 = vector.extract_strided_slice %248 {offsets = [0, 64], sizes = [2, 64], strides = [1, 1]} : vector<2x256xf32> to vector<2x64xf32>
    %251 = vector.extract_strided_slice %228 {offsets = [0, 128], sizes = [2, 64], strides = [1, 1]} : vector<2x256xf32> to vector<2x64xf32>
    %252 = math.tanh %251 : vector<2x64xf32>
    %253 = vector.extract_strided_slice %248 {offsets = [0, 192], sizes = [2, 64], strides = [1, 1]} : vector<2x256xf32> to vector<2x64xf32>
    %254 = arith.mulf %250, %204 : vector<2x64xf32>
    %255 = arith.mulf %249, %252 : vector<2x64xf32>
    %256 = arith.addf %254, %255 : vector<2x64xf32>
    %257 = math.tanh %256 : vector<2x64xf32>
    %258 = arith.mulf %253, %257 : vector<2x64xf32>
    %259 = arith.index_cast %c4_i32 : i32 to index
    %c0_69 = arith.constant 0 : index
    %c0_70 = arith.constant 0 : index
    %260 = vector.load %arg4[%259, %c0_69, %c0_70] : memref<8x2x64xf32, #tpu.memory_space<vmem>>, vector<1x2x64xf32>
    %261 = vector.shape_cast %260 : vector<1x2x64xf32> to vector<2x64xf32>
    %262 = vector.shape_cast %243 : vector<2x64xf32> to vector<1x2x64xf32>
    tpu.vector_store %arg4[%259, %c0_69, %c0_70], %262 {strides = array<i32>} : memref<8x2x64xf32, #tpu.memory_space<vmem>>, vector<1x2x64xf32>,
    %c7_i32_71 = arith.constant 7 : i32
    %263 = arith.subi %c7_i32_71, %c4_i32 : i32
    %264 = arith.index_cast %263 : i32 to index
    %c0_72 = arith.constant 0 : index
    %c0_73 = arith.constant 0 : index
    %265 = vector.load %arg5[%264, %c0_72, %c0_73] : memref<8x2x64xf32, #tpu.memory_space<vmem>>, vector<1x2x64xf32>
    %266 = vector.shape_cast %265 : vector<1x2x64xf32> to vector<2x64xf32>
    %267 = vector.shape_cast %258 : vector<2x64xf32> to vector<1x2x64xf32>
    tpu.vector_store %arg5[%264, %c0_72, %c0_73], %267 {strides = array<i32>} : memref<8x2x64xf32, #tpu.memory_space<vmem>>, vector<1x2x64xf32>,
    %c5_i32 = arith.constant 5 : i32
    %268 = tpu.concatenate %243, %258 in 1 : vector<2x64xf32>, vector<2x64xf32> -> vector<2x128xf32>
    %cst_74 = arith.constant dense<0.000000e+00> : vector<2x512xf32>
    %269 = tpu.matmul %268, %3, %cst_74 {dimension_numbers = #tpu.dot_dimension_numbers<[1], [0], [0], [1], [0, 0, 1, 1], [], []>} : vector<2x128xf32>, vector<128x512xf32>, vector<2x512xf32> -> vector<2x512xf32>
    %270 = vector.extract_strided_slice %269 {offsets = [0, 0], sizes = [2, 256], strides = [1, 1]} : vector<2x512xf32> to vector<2x256xf32>
    %271 = arith.index_cast %c5_i32 : i32 to index
    %c0_75 = arith.constant 0 : index
    %c0_76 = arith.constant 0 : index
    %272 = vector.load %arg1[%271, %c0_75, %c0_76] : memref<8x2x256xf32, #tpu.memory_space<vmem>>, vector<1x2x256xf32>
    %273 = vector.shape_cast %272 : vector<1x2x256xf32> to vector<2x256xf32>
    %274 = arith.addf %270, %273 : vector<2x256xf32>
    %275 = vector.extract_strided_slice %269 {offsets = [0, 256], sizes = [2, 256], strides = [1, 1]} : vector<2x512xf32> to vector<2x256xf32>
    %c7_i32_77 = arith.constant 7 : i32
    %276 = arith.subi %c7_i32_77, %c5_i32 : i32
    %277 = arith.index_cast %276 : i32 to index
    %c0_78 = arith.constant 0 : index
    %c0_79 = arith.constant 0 : index
    %278 = vector.load %arg2[%277, %c0_78, %c0_79] : memref<8x2x256xf32, #tpu.memory_space<vmem>>, vector<1x2x256xf32>
    %279 = vector.shape_cast %278 : vector<1x2x256xf32> to vector<2x256xf32>
    %280 = arith.addf %275, %279 : vector<2x256xf32>
    %281 = arith.negf %274 : vector<2x256xf32>
    %282 = math.exp %281 : vector<2x256xf32>
    %cst_80 = arith.constant 1.000000e+00 : f32
    %283 = vector.broadcast %cst_80 : f32 to vector<2x256xf32>
    %284 = arith.addf %283, %282 : vector<2x256xf32>
    %285 = arith.divf %283, %284 : vector<2x256xf32>
    %286 = vector.extract_strided_slice %285 {offsets = [0, 0], sizes = [2, 64], strides = [1, 1]} : vector<2x256xf32> to vector<2x64xf32>
    %287 = vector.extract_strided_slice %285 {offsets = [0, 64], sizes = [2, 64], strides = [1, 1]} : vector<2x256xf32> to vector<2x64xf32>
    %288 = vector.extract_strided_slice %274 {offsets = [0, 128], sizes = [2, 64], strides = [1, 1]} : vector<2x256xf32> to vector<2x64xf32>
    %289 = math.tanh %288 : vector<2x64xf32>
    %290 = vector.extract_strided_slice %285 {offsets = [0, 192], sizes = [2, 64], strides = [1, 1]} : vector<2x256xf32> to vector<2x64xf32>
    %291 = arith.mulf %287, %241 : vector<2x64xf32>
    %292 = arith.mulf %286, %289 : vector<2x64xf32>
    %293 = arith.addf %291, %292 : vector<2x64xf32>
    %294 = math.tanh %293 : vector<2x64xf32>
    %295 = arith.mulf %290, %294 : vector<2x64xf32>
    %296 = arith.negf %280 : vector<2x256xf32>
    %297 = math.exp %296 : vector<2x256xf32>
    %cst_81 = arith.constant 1.000000e+00 : f32
    %298 = vector.broadcast %cst_81 : f32 to vector<2x256xf32>
    %299 = arith.addf %298, %297 : vector<2x256xf32>
    %300 = arith.divf %298, %299 : vector<2x256xf32>
    %301 = vector.extract_strided_slice %300 {offsets = [0, 0], sizes = [2, 64], strides = [1, 1]} : vector<2x256xf32> to vector<2x64xf32>
    %302 = vector.extract_strided_slice %300 {offsets = [0, 64], sizes = [2, 64], strides = [1, 1]} : vector<2x256xf32> to vector<2x64xf32>
    %303 = vector.extract_strided_slice %280 {offsets = [0, 128], sizes = [2, 64], strides = [1, 1]} : vector<2x256xf32> to vector<2x64xf32>
    %304 = math.tanh %303 : vector<2x64xf32>
    %305 = vector.extract_strided_slice %300 {offsets = [0, 192], sizes = [2, 64], strides = [1, 1]} : vector<2x256xf32> to vector<2x64xf32>
    %306 = arith.mulf %302, %256 : vector<2x64xf32>
    %307 = arith.mulf %301, %304 : vector<2x64xf32>
    %308 = arith.addf %306, %307 : vector<2x64xf32>
    %309 = math.tanh %308 : vector<2x64xf32>
    %310 = arith.mulf %305, %309 : vector<2x64xf32>
    %311 = arith.index_cast %c5_i32 : i32 to index
    %c0_82 = arith.constant 0 : index
    %c0_83 = arith.constant 0 : index
    %312 = vector.load %arg4[%311, %c0_82, %c0_83] : memref<8x2x64xf32, #tpu.memory_space<vmem>>, vector<1x2x64xf32>
    %313 = vector.shape_cast %312 : vector<1x2x64xf32> to vector<2x64xf32>
    %314 = vector.shape_cast %295 : vector<2x64xf32> to vector<1x2x64xf32>
    tpu.vector_store %arg4[%311, %c0_82, %c0_83], %314 {strides = array<i32>} : memref<8x2x64xf32, #tpu.memory_space<vmem>>, vector<1x2x64xf32>,
    %c7_i32_84 = arith.constant 7 : i32
    %315 = arith.subi %c7_i32_84, %c5_i32 : i32
    %316 = arith.index_cast %315 : i32 to index
    %c0_85 = arith.constant 0 : index
    %c0_86 = arith.constant 0 : index
    %317 = vector.load %arg5[%316, %c0_85, %c0_86] : memref<8x2x64xf32, #tpu.memory_space<vmem>>, vector<1x2x64xf32>
    %318 = vector.shape_cast %317 : vector<1x2x64xf32> to vector<2x64xf32>
    %319 = vector.shape_cast %310 : vector<2x64xf32> to vector<1x2x64xf32>
    tpu.vector_store %arg5[%316, %c0_85, %c0_86], %319 {strides = array<i32>} : memref<8x2x64xf32, #tpu.memory_space<vmem>>, vector<1x2x64xf32>,
    %c6_i32 = arith.constant 6 : i32
    %320 = tpu.concatenate %295, %310 in 1 : vector<2x64xf32>, vector<2x64xf32> -> vector<2x128xf32>
    %cst_87 = arith.constant dense<0.000000e+00> : vector<2x512xf32>
    %321 = tpu.matmul %320, %3, %cst_87 {dimension_numbers = #tpu.dot_dimension_numbers<[1], [0], [0], [1], [0, 0, 1, 1], [], []>} : vector<2x128xf32>, vector<128x512xf32>, vector<2x512xf32> -> vector<2x512xf32>
    %322 = vector.extract_strided_slice %321 {offsets = [0, 0], sizes = [2, 256], strides = [1, 1]} : vector<2x512xf32> to vector<2x256xf32>
    %323 = arith.index_cast %c6_i32 : i32 to index
    %c0_88 = arith.constant 0 : index
    %c0_89 = arith.constant 0 : index
    %324 = vector.load %arg1[%323, %c0_88, %c0_89] : memref<8x2x256xf32, #tpu.memory_space<vmem>>, vector<1x2x256xf32>
    %325 = vector.shape_cast %324 : vector<1x2x256xf32> to vector<2x256xf32>
    %326 = arith.addf %322, %325 : vector<2x256xf32>
    %327 = vector.extract_strided_slice %321 {offsets = [0, 256], sizes = [2, 256], strides = [1, 1]} : vector<2x512xf32> to vector<2x256xf32>
    %c7_i32_90 = arith.constant 7 : i32
    %328 = arith.subi %c7_i32_90, %c6_i32 : i32
    %329 = arith.index_cast %328 : i32 to index
    %c0_91 = arith.constant 0 : index
    %c0_92 = arith.constant 0 : index
    %330 = vector.load %arg2[%329, %c0_91, %c0_92] : memref<8x2x256xf32, #tpu.memory_space<vmem>>, vector<1x2x256xf32>
    %331 = vector.shape_cast %330 : vector<1x2x256xf32> to vector<2x256xf32>
    %332 = arith.addf %327, %331 : vector<2x256xf32>
    %333 = arith.negf %326 : vector<2x256xf32>
    %334 = math.exp %333 : vector<2x256xf32>
    %cst_93 = arith.constant 1.000000e+00 : f32
    %335 = vector.broadcast %cst_93 : f32 to vector<2x256xf32>
    %336 = arith.addf %335, %334 : vector<2x256xf32>
    %337 = arith.divf %335, %336 : vector<2x256xf32>
    %338 = vector.extract_strided_slice %337 {offsets = [0, 0], sizes = [2, 64], strides = [1, 1]} : vector<2x256xf32> to vector<2x64xf32>
    %339 = vector.extract_strided_slice %337 {offsets = [0, 64], sizes = [2, 64], strides = [1, 1]} : vector<2x256xf32> to vector<2x64xf32>
    %340 = vector.extract_strided_slice %326 {offsets = [0, 128], sizes = [2, 64], strides = [1, 1]} : vector<2x256xf32> to vector<2x64xf32>
    %341 = math.tanh %340 : vector<2x64xf32>
    %342 = vector.extract_strided_slice %337 {offsets = [0, 192], sizes = [2, 64], strides = [1, 1]} : vector<2x256xf32> to vector<2x64xf32>
    %343 = arith.mulf %339, %293 : vector<2x64xf32>
    %344 = arith.mulf %338, %341 : vector<2x64xf32>
    %345 = arith.addf %343, %344 : vector<2x64xf32>
    %346 = math.tanh %345 : vector<2x64xf32>
    %347 = arith.mulf %342, %346 : vector<2x64xf32>
    %348 = arith.negf %332 : vector<2x256xf32>
    %349 = math.exp %348 : vector<2x256xf32>
    %cst_94 = arith.constant 1.000000e+00 : f32
    %350 = vector.broadcast %cst_94 : f32 to vector<2x256xf32>
    %351 = arith.addf %350, %349 : vector<2x256xf32>
    %352 = arith.divf %350, %351 : vector<2x256xf32>
    %353 = vector.extract_strided_slice %352 {offsets = [0, 0], sizes = [2, 64], strides = [1, 1]} : vector<2x256xf32> to vector<2x64xf32>
    %354 = vector.extract_strided_slice %352 {offsets = [0, 64], sizes = [2, 64], strides = [1, 1]} : vector<2x256xf32> to vector<2x64xf32>
    %355 = vector.extract_strided_slice %332 {offsets = [0, 128], sizes = [2, 64], strides = [1, 1]} : vector<2x256xf32> to vector<2x64xf32>
    %356 = math.tanh %355 : vector<2x64xf32>
    %357 = vector.extract_strided_slice %352 {offsets = [0, 192], sizes = [2, 64], strides = [1, 1]} : vector<2x256xf32> to vector<2x64xf32>
    %358 = arith.mulf %354, %308 : vector<2x64xf32>
    %359 = arith.mulf %353, %356 : vector<2x64xf32>
    %360 = arith.addf %358, %359 : vector<2x64xf32>
    %361 = math.tanh %360 : vector<2x64xf32>
    %362 = arith.mulf %357, %361 : vector<2x64xf32>
    %363 = arith.index_cast %c6_i32 : i32 to index
    %c0_95 = arith.constant 0 : index
    %c0_96 = arith.constant 0 : index
    %364 = vector.load %arg4[%363, %c0_95, %c0_96] : memref<8x2x64xf32, #tpu.memory_space<vmem>>, vector<1x2x64xf32>
    %365 = vector.shape_cast %364 : vector<1x2x64xf32> to vector<2x64xf32>
    %366 = vector.shape_cast %347 : vector<2x64xf32> to vector<1x2x64xf32>
    tpu.vector_store %arg4[%363, %c0_95, %c0_96], %366 {strides = array<i32>} : memref<8x2x64xf32, #tpu.memory_space<vmem>>, vector<1x2x64xf32>,
    %c7_i32_97 = arith.constant 7 : i32
    %367 = arith.subi %c7_i32_97, %c6_i32 : i32
    %368 = arith.index_cast %367 : i32 to index
    %c0_98 = arith.constant 0 : index
    %c0_99 = arith.constant 0 : index
    %369 = vector.load %arg5[%368, %c0_98, %c0_99] : memref<8x2x64xf32, #tpu.memory_space<vmem>>, vector<1x2x64xf32>
    %370 = vector.shape_cast %369 : vector<1x2x64xf32> to vector<2x64xf32>
    %371 = vector.shape_cast %362 : vector<2x64xf32> to vector<1x2x64xf32>
    tpu.vector_store %arg5[%368, %c0_98, %c0_99], %371 {strides = array<i32>} : memref<8x2x64xf32, #tpu.memory_space<vmem>>, vector<1x2x64xf32>,
    %c7_i32_100 = arith.constant 7 : i32
    %372 = tpu.concatenate %347, %362 in 1 : vector<2x64xf32>, vector<2x64xf32> -> vector<2x128xf32>
    %cst_101 = arith.constant dense<0.000000e+00> : vector<2x512xf32>
    %373 = tpu.matmul %372, %3, %cst_101 {dimension_numbers = #tpu.dot_dimension_numbers<[1], [0], [0], [1], [0, 0, 1, 1], [], []>} : vector<2x128xf32>, vector<128x512xf32>, vector<2x512xf32> -> vector<2x512xf32>
    %374 = vector.extract_strided_slice %373 {offsets = [0, 0], sizes = [2, 256], strides = [1, 1]} : vector<2x512xf32> to vector<2x256xf32>
    %375 = arith.index_cast %c7_i32_100 : i32 to index
    %c0_102 = arith.constant 0 : index
    %c0_103 = arith.constant 0 : index
    %376 = vector.load %arg1[%375, %c0_102, %c0_103] : memref<8x2x256xf32, #tpu.memory_space<vmem>>, vector<1x2x256xf32>
    %377 = vector.shape_cast %376 : vector<1x2x256xf32> to vector<2x256xf32>
    %378 = arith.addf %374, %377 : vector<2x256xf32>
    %379 = vector.extract_strided_slice %373 {offsets = [0, 256], sizes = [2, 256], strides = [1, 1]} : vector<2x512xf32> to vector<2x256xf32>
    %c7_i32_104 = arith.constant 7 : i32
    %380 = arith.subi %c7_i32_104, %c7_i32_100 : i32
    %381 = arith.index_cast %380 : i32 to index
    %c0_105 = arith.constant 0 : index
    %c0_106 = arith.constant 0 : index
    %382 = vector.load %arg2[%381, %c0_105, %c0_106] : memref<8x2x256xf32, #tpu.memory_space<vmem>>, vector<1x2x256xf32>
    %383 = vector.shape_cast %382 : vector<1x2x256xf32> to vector<2x256xf32>
    %384 = arith.addf %379, %383 : vector<2x256xf32>
    %385 = arith.negf %378 : vector<2x256xf32>
    %386 = math.exp %385 : vector<2x256xf32>
    %cst_107 = arith.constant 1.000000e+00 : f32
    %387 = vector.broadcast %cst_107 : f32 to vector<2x256xf32>
    %388 = arith.addf %387, %386 : vector<2x256xf32>
    %389 = arith.divf %387, %388 : vector<2x256xf32>
    %390 = vector.extract_strided_slice %389 {offsets = [0, 0], sizes = [2, 64], strides = [1, 1]} : vector<2x256xf32> to vector<2x64xf32>
    %391 = vector.extract_strided_slice %389 {offsets = [0, 64], sizes = [2, 64], strides = [1, 1]} : vector<2x256xf32> to vector<2x64xf32>
    %392 = vector.extract_strided_slice %378 {offsets = [0, 128], sizes = [2, 64], strides = [1, 1]} : vector<2x256xf32> to vector<2x64xf32>
    %393 = math.tanh %392 : vector<2x64xf32>
    %394 = vector.extract_strided_slice %389 {offsets = [0, 192], sizes = [2, 64], strides = [1, 1]} : vector<2x256xf32> to vector<2x64xf32>
    %395 = arith.mulf %391, %345 : vector<2x64xf32>
    %396 = arith.mulf %390, %393 : vector<2x64xf32>
    %397 = arith.addf %395, %396 : vector<2x64xf32>
    %398 = math.tanh %397 : vector<2x64xf32>
    %399 = arith.mulf %394, %398 : vector<2x64xf32>
    %400 = arith.negf %384 : vector<2x256xf32>
    %401 = math.exp %400 : vector<2x256xf32>
    %cst_108 = arith.constant 1.000000e+00 : f32
    %402 = vector.broadcast %cst_108 : f32 to vector<2x256xf32>
    %403 = arith.addf %402, %401 : vector<2x256xf32>
    %404 = arith.divf %402, %403 : vector<2x256xf32>
    %405 = vector.extract_strided_slice %404 {offsets = [0, 0], sizes = [2, 64], strides = [1, 1]} : vector<2x256xf32> to vector<2x64xf32>
    %406 = vector.extract_strided_slice %404 {offsets = [0, 64], sizes = [2, 64], strides = [1, 1]} : vector<2x256xf32> to vector<2x64xf32>
    %407 = vector.extract_strided_slice %384 {offsets = [0, 128], sizes = [2, 64], strides = [1, 1]} : vector<2x256xf32> to vector<2x64xf32>
    %408 = math.tanh %407 : vector<2x64xf32>
    %409 = vector.extract_strided_slice %404 {offsets = [0, 192], sizes = [2, 64], strides = [1, 1]} : vector<2x256xf32> to vector<2x64xf32>
    %410 = arith.mulf %406, %360 : vector<2x64xf32>
    %411 = arith.mulf %405, %408 : vector<2x64xf32>
    %412 = arith.addf %410, %411 : vector<2x64xf32>
    %413 = math.tanh %412 : vector<2x64xf32>
    %414 = arith.mulf %409, %413 : vector<2x64xf32>
    %415 = arith.index_cast %c7_i32_100 : i32 to index
    %c0_109 = arith.constant 0 : index
    %c0_110 = arith.constant 0 : index
    %416 = vector.load %arg4[%415, %c0_109, %c0_110] : memref<8x2x64xf32, #tpu.memory_space<vmem>>, vector<1x2x64xf32>
    %417 = vector.shape_cast %416 : vector<1x2x64xf32> to vector<2x64xf32>
    %418 = vector.shape_cast %399 : vector<2x64xf32> to vector<1x2x64xf32>
    tpu.vector_store %arg4[%415, %c0_109, %c0_110], %418 {strides = array<i32>} : memref<8x2x64xf32, #tpu.memory_space<vmem>>, vector<1x2x64xf32>,
    %c7_i32_111 = arith.constant 7 : i32
    %419 = arith.subi %c7_i32_111, %c7_i32_100 : i32
    %420 = arith.index_cast %419 : i32 to index
    %c0_112 = arith.constant 0 : index
    %c0_113 = arith.constant 0 : index
    %421 = vector.load %arg5[%420, %c0_112, %c0_113] : memref<8x2x64xf32, #tpu.memory_space<vmem>>, vector<1x2x64xf32>
    %422 = vector.shape_cast %421 : vector<1x2x64xf32> to vector<2x64xf32>
    %423 = vector.shape_cast %414 : vector<2x64xf32> to vector<1x2x64xf32>
    tpu.vector_store %arg5[%420, %c0_112, %c0_113], %423 {strides = array<i32>} : memref<8x2x64xf32, #tpu.memory_space<vmem>>, vector<1x2x64xf32>,
    %c8_i32 = arith.constant 8 : i32
    %c0_114 = arith.constant 0 : index
    %c0_115 = arith.constant 0 : index
    %424 = vector.load %arg7[%c0_114, %c0_115] : memref<2x64xf32, #tpu.memory_space<vmem>>, vector<2x64xf32>
    tpu.vector_store %arg7[%c0_114, %c0_115], %399 {strides = array<i32>} : memref<2x64xf32, #tpu.memory_space<vmem>>, vector<2x64xf32>,
    %c0_116 = arith.constant 0 : index
    %c0_117 = arith.constant 0 : index
    %425 = vector.load %arg8[%c0_116, %c0_117] : memref<2x64xf32, #tpu.memory_space<vmem>>, vector<2x64xf32>
    tpu.vector_store %arg8[%c0_116, %c0_117], %397 {strides = array<i32>} : memref<2x64xf32, #tpu.memory_space<vmem>>, vector<2x64xf32>,
    %c0_118 = arith.constant 0 : index
    %c0_119 = arith.constant 0 : index
    %426 = vector.load %arg9[%c0_118, %c0_119] : memref<2x64xf32, #tpu.memory_space<vmem>>, vector<2x64xf32>
    tpu.vector_store %arg9[%c0_118, %c0_119], %414 {strides = array<i32>} : memref<2x64xf32, #tpu.memory_space<vmem>>, vector<2x64xf32>,
    %c0_120 = arith.constant 0 : index
    %c0_121 = arith.constant 0 : index
    %427 = vector.load %arg10[%c0_120, %c0_121] : memref<2x64xf32, #tpu.memory_space<vmem>>, vector<2x64xf32>
    tpu.vector_store %arg10[%c0_120, %c0_121], %412 {strides = array<i32>} : memref<2x64xf32, #tpu.memory_space<vmem>>, vector<2x64xf32>,
    %c0_i32_122 = arith.constant 0 : i32
    %428 = arith.cmpi eq, %arg0, %c0_i32_122 : i32
    %429 = arith.extui %428 : i1 to i32
    %c0_i32_123 = arith.constant 0 : i32
    %430 = arith.cmpi ne, %429, %c0_i32_123 : i32
    scf.if %430 {
      %c0_124 = arith.constant 0 : index
      %c0_125 = arith.constant 0 : index
      %c0_126 = arith.constant 0 : index
      %431 = vector.load %arg6[%c0_124, %c0_125, %c0_126] : memref<2x2x64xf32, #tpu.memory_space<vmem>>, vector<1x2x64xf32>
      %432 = vector.shape_cast %431 : vector<1x2x64xf32> to vector<2x64xf32>
      %433 = vector.shape_cast %399 : vector<2x64xf32> to vector<1x2x64xf32>
      tpu.vector_store %arg6[%c0_124, %c0_125, %c0_126], %433 {strides = array<i32>} : memref<2x2x64xf32, #tpu.memory_space<vmem>>, vector<1x2x64xf32>,
      %c1 = arith.constant 1 : index
      %c0_127 = arith.constant 0 : index
      %c0_128 = arith.constant 0 : index
      %434 = vector.load %arg6[%c1, %c0_127, %c0_128] : memref<2x2x64xf32, #tpu.memory_space<vmem>>, vector<1x2x64xf32>
      %435 = vector.shape_cast %434 : vector<1x2x64xf32> to vector<2x64xf32>
      %436 = vector.shape_cast %414 : vector<2x64xf32> to vector<1x2x64xf32>
      tpu.vector_store %arg6[%c1, %c0_127, %c0_128], %436 {strides = array<i32>} : memref<2x2x64xf32, #tpu.memory_space<vmem>>, vector<1x2x64xf32>,
    } else {
    }
    return
  }
  func.func @transform_0(%arg0: i32) -> (i32, i32, i32) {
    %c0_i32 = arith.constant 0 : i32
    %c0_i32_0 = arith.constant 0 : i32
    %c0_i32_1 = arith.constant 0 : i32
    return %arg0, %c0_i32, %c0_i32_0 : i32, i32, i32
  }
  func.func @transform_1(%arg0: i32) -> (i32, i32, i32) {
    %c0_i32 = arith.constant 0 : i32
    %0 = arith.subi %c0_i32, %arg0 : i32
    %c0_i32_0 = arith.constant 0 : i32
    %c1_i32 = arith.constant 1 : i32
    %c0_i32_1 = arith.constant 0 : i32
    return %0, %c0_i32_0, %c1_i32 : i32, i32, i32
  }
  func.func @transform_2(%arg0: i32) -> (i32, i32) {
    %c0_i32 = arith.constant 0 : i32
    %c0_i32_0 = arith.constant 0 : i32
    %c0_i32_1 = arith.constant 0 : i32
    return %c0_i32, %c0_i32_0 : i32, i32
  }
  func.func @transform_3(%arg0: i32) -> (i32, i32, i32) {
    %c0_i32 = arith.constant 0 : i32
    %c0_i32_0 = arith.constant 0 : i32
    %c0_i32_1 = arith.constant 0 : i32
    return %arg0, %c0_i32, %c0_i32_0 : i32, i32, i32
  }
  func.func @transform_4(%arg0: i32) -> (i32, i32, i32) {
    %c0_i32 = arith.constant 0 : i32
    %0 = arith.subi %c0_i32, %arg0 : i32
    %c0_i32_0 = arith.constant 0 : i32
    %c0_i32_1 = arith.constant 0 : i32
    %c0_i32_2 = arith.constant 0 : i32
    return %0, %c0_i32_0, %c0_i32_1 : i32, i32, i32
  }
  func.func @transform_5(%arg0: i32) -> (i32, i32, i32) {
    %c0_i32 = arith.constant 0 : i32
    %c0_i32_0 = arith.constant 0 : i32
    %c0_i32_1 = arith.constant 0 : i32
    %c0_i32_2 = arith.constant 0 : i32
    return %c0_i32, %c0_i32_0, %c0_i32_1 : i32, i32, i32
  }
}

</mosaic_0001>

<bundles_post_ra>
// kernel: detector_head_forward.2
= control target key start
LH: loop header
LB: loop body
LE: loop exit
PB: predicated region body
PF: predicated region fallthrough
CT: control target
= control target key end

     0   :  { %s503_s0 = inlined_call_operand.vmem [shape: f32[16,128], index: 0, kind: input, shape index: {}]   ;;  %s504_s1 = inlined_call_operand.hbm [shape: f32[128,512], index: 1, kind: input, shape index: {}]   ;;  %s505_s2 = inlined_call_operand.vmem [shape: f32[1,512], index: 2, kind: input, shape index: {}]   ;;  %s506_s3 = inlined_call_operand.vmem [shape: f32[128,1], index: 3, kind: input, shape index: {}]   ;;  %s507_s4 = inlined_call_operand.<no memory space> [shape: f32[1,1], index: 4, kind: input, shape index: {}]   ;;  %s508_s5 = inlined_call_operand.vmem [shape: f32[16,512], index: 5, kind: output, shape index: {0}]   ;;  %s509_s6 = inlined_call_operand.vmem [shape: f32[16,1], index: 6, kind: output, shape index: {1}]  }
   0x1   :  { %v12_v0 = vstv %s507_s4 }
   0x2   :  { %13 = vst [vmem:[#allocation2] sm:$0x1] %v12_v0 }
   0x3   :  { %14 = vsyncpa [#allocation4], 0  ;;  %s21_s25 = sshll.u32 %s504_s1, 4  ;;  %s365_s26 = smov [#allocation3]   ;;  %s22_s25 = int_to_ptr.hbm [resolvable:$true] %s21_s25 }
   0x4   :  { %s23_s27 = sshll.u32 %s365_s26, 4  ;;  %s366_s28 = smov 512   ;;  %s24_s27 = int_to_ptr.vmem [resolvable:$true] %s23_s27 }
   0x5   :  { %s367_s29 = smov 32  }
   0x6   :  { %29 = dma.hbm_to_vmem [thread:$0]  %s22_s25, 8192, %s24_s27, [#allocation4], %s366_s28, %s366_s28, %s367_s29  }
   0x7   :  { %363 = dma.done.wait [#allocation4], 8192  }
   0x8   :  { %364 = vsyncadd [#allocation4], 4294959104  ;;  %v102_v1 = vld [vmem:[#allocation3 + $0x1e0] sm:$0xff]  ;;  %v103_v2 = vld [vmem:[#allocation3 + $0x1e8] sm:$0xff]  ;;  %vm297_vm4 = vcmask 7168  }
   0x9   :  { %v98_v3 = vld [vmem:[#allocation3 + $0x1c0] sm:$0xff]  ;;  %116 = vmatpush.msra.mxu0 %v102_v1  ;;  %139 = vmatpush.msra.mxu1 %v103_v2  ;;  %v99_v4 = vld [vmem:[#allocation3 + $0x1c8] sm:$0xff]  ;;  %v104_v18 = vld [vmem:[#allocation3 + $0x1f0] sm:$0xff] }
   0xa   :  { %v94_v5 = vld [vmem:[#allocation3 + $0x1a0] sm:$0xff]  ;;  %v95_v6 = vld [vmem:[#allocation3 + $0x1a8] sm:$0xff]  ;;  %v105_v19 = vld [vmem:[#allocation3 + $0x1f8] sm:$0xff]  ;;  %162 = vmatpush.msra.mxu2 %v104_v18 }
   0xb   :  { %117 = vmatpush.msra.mxu0 %v98_v3  ;;  %140 = vmatpush.msra.mxu1 %v99_v4  ;;  %v90_v7 = vld [vmem:[#allocation3 + $0x180] sm:$0xff]  ;;  %v91_v8 = vld [vmem:[#allocation3 + $0x188] sm:$0xff]  ;;  %v100_v21 = vld [vmem:[#allocation3 + $0x1d0] sm:$0xff] }
   0xc   :  { %v86_v9 = vld [vmem:[#allocation3 + $0x160] sm:$0xff]  ;;  %v87_v10 = vld [vmem:[#allocation3 + $0x168] sm:$0xff]  ;;  %185 = vmatpush.msra.mxu3 %v105_v19  ;;  %v101_v22 = vld [vmem:[#allocation3 + $0x1d8] sm:$0xff]  ;;  %163 = vmatpush.msra.mxu2 %v100_v21 }
   0xd   :  { %118 = vmatpush.msra.mxu0 %v94_v5  ;;  %141 = vmatpush.msra.mxu1 %v95_v6  ;;  %v82_v11 = vld [vmem:[#allocation3 + $0x140] sm:$0xff]  ;;  %v83_v12 = vld [vmem:[#allocation3 + $0x148] sm:$0xff]  ;;  %v96_v25 = vld [vmem:[#allocation3 + $0x1b0] sm:$0xff] }
   0xe   :  { %v78_v13 = vld [vmem:[#allocation3 + $0x120] sm:$0xff]  ;;  %v79_v14 = vld [vmem:[#allocation3 + $0x128] sm:$0xff]  ;;  %186 = vmatpush.msra.mxu3 %v101_v22  ;;  %v97_v26 = vld [vmem:[#allocation3 + $0x1b8] sm:$0xff]  ;;  %164 = vmatpush.msra.mxu2 %v96_v25 }
   0xf   :  { %119 = vmatpush.msra.mxu0 %v90_v7  ;;  %142 = vmatpush.msra.mxu1 %v91_v8  ;;  %v74_v15 = vld [vmem:[#allocation3 + $0x100] sm:$0xff]  ;;  %v75_v16 = vld [vmem:[#allocation3 + $0x108] sm:$0xff]  ;;  %v92_v29 = vld [vmem:[#allocation3 + $0x190] sm:$0xff] }
  0x10   :  { %v70_v17 = vld [vmem:[#allocation3 + $0xe0] sm:$0xff]  ;;  %v71_v20 = vld [vmem:[#allocation3 + $0xe8] sm:$0xff]  ;;  %187 = vmatpush.msra.mxu3 %v97_v26  ;;  %v93_v30 = vld [vmem:[#allocation3 + $0x198] sm:$0xff]  ;;  %165 = vmatpush.msra.mxu2 %v92_v29 }
  0x11   :  { %120 = vmatpush.msra.mxu0 %v86_v9  ;;  %143 = vmatpush.msra.mxu1 %v87_v10  ;;  %v66_v23 = vld [vmem:[#allocation3 + $0xc0] sm:$0xff]  ;;  %v67_v24 = vld [vmem:[#allocation3 + $0xc8] sm:$0xff]  ;;  %v88_v33 = vld [vmem:[#allocation3 + $0x170] sm:$0xff] }
  0x12   :  { %v62_v27 = vld [vmem:[#allocation3 + $0xa0] sm:$0xff]  ;;  %v63_v28 = vld [vmem:[#allocation3 + $0xa8] sm:$0xff]  ;;  %188 = vmatpush.msra.mxu3 %v93_v30  ;;  %v89_v34 = vld [vmem:[#allocation3 + $0x178] sm:$0xff]  ;;  %166 = vmatpush.msra.mxu2 %v88_v33 }
  0x13   :  { %121 = vmatpush.msra.mxu0 %v82_v11  ;;  %144 = vmatpush.msra.mxu1 %v83_v12  ;;  %v58_v31 = vld [vmem:[#allocation3 + $0x80] sm:$0xff]  ;;  %v59_v32 = vld [vmem:[#allocation3 + $0x88] sm:$0xff]  ;;  %v84_v37 = vld [vmem:[#allocation3 + $0x150] sm:$0xff] }
  0x14   :  { %v54_v35 = vld [vmem:[#allocation3 + $0x60] sm:$0xff]  ;;  %v55_v36 = vld [vmem:[#allocation3 + $0x68] sm:$0xff]  ;;  %189 = vmatpush.msra.mxu3 %v89_v34  ;;  %v85_v38 = vld [vmem:[#allocation3 + $0x158] sm:$0xff]  ;;  %167 = vmatpush.msra.mxu2 %v84_v37 }
  0x15   :  { %122 = vmatpush.msra.mxu0 %v78_v13  ;;  %145 = vmatpush.msra.mxu1 %v79_v14  ;;  %v50_v39 = vld [vmem:[#allocation3 + $0x40] sm:$0xff]  ;;  %v51_v40 = vld [vmem:[#allocation3 + $0x48] sm:$0xff]  ;;  %v80_v41 = vld [vmem:[#allocation3 + $0x130] sm:$0xff] }
  0x16   :  { %190 = vmatpush.msra.mxu3 %v85_v38  ;;  %v81_v42 = vld [vmem:[#allocation3 + $0x138] sm:$0xff]  ;;  %v46_v43 = vld [vmem:[#allocation3 + $0x20] sm:$0xff]  ;;  %v47_v44 = vld [vmem:[#allocation3 + $0x28] sm:$0xff]  ;;  %168 = vmatpush.msra.mxu2 %v80_v41 }
  0x17   :  { %123 = vmatpush.msra.mxu0 %v74_v15  ;;  %146 = vmatpush.msra.mxu1 %v75_v16  ;;  %v76_v45 = vld [vmem:[#allocation3 + $0x110] sm:$0xff]  ;;  %v77_v46 = vld [vmem:[#allocation3 + $0x118] sm:$0xff]  ;;  %v42_v47 = vld [vmem:[#allocation3] sm:$0xff] }
  0x18   :  { %191 = vmatpush.msra.mxu3 %v81_v42  ;;  %v43_v48 = vld [vmem:[#allocation3 + $0x8] sm:$0xff]  ;;  %169 = vmatpush.msra.mxu2 %v76_v45  ;;  %v72_v49 = vld [vmem:[#allocation3 + $0xf0] sm:$0xff]  ;;  %v73_v50 = vld [vmem:[#allocation3 + $0xf8] sm:$0xff] }
  0x19   :  { %124 = vmatpush.msra.mxu0 %v70_v17  ;;  %147 = vmatpush.msra.mxu1 %v71_v20  ;;  %v231_v51 = vld [vmem:[%s506_s3 + $0x78] sm:$0xff]  ;;  %v415_v52 = vld [vmem:[%s503_s0] sm:$0xff]  ;;  %v230_v53 = vld [vmem:[%s506_s3 + $0x70] sm:$0xff] }
  0x1a   :  { %192 = vmatpush.msra.mxu3 %v77_v46  ;;  %170 = vmatpush.msra.mxu2 %v72_v49  ;;  %v68_v54 = vld [vmem:[#allocation3 + $0xd0] sm:$0xff]  ;;  %v69_v55 = vld [vmem:[#allocation3 + $0xd8] sm:$0xff]  ;;  %v229_v56 = vld [vmem:[%s506_s3 + $0x68] sm:$0xff] }
  0x1b   :  { %125 = vmatpush.msra.mxu0 %v66_v23  ;;  %148 = vmatpush.msra.mxu1 %v67_v24  ;;  %v64_v57 = vld [vmem:[#allocation3 + $0xb0] sm:$0xff]  ;;  %v65_v58 = vld [vmem:[#allocation3 + $0xb8] sm:$0xff]  ;;  %v41_v63 = vld [vmem:[%s503_s0 + $0x8] sm:$0xff] }
  0x1c   :  { %193 = vmatpush.msra.mxu3 %v73_v50  ;;  %v228_v59 = vld [vmem:[%s506_s3 + $0x60] sm:$0xff]  ;;  %171 = vmatpush.msra.mxu2 %v68_v54  ;;  %v60_v60 = vld [vmem:[#allocation3 + $0x90] sm:$0xff]  ;;  %v225_v3 = vld [vmem:[%s506_s3 + $0x48] sm:$0xff] }
  0x1d   :  { %126 = vmatpush.msra.mxu0 %v62_v27  ;;  %149 = vmatpush.msra.mxu1 %v63_v28  ;;  %v61_v61 = vld [vmem:[#allocation3 + $0x98] sm:$0xff]  ;;  %v226_v0 = vld [vmem:[%s506_s3 + $0x50] sm:$0xff]  ;;  %v221_v13 = vld [vmem:[%s506_s3 + $0x28] sm:$0xff] }
  0x1e   :  { %194 = vmatpush.msra.mxu3 %v69_v55  ;;  %v227_v62 = vld [vmem:[%s506_s3 + $0x58] sm:$0xff]  ;;  %172 = vmatpush.msra.mxu2 %v64_v57  ;;  %v224_v6 = vld [vmem:[%s506_s3 + $0x40] sm:$0xff]  ;;  %v222_v12 = vld [vmem:[%s506_s3 + $0x30] sm:$0xff] }
  0x1f   :  { %127 = vmatpush.msra.mxu0 %v58_v31  ;;  %150 = vmatpush.msra.mxu1 %v59_v32  ;;  %v56_v1 = vld [vmem:[#allocation3 + $0x70] sm:$0xff]  ;;  %v57_v2 = vld [vmem:[#allocation3 + $0x78] sm:$0xff]  ;;  %v217_v17 = vld [vmem:[%s506_s3 + $0x8] sm:$0xff] }
  0x20   :  { %195 = vmatpush.msra.mxu3 %v65_v58  ;;  %173 = vmatpush.msra.mxu2 %v60_v60  ;;  %v52_v4 = vld [vmem:[#allocation3 + $0x50] sm:$0xff]  ;;  %v53_v5 = vld [vmem:[#allocation3 + $0x58] sm:$0xff] }
  0x21   :  { %128 = vmatpush.msra.mxu0 %v54_v35  ;;  %151 = vmatpush.msra.mxu1 %v55_v36  ;;  %v48_v7 = vld [vmem:[#allocation3 + $0x30] sm:$0xff]  ;;  %v49_v8 = vld [vmem:[#allocation3 + $0x38] sm:$0xff] }
  0x22   :  { %196 = vmatpush.msra.mxu3 %v61_v61  ;;  %174 = vmatpush.msra.mxu2 %v56_v1  ;;  %v223_v9 = vld [vmem:[%s506_s3 + $0x38] sm:$0xff]  ;;  %v220_v14 = vld [vmem:[%s506_s3 + $0x20] sm:$0xff]  ;;  %v218_v16 = vld [vmem:[%s506_s3 + $0x10] sm:$0xff] }
  0x23   :  { %129 = vmatpush.msra.mxu0 %v50_v39  ;;  %152 = vmatpush.msra.mxu1 %v51_v40  ;;  %v44_v10 = vld [vmem:[#allocation3 + $0x10] sm:$0xff]  ;;  %v45_v11 = vld [vmem:[#allocation3 + $0x18] sm:$0xff] }
  0x24   :  { %197 = vmatpush.msra.mxu3 %v57_v2  ;;  %175 = vmatpush.msra.mxu2 %v52_v4  ;;  %v219_v15 = vld [vmem:[%s506_s3 + $0x18] sm:$0xff]  ;;  %v216_v18 = vld [vmem:[%s506_s3] sm:$0xff] }
  0x25   :  { %130 = vmatpush.msra.mxu0 %v46_v43  ;;  %153 = vmatpush.msra.mxu1 %v47_v44  ;;  %v106_v19 = vld [vmem:[%s505_s2] sm:$0xf] }
  0x26   :  { %198 = vmatpush.msra.mxu3 %v53_v5  ;;  %176 = vmatpush.msra.mxu2 %v48_v7  ;;  %v108_v20 = vperm.slane %v106_v19, 0  ;;  %v109_v21 = vperm.slane %v106_v19, 1  ;;  %v110_v30 = vperm.slane %v106_v19, 2  ;;  %v111_v31 = vperm.slane %v106_v19, 3  ;;  %v330_v36 = vld [vmem:[#allocation2] ss:$0 sm:$0xff] }
  0x27   :  { %131 = vmatpush.msra.mxu0 %v42_v47  ;;  %154 = vmatpush.msra.mxu1 %v43_v48 }
  0x28   :  { %132 = vmatmul.f32.vlgmr.msra.gmra.mxu0 %v415_v52  ;;  %155 = vmatmul.f32.vlgmr.msra.gmra.mxu1 %v415_v52 }
  0x29   :  { %236 = vmatpush.msrb.mxu0 %v231_v51  ;;  %311 = vmatpush.msrb.mxu1 %v231_v51 }
  0x2a   :  { %199 = vmatpush.msra.mxu3 %v49_v8  ;;  %177 = vmatpush.msra.mxu2 %v44_v10 }
  0x2b   :  { %237 = vmatpush.msrb.mxu0 %v230_v53  ;;  %312 = vmatpush.msrb.mxu1 %v230_v53 }
  0x2c   :  { %200 = vmatpush.msra.mxu3 %v45_v11  ;;  %178 = vmatmul.f32.vlgmr.msra.gmra.mxu2 %v415_v52 }
  0x2d   :  { %238 = vmatpush.msrb.mxu0 %v229_v56  ;;  %313 = vmatpush.msrb.mxu1 %v229_v56 }
  0x2e   :  { %201 = vmatmul.f32.vlgmr.msra.gmra.mxu3 %v415_v52 }
  0x2f   :  { %239 = vmatpush.msrb.mxu0 %v228_v59  ;;  %314 = vmatpush.msrb.mxu1 %v228_v59 }
  0x30   :  { %135 = vmatmul.f32.gmra.mxu0 %v41_v63  ;;  %158 = vmatmul.f32.gmra.mxu1 %v41_v63 }
  0x31   :  { %240 = vmatpush.msrb.mxu0 %v227_v62  ;;  %315 = vmatpush.msrb.mxu1 %v227_v62 }
  0x33   :  { %241 = vmatpush.msrb.mxu0 %v226_v0  ;;  %316 = vmatpush.msrb.mxu1 %v226_v0 }
  0x34   :  { %181 = vmatmul.f32.gmra.mxu2 %v41_v63 }
  0x35   :  { %242 = vmatpush.msrb.mxu0 %v225_v3  ;;  %317 = vmatpush.msrb.mxu1 %v225_v3 }
  0x36   :  { %204 = vmatmul.f32.gmra.mxu3 %v41_v63 }
  0x37   :  { %243 = vmatpush.msrb.mxu0 %v224_v6  ;;  %318 = vmatpush.msrb.mxu1 %v224_v6 }
  0x39   :  { %244 = vmatpush.msrb.mxu0 %v223_v9  ;;  %319 = vmatpush.msrb.mxu1 %v223_v9 }
  0x3b   :  { %245 = vmatpush.msrb.mxu0 %v222_v12  ;;  %320 = vmatpush.msrb.mxu1 %v222_v12 }
  0x3d   :  { %246 = vmatpush.msrb.mxu0 %v221_v13  ;;  %321 = vmatpush.msrb.mxu1 %v221_v13 }
  0x3f   :  { %247 = vmatpush.msrb.mxu0 %v220_v14  ;;  %322 = vmatpush.msrb.mxu1 %v220_v14 }
  0x41   :  { %248 = vmatpush.msrb.mxu0 %v219_v15  ;;  %323 = vmatpush.msrb.mxu1 %v219_v15 }
  0x43   :  { %249 = vmatpush.msrb.mxu0 %v218_v16  ;;  %324 = vmatpush.msrb.mxu1 %v218_v16 }
  0x45   :  { %250 = vmatpush.msrb.mxu0 %v217_v17  ;;  %325 = vmatpush.msrb.mxu1 %v217_v17 }
  0x47   :  { %251 = vmatpush.msrb.mxu0 %v216_v18  ;;  %326 = vmatpush.msrb.mxu1 %v216_v18 }
  0x48   :  { %252 = vmatmul.f32.vlgmr.msrb.gmra.mxu0 %v415_v52  ;;  %255 = vmatmul.f32.vlgmr.msrb.gmra.mxu1 %v41_v63 }
  0xa5   :  { %v133_v22 = vpop.f32.mrf.mxu0  ;;  %v156_v23 = vpop.f32.mrf.mxu1 }
  0xa6   :  { %v134_v24 = vadd.f32 %v133_v22, %v108_v20  ;;  %v157_v25 = vadd.f32 %v156_v23, %v109_v21 }
  0xa8   :  { %208 = vst [vmem:[%s508_s5] sm:$0xff] %v134_v24 }
  0xa9   :  { %209 = vst [vmem:[%s508_s5 + $0x8] sm:$0xff] %v157_v25 }
  0xad   :  { %v136_v26 = vpop.f32.mrf.mxu0  ;;  %v159_v27 = vpop.f32.mrf.mxu1 }
  0xae   :  { %v137_v28 = vadd.f32 %v136_v26, %v108_v20  ;;  %v160_v29 = vadd.f32 %v159_v27, %v109_v21 }
  0xaf   :  { %v179_v32 = vpop.f32.mrf.mxu2 }
  0xb0   :  { %212 = vst [vmem:[%s508_s5 + $0x20] sm:$0xff] %v137_v28  ;;  %v180_v34 = vadd.f32 %v179_v32, %v110_v30 }
  0xb1   :  { %213 = vst [vmem:[%s508_s5 + $0x28] sm:$0xff] %v160_v29  ;;  %v202_v33 = vpop.f32.mrf.mxu3 }
  0xb2   :  { %v203_v35 = vadd.f32 %v202_v33, %v111_v31  ;;  %210 = vst [vmem:[%s508_s5 + $0x10] sm:$0xff] %v180_v34 }
  0xb4   :  { %211 = vst [vmem:[%s508_s5 + $0x18] sm:$0xff] %v203_v35 }
  0xb7   :  { %v182_v41 = vpop.f32.mrf.mxu2 }
  0xb8   :  { %v183_v45 = vadd.f32 %v182_v41, %v110_v30 }
  0xb9   :  { %v205_v42 = vpop.f32.mrf.mxu3 }
  0xba   :  { %v206_v46 = vadd.f32 %v205_v42, %v111_v31  ;;  %214 = vst [vmem:[%s508_s5 + $0x30] sm:$0xff] %v183_v45 }
  0xbc   :  { %215 = vst [vmem:[%s508_s5 + $0x38] sm:$0xff] %v206_v46 }
  0xc5   :  { %v253_v37 = vpop.f32.mrf.mxu0  ;;  %v256_v38 = vpop.f32.mrf.mxu1 }
  0xc6   :  { %v254_v39 = vadd.f32 %v330_v36, %v253_v37  ;;  %v257_v40 = vadd.f32 %v330_v36, %v256_v38 }
  0xc8   :  { %v309_v43 = vmul.f32 -1.442695, %v254_v39  ;;  %v310_v44 = vmul.f32 -1.442695, %v257_v40 }
  0xca   :  { %331 = vpow2.f32 %v309_v43 }
  0xcb   :  { %333 = vpow2.f32 %v310_v44 }
  0xd0   :  { %v332_v47 = vpop.eup %331 }
  0xd1   :  { %v334_v48 = vpop.eup %333  ;;  %v265_v49 = vadd.f32 1.0, %v332_v47 }
  0xd2   :  { %v266_v50 = vadd.f32 1.0, %v334_v48 }
  0xd3   :  { %335 = vrcp.f32 %v265_v49  ;;  %v278_v56 = vand.u32 2147483648, %v265_v49  ;;  %v276_v59 = vand.u32 2147483647, %v265_v49  ;;  %vm272_vm2 = vweird.f32 %v265_v49 }
  0xd4   :  { %337 = vrcp.f32 %v266_v50  ;;  %v293_v60 = vand.u32 2147483648, %v266_v50  ;;  %v291_v62 = vand.u32 2147483647, %v266_v50  ;;  %vm287_vm5 = vweird.f32 %v266_v50 }
  0xd5   :  { %v279_v0 = vor.u32 1.1754944e-38, %v278_v56  ;;  %vm277_vm6 = vcmp.eq.f32.partialorder %v276_v59, 8.507059e+37 }
  0xd6   :  { %v294_v3 = vor.u32 1.1754944e-38, %v293_v60  ;;  %vm292_vm8 = vcmp.eq.f32.partialorder %v291_v62, 8.507059e+37 }
  0xd9   :  { %v336_v51 = vpop.eup %335 }
  0xda   :  { %v338_v52 = vpop.eup %337  ;;  %v268_v53 = vmul.f32 %v336_v51, %v265_v49  ;;  %vm273_vm0 = vweird.f32 %v336_v51 }
  0xdb   :  { %v283_v54 = vmul.f32 %v338_v52, %v266_v50  ;;  %vm288_vm1 = vweird.f32 %v338_v52  ;;  %vm274_vm3 = vmor %vm272_vm2, %vm273_vm0 }
  0xdc   :  { %v269_v55 = vsub.f32 1.0, %v268_v53  ;;  %vm289_vm7 = vmor %vm287_vm5, %vm288_vm1 }
  0xdd   :  { %v284_v57 = vsub.f32 1.0, %v283_v54 }
  0xde   :  { %v270_v58 = vmul.f32 %v336_v51, %v269_v55 }
  0xdf   :  { %v285_v61 = vmul.f32 %v338_v52, %v284_v57 }
  0xe0   :  { %v271_v63 = vadd.f32 %v336_v51, %v270_v58 }
  0xe1   :  { %v286_v1 = vadd.f32 %v338_v52, %v285_v61 }
  0xe2   :  { %v275_v2 = vsel %vm274_vm3, %v336_v51, %v271_v63 }
  0xe3   :  { %v280_v4 = vsel %vm277_vm6, %v279_v0, %v275_v2  ;;  %v290_v5 = vsel %vm289_vm7, %v338_v52, %v286_v1 }
  0xe4   :  { %298 = vst.msk [vmem:[%s509_s6] sm:$0xff] %vm297_vm4, %v280_v4  ;;  %v295_v6 = vsel %vm292_vm8, %v294_v3, %v290_v5 }
  0xe5   :  { %299 = vst.msk [vmem:[%s509_s6 + $0x8] sm:$0xff] %vm297_vm4, %v295_v6 }
  0xe6   :  { %308 = vsyncpa [#allocation4], 1 }

// kernel: detector_head_forward.3
= control target key start
LH: loop header
LB: loop body
LE: loop exit
PB: predicated region body
PF: predicated region fallthrough
CT: control target
= control target key end

     0   :  { %11 = vsyncpa [#allocation9], 0  ;;  %s3470_s0 = inlined_call_operand.vmem [shape: f32[8,2,512], index: 0, kind: input, shape index: {}, may-alias: {0,1}]   ;;  %s3471_s1 = inlined_call_operand.vmem [shape: f32[8,2,512], index: 1, kind: input, shape index: {}, may-alias: {0,1}]   ;;  %s3472_s2 = inlined_call_operand.hbm [shape: f32[128,512], index: 2, kind: input, shape index: {}]   ;;  %s3473_s3 = inlined_call_operand.vmem [shape: f32[8,2,64], index: 3, kind: output, shape index: {0}]   ;;  %s3474_s4 = inlined_call_operand.vmem [shape: f32[8,2,64], index: 4, kind: output, shape index: {1}]   ;;  %s3475_s5 = inlined_call_operand.hbm [shape: f32[2,2,64], index: 5, kind: output, shape index: {2}]  }
   0x1   :  { %12 = vsyncpa [#allocation10], 0  ;;  %v31_v0 = vld [vmem:[%s3470_s0] sm:$0xf]  ;;  %v33_v1 = vld [vmem:[%s3470_s0 + $0x8] sm:$0xf] }
   0x2   :  { %32 = vst [vmem:[#allocation6] sm:$0xf] %v31_v0  ;;  %v35_v2 = vld [vmem:[%s3470_s0 + $0x10] sm:$0xf]  ;;  %v37_v3 = vld [vmem:[%s3470_s0 + $0x18] sm:$0xf] }
   0x3   :  { %34 = vst [vmem:[#allocation6 + $0x4] sm:$0xf] %v33_v1  ;;  %v39_v4 = vld [vmem:[%s3470_s0 + $0x20] sm:$0xf]  ;;  %v41_v5 = vld [vmem:[%s3470_s0 + $0x28] sm:$0xf] }
   0x4   :  { %36 = vst [vmem:[#allocation6 + $0x8] sm:$0xf] %v35_v2  ;;  %v43_v6 = vld [vmem:[%s3470_s0 + $0x30] sm:$0xf]  ;;  %v45_v7 = vld [vmem:[%s3470_s0 + $0x38] sm:$0xf] }
   0x5   :  { %38 = vst [vmem:[#allocation6 + $0xc] sm:$0xf] %v37_v3  ;;  %v2036_v8 = vld [vmem:[%s3471_s1 + $0x4] sm:$0xf]  ;;  %v2037_v9 = vld [vmem:[%s3471_s1 + $0xc] sm:$0xf] }
   0x6   :  { %40 = vst [vmem:[#allocation6 + $0x10] sm:$0xf] %v39_v4  ;;  %v2038_v10 = vld [vmem:[%s3471_s1 + $0x14] sm:$0xf]  ;;  %v2039_v11 = vld [vmem:[%s3471_s1 + $0x1c] sm:$0xf] }
   0x7   :  { %42 = vst [vmem:[#allocation6 + $0x14] sm:$0xf] %v41_v5  ;;  %s165_s18 = sshll.u32 %s3472_s2, 4  ;;  %v2040_v12 = vld [vmem:[%s3471_s1 + $0x24] sm:$0xf]  ;;  %s2469_s21 = smov [#allocation8]   ;;  %s166_s18 = int_to_ptr.hbm [resolvable:$true] %s165_s18 }
   0x8   :  { %44 = vst [vmem:[#allocation6 + $0x18] sm:$0xf] %v43_v6  ;;  %s167_s22 = sshll.u32 %s2469_s21, 4  ;;  %v2041_v13 = vld [vmem:[%s3471_s1 + $0x2c] sm:$0xf]  ;;  %s2470_s2 = smov 512   ;;  %s168_s22 = int_to_ptr.vmem [resolvable:$true] %s167_s22 }
   0x9   :  { %46 = vst [vmem:[#allocation6 + $0x1c] sm:$0xf] %v45_v7  ;;  %v2042_v14 = vld [vmem:[%s3471_s1 + $0x34] sm:$0xf]  ;;  %s2471_s27 = smov 32  }
   0xa   :  { %109 = vst [vmem:[#allocation7] sm:$0xf] %v2036_v8  ;;  %173 = dma.hbm_to_vmem [thread:$0]  %s166_s18, 8192, %s168_s22, [#allocation9], %s2470_s2, %s2470_s2, %s2471_s27  }
   0xb   :  { %111 = vst [vmem:[#allocation7 + $0x4] sm:$0xf] %v2037_v9  ;;  %v2043_v15 = vld [vmem:[%s3471_s1 + $0x3c] sm:$0xf] }
   0xc   :  { %113 = vst [vmem:[#allocation7 + $0x8] sm:$0xf] %v2038_v10 }
   0xd   :  { %115 = vst [vmem:[#allocation7 + $0xc] sm:$0xf] %v2039_v11 }
   0xe   :  { %117 = vst [vmem:[#allocation7 + $0x10] sm:$0xf] %v2040_v12 }
   0xf   :  { %119 = vst [vmem:[#allocation7 + $0x14] sm:$0xf] %v2041_v13 }
  0x10   :  { %121 = vst [vmem:[#allocation7 + $0x18] sm:$0xf] %v2042_v14 }
  0x11   :  { %123 = vst [vmem:[#allocation7 + $0x1c] sm:$0xf] %v2043_v15 }
  0x12   :  { %2465 = dma.done.wait [#allocation9], 8192  }
  0x13   :  { %2466 = vsyncadd [#allocation9], 4294959104  ;;  %vm202_vm0 = vcmask 517120   ;;  %v2472_v16 = vmov 0.0   ;;  %v2562_v17 = vld [vmem:[#allocation8 + $0x1e0] sm:$0xff]  ;;  %v2564_v18 = vld [vmem:[#allocation8 + $0x1e8] sm:$0xff] }
  0x14   :  { %205 = vst.msk [vmem:[#allocation4] sm:$0x3] %vm202_vm0, %v2472_v16  ;;  %v2566_v19 = vld [vmem:[#allocation8 + $0x1f0] sm:$0xff]  ;;  %281 = vmatpush.msra.mxu0 %v2562_v17  ;;  %301 = vmatpush.msra.mxu1 %v2564_v18  ;;  %v2570_v21 = vld [vmem:[#allocation8 + $0x1f8] sm:$0xff]  ;;  %v2572_v22 = vld [vmem:[#allocation8 + $0x1c0] sm:$0xff]  ;;  %s2473_s1 = smov 64  }
  0x15   :  { %203 = vst.msk [vmem:[#allocation2] sm:$0x3] %vm202_vm0, %v2472_v16  ;;  %321 = vmatpush.msra.mxu2 %v2566_v19  ;;  %v2576_v23 = vld [vmem:[#allocation8 + $0x1c8] sm:$0xff]  ;;  %v2578_v24 = vld [vmem:[#allocation8 + $0x1d0] sm:$0xff]  ;;  %v2580_v25 = vld [vmem:[#allocation8 + $0x1d8] sm:$0xff]  ;;  %341 = vmatpush.msra.mxu3 %v2570_v21  ;;  %vm279_vm1 = vcmask 523264  }
  0x16   :  { %204 = vst.msk [vmem:[#allocation3] sm:$0x3] %vm202_vm0, %v2472_v16  ;;  %282 = vmatpush.msra.mxu0 %v2572_v22  ;;  %v2584_v26 = vld [vmem:[#allocation8 + $0x1a0] sm:$0xff]  ;;  %v2586_v27 = vld [vmem:[#allocation8 + $0x1a8] sm:$0xff]  ;;  %v2588_v28 = vld [vmem:[#allocation8 + $0x1b0] sm:$0xff]  ;;  %302 = vmatpush.msra.mxu1 %v2576_v23  ;;  %s1993_s10 = sshll.u32 %s3475_s5, 4  ;;  %s1994_s10 = int_to_ptr.hbm [resolvable:$true] %s1993_s10 }
  0x17   :  { %206 = vst.msk [vmem:[#allocation5] sm:$0x3] %vm202_vm0, %v2472_v16  ;;  %322 = vmatpush.msra.mxu2 %v2578_v24  ;;  %v2592_v29 = vld [vmem:[#allocation8 + $0x1b8] sm:$0xff]  ;;  %v2594_v30 = vld [vmem:[#allocation8 + $0x180] sm:$0xff]  ;;  %342 = vmatpush.msra.mxu3 %v2580_v25  ;;  %v2598_v31 = vld [vmem:[#allocation8 + $0x188] sm:$0xff]  ;;  %s2474_s11 = smov [#allocation11]  }
  0x18   :  { %283 = vmatpush.msra.mxu0 %v2584_v26  ;;  %v2600_v32 = vld [vmem:[#allocation8 + $0x190] sm:$0xff]  ;;  %303 = vmatpush.msra.mxu1 %v2586_v27  ;;  %v2604_v33 = vld [vmem:[#allocation8 + $0x198] sm:$0xff]  ;;  %v2606_v34 = vld [vmem:[#allocation8 + $0x160] sm:$0xff]  ;;  %s1991_s12 = sshll.u32 %s2474_s11, 4  ;;  %s1992_s12 = int_to_ptr.vmem [resolvable:$true] %s1991_s12 }
  0x19   :  { %323 = vmatpush.msra.mxu2 %v2588_v28  ;;  %343 = vmatpush.msra.mxu3 %v2592_v29  ;;  %v2610_v35 = vld [vmem:[#allocation8 + $0x168] sm:$0xff]  ;;  %v2612_v36 = vld [vmem:[#allocation8 + $0x170] sm:$0xff]  ;;  %v2616_v37 = vld [vmem:[#allocation8 + $0x178] sm:$0xff] }
  0x1a   :  { %284 = vmatpush.msra.mxu0 %v2594_v30  ;;  %304 = vmatpush.msra.mxu1 %v2598_v31  ;;  %v2618_v38 = vld [vmem:[#allocation8 + $0x140] sm:$0xff]  ;;  %v2622_v39 = vld [vmem:[#allocation8 + $0x148] sm:$0xff]  ;;  %v2624_v40 = vld [vmem:[#allocation8 + $0x150] sm:$0xff] }
  0x1b   :  { %v273_v20 = vld [vmem:[#allocation4] sm:$0x3]  ;;  %324 = vmatpush.msra.mxu2 %v2600_v32  ;;  %344 = vmatpush.msra.mxu3 %v2604_v33  ;;  %v2630_v42 = vld [vmem:[#allocation8 + $0x120] sm:$0xff]  ;;  %v2634_v43 = vld [vmem:[#allocation8 + $0x128] sm:$0xff] }
  0x1c   :  { %276 = vrot.lane.b32.xlu0 %v273_v20, %s2473_s1  ;;  %285 = vmatpush.msra.mxu0 %v2606_v34  ;;  %v2628_v41 = vld [vmem:[#allocation8 + $0x158] sm:$0xff]  ;;  %v2636_v44 = vld [vmem:[#allocation8 + $0x130] sm:$0xff]  ;;  %v2642_v46 = vld [vmem:[#allocation8 + $0x100] sm:$0xff] }
  0x1d   :  { %305 = vmatpush.msra.mxu1 %v2610_v35  ;;  %325 = vmatpush.msra.mxu2 %v2612_v36  ;;  %v2640_v45 = vld [vmem:[#allocation8 + $0x138] sm:$0xff]  ;;  %v2646_v47 = vld [vmem:[#allocation8 + $0x108] sm:$0xff]  ;;  %v2648_v48 = vld [vmem:[#allocation8 + $0x110] sm:$0xff] }
  0x1e   :  { %345 = vmatpush.msra.mxu3 %v2616_v37  ;;  %286 = vmatpush.msra.mxu0 %v2618_v38  ;;  %v2652_v49 = vld [vmem:[#allocation8 + $0x118] sm:$0xff]  ;;  %v2654_v50 = vld [vmem:[#allocation8 + $0xe0] sm:$0xff]  ;;  %v2658_v51 = vld [vmem:[#allocation8 + $0xe8] sm:$0xff] }
  0x1f   :  { %306 = vmatpush.msra.mxu1 %v2622_v39  ;;  %326 = vmatpush.msra.mxu2 %v2624_v40  ;;  %v2660_v52 = vld [vmem:[#allocation8 + $0xf0] sm:$0xff]  ;;  %v2664_v53 = vld [vmem:[#allocation8 + $0xf8] sm:$0xff]  ;;  %v2666_v54 = vld [vmem:[#allocation8 + $0xc0] sm:$0xff] }
  0x20   :  { %346 = vmatpush.msra.mxu3 %v2628_v41  ;;  %287 = vmatpush.msra.mxu0 %v2630_v42  ;;  %v2670_v55 = vld [vmem:[#allocation8 + $0xc8] sm:$0xff]  ;;  %v2672_v56 = vld [vmem:[#allocation8 + $0xd0] sm:$0xff]  ;;  %v2676_v57 = vld [vmem:[#allocation8 + $0xd8] sm:$0xff] }
  0x21   :  { %307 = vmatpush.msra.mxu1 %v2634_v43  ;;  %327 = vmatpush.msra.mxu2 %v2636_v44  ;;  %v2678_v58 = vld [vmem:[#allocation8 + $0xa0] sm:$0xff]  ;;  %v2682_v59 = vld [vmem:[#allocation8 + $0xa8] sm:$0xff]  ;;  %v2684_v60 = vld [vmem:[#allocation8 + $0xb0] sm:$0xff] }
  0x22   :  { %347 = vmatpush.msra.mxu3 %v2640_v45  ;;  %288 = vmatpush.msra.mxu0 %v2642_v46  ;;  %3557 = vst [vmem:[#allocation14_spill] sm:$0xff] %v2682_v59  ;;  %v2688_v61 = vld [vmem:[#allocation8 + $0xb8] sm:$0xff]  ;;  %v2690_v62 = vld [vmem:[#allocation8 + $0x80] sm:$0xff]  ;;  %v2694_v63 = vld [vmem:[#allocation8 + $0x88] sm:$0xff] }
  0x23   :  { %308 = vmatpush.msra.mxu1 %v2646_v47  ;;  %328 = vmatpush.msra.mxu2 %v2648_v48  ;;  %3558 = vst [vmem:[#allocation15_spill] sm:$0xff] %v2684_v60  ;;  %v2696_v0 = vld [vmem:[#allocation8 + $0x90] sm:$0xff]  ;;  %v2700_v1 = vld [vmem:[#allocation8 + $0x98] sm:$0xff]  ;;  %v2702_v2 = vld [vmem:[#allocation8 + $0x60] sm:$0xff] }
  0x24   :  { %348 = vmatpush.msra.mxu3 %v2652_v49  ;;  %289 = vmatpush.msra.mxu0 %v2654_v50  ;;  %3559 = vst [vmem:[#allocation16_spill] sm:$0xff] %v2688_v61  ;;  %v2706_v3 = vld [vmem:[#allocation8 + $0x68] sm:$0xff]  ;;  %v2708_v4 = vld [vmem:[#allocation8 + $0x70] sm:$0xff]  ;;  %v2712_v5 = vld [vmem:[#allocation8 + $0x78] sm:$0xff] }
  0x25   :  { %309 = vmatpush.msra.mxu1 %v2658_v51  ;;  %329 = vmatpush.msra.mxu2 %v2660_v52  ;;  %3560 = vst [vmem:[#allocation17_spill] sm:$0xff] %v2690_v62  ;;  %v2714_v6 = vld [vmem:[#allocation8 + $0x40] sm:$0xff]  ;;  %v2718_v7 = vld [vmem:[#allocation8 + $0x48] sm:$0xff]  ;;  %v2720_v8 = vld [vmem:[#allocation8 + $0x50] sm:$0xff] }
  0x26   :  { %349 = vmatpush.msra.mxu3 %v2664_v53  ;;  %290 = vmatpush.msra.mxu0 %v2666_v54  ;;  %3561 = vst [vmem:[#allocation18_spill] sm:$0xff] %v2694_v63  ;;  %v2724_v9 = vld [vmem:[#allocation8 + $0x58] sm:$0xff]  ;;  %v2726_v10 = vld [vmem:[#allocation8 + $0x20] sm:$0xff]  ;;  %v2730_v11 = vld [vmem:[#allocation8 + $0x28] sm:$0xff] }
  0x27   :  { %310 = vmatpush.msra.mxu1 %v2670_v55  ;;  %330 = vmatpush.msra.mxu2 %v2672_v56  ;;  %3562 = vst [vmem:[#allocation19_spill] sm:$0xff] %v2696_v0  ;;  %v2732_v12 = vld [vmem:[#allocation8 + $0x30] sm:$0xff]  ;;  %v2736_v13 = vld [vmem:[#allocation8 + $0x38] sm:$0xff]  ;;  %v2743_v14 = vld [vmem:[#allocation8] sm:$0xff] }
  0x28   :  { %350 = vmatpush.msra.mxu3 %v2676_v57  ;;  %291 = vmatpush.msra.mxu0 %v2678_v58  ;;  %3563 = vst [vmem:[#allocation20_spill] sm:$0xff] %v2700_v1  ;;  %v2745_v15 = vld [vmem:[#allocation8 + $0x8] sm:$0xff]  ;;  %v2749_v16 = vld [vmem:[#allocation8 + $0x10] sm:$0xff]  ;;  %v2751_v20 = vld [vmem:[#allocation8 + $0x18] sm:$0xff] }
  0x29   :  { %311 = vmatpush.msra.mxu1 %v2682_v59  ;;  %331 = vmatpush.msra.mxu2 %v2684_v60  ;;  %3564 = vst [vmem:[#allocation21_spill] sm:$0xff] %v2702_v2 }
  0x2a   :  { %351 = vmatpush.msra.mxu3 %v2688_v61  ;;  %292 = vmatpush.msra.mxu0 %v2690_v62  ;;  %3565 = vst [vmem:[#allocation22_spill] sm:$0xff] %v2706_v3 }
  0x2b   :  { %3566 = vst [vmem:[#allocation23_spill] sm:$0xff] %v2708_v4  ;;  %312 = vmatpush.msra.mxu1 %v2694_v63  ;;  %332 = vmatpush.msra.mxu2 %v2696_v0 }
  0x2c   :  { %3567 = vst [vmem:[#allocation24_spill] sm:$0xff] %v2712_v5  ;;  %352 = vmatpush.msra.mxu3 %v2700_v1  ;;  %293 = vmatpush.msra.mxu0 %v2702_v2 }
  0x2d   :  { %3568 = vst [vmem:[#allocation25_spill] sm:$0xff] %v2714_v6  ;;  %313 = vmatpush.msra.mxu1 %v2706_v3  ;;  %333 = vmatpush.msra.mxu2 %v2708_v4 }
  0x2e   :  { %3569 = vst [vmem:[#allocation26_spill] sm:$0xff] %v2718_v7  ;;  %353 = vmatpush.msra.mxu3 %v2712_v5  ;;  %294 = vmatpush.msra.mxu0 %v2714_v6 }
  0x2f   :  { %3570 = vst [vmem:[#allocation27_spill] sm:$0xff] %v2720_v8  ;;  %314 = vmatpush.msra.mxu1 %v2718_v7  ;;  %334 = vmatpush.msra.mxu2 %v2720_v8 }
  0x30   :  { %3571 = vst [vmem:[#allocation28_spill] sm:$0xff] %v2724_v9  ;;  %354 = vmatpush.msra.mxu3 %v2724_v9  ;;  %295 = vmatpush.msra.mxu0 %v2726_v10 }
  0x31   :  { %3572 = vst [vmem:[#allocation29_spill] sm:$0xff] %v2726_v10  ;;  %315 = vmatpush.msra.mxu1 %v2730_v11  ;;  %335 = vmatpush.msra.mxu2 %v2732_v12 }
  0x32   :  { %3573 = vst [vmem:[#allocation30_spill] sm:$0xff] %v2730_v11  ;;  %355 = vmatpush.msra.mxu3 %v2736_v13  ;;  %296 = vmatpush.msra.mxu0 %v2743_v14  ;;  %v272_v11 = vld [vmem:[#allocation3] sm:$0x3] }
  0x33   :  { %3574 = vst [vmem:[#allocation31_spill] sm:$0xff] %v2732_v12  ;;  %316 = vmatpush.msra.mxu1 %v2745_v15  ;;  %336 = vmatpush.msra.mxu2 %v2749_v16 }
  0x34   :  { %3575 = vst [vmem:[#allocation32_spill] sm:$0xff] %v2736_v13  ;;  %356 = vmatpush.msra.mxu3 %v2751_v20  ;;  %497 = vmatpush.msrb.mxu0 %v2562_v17 }
  0x35   :  { %3576 = vst [vmem:[#allocation33_spill] sm:$0xff] %v2743_v14  ;;  %517 = vmatpush.msrb.mxu1 %v2564_v18  ;;  %420 = vrot.lane.b32.xlu0 %v272_v11, %s2473_s1  ;;  %v271_v11 = vld [vmem:[#allocation2] sm:$0x3] }
  0x36   :  { %3577 = vst [vmem:[#allocation34_spill] sm:$0xff] %v2745_v15  ;;  %537 = vmatpush.msrb.mxu2 %v2566_v19  ;;  %557 = vmatpush.msrb.mxu3 %v2570_v21 }
  0x37   :  { %3578 = vst [vmem:[#allocation35_spill] sm:$0xff] %v2749_v16  ;;  %498 = vmatpush.msrb.mxu0 %v2572_v22  ;;  %518 = vmatpush.msrb.mxu1 %v2576_v23 }
  0x38   :  { %3579 = vst [vmem:[#allocation36_spill] sm:$0xff] %v2751_v20  ;;  %538 = vmatpush.msrb.mxu2 %v2578_v24  ;;  %558 = vmatpush.msrb.mxu3 %v2580_v25 }
  0x39   :  { %499 = vmatpush.msrb.mxu0 %v2584_v26  ;;  %519 = vmatpush.msrb.mxu1 %v2586_v27 }
  0x3a   :  { %539 = vmatpush.msrb.mxu2 %v2588_v28  ;;  %559 = vmatpush.msrb.mxu3 %v2592_v29 }
  0x3b   :  { %500 = vmatpush.msrb.mxu0 %v2594_v30  ;;  %520 = vmatpush.msrb.mxu1 %v2598_v31 }
  0x3c   :  { %540 = vmatpush.msrb.mxu2 %v2600_v32  ;;  %560 = vmatpush.msrb.mxu3 %v2604_v33 }
  0x3d   :  { %501 = vmatpush.msrb.mxu0 %v2606_v34  ;;  %521 = vmatpush.msrb.mxu1 %v2610_v35 }
  0x3e   :  { %541 = vmatpush.msrb.mxu2 %v2612_v36  ;;  %561 = vmatpush.msrb.mxu3 %v2616_v37 }
  0x3f   :  { %502 = vmatpush.msrb.mxu0 %v2618_v38  ;;  %522 = vmatpush.msrb.mxu1 %v2622_v39 }
  0x40   :  { %542 = vmatpush.msrb.mxu2 %v2624_v40  ;;  %562 = vmatpush.msrb.mxu3 %v2628_v41 }
  0x41   :  { %503 = vmatpush.msrb.mxu0 %v2630_v42  ;;  %523 = vmatpush.msrb.mxu1 %v2634_v43 }
  0x42   :  { %543 = vmatpush.msrb.mxu2 %v2636_v44  ;;  %563 = vmatpush.msrb.mxu3 %v2640_v45 }
  0x43   :  { %504 = vmatpush.msrb.mxu0 %v2642_v46  ;;  %524 = vmatpush.msrb.mxu1 %v2646_v47 }
  0x44   :  { %544 = vmatpush.msrb.mxu2 %v2648_v48  ;;  %564 = vmatpush.msrb.mxu3 %v2652_v49 }
  0x45   :  { %505 = vmatpush.msrb.mxu0 %v2654_v50  ;;  %525 = vmatpush.msrb.mxu1 %v2658_v51 }
  0x46   :  { %545 = vmatpush.msrb.mxu2 %v2660_v52  ;;  %565 = vmatpush.msrb.mxu3 %v2664_v53 }
  0x47   :  { %506 = vmatpush.msrb.mxu0 %v2666_v54  ;;  %526 = vmatpush.msrb.mxu1 %v2670_v55 }
  0x48   :  { %546 = vmatpush.msrb.mxu2 %v2672_v56  ;;  %566 = vmatpush.msrb.mxu3 %v2676_v57 }
  0x49   :  { %507 = vmatpush.msrb.mxu0 %v2678_v58  ;;  %527 = vmatpush.msrb.mxu1 %v2682_v59 }
  0x4a   :  { %547 = vmatpush.msrb.mxu2 %v2684_v60  ;;  %567 = vmatpush.msrb.mxu3 %v2688_v61 }
  0x4b   :  { %508 = vmatpush.msrb.mxu0 %v2690_v62  ;;  %528 = vmatpush.msrb.mxu1 %v2694_v63 }
  0x4c   :  { %548 = vmatpush.msrb.mxu2 %v2696_v0  ;;  %568 = vmatpush.msrb.mxu3 %v2700_v1 }
  0x4d   :  { %509 = vmatpush.msrb.mxu0 %v2702_v2  ;;  %529 = vmatpush.msrb.mxu1 %v2706_v3  ;;  %v3580_v2 = vld [vmem:[#allocation30_spill] sm:$0xff] }
  0x4e   :  { %549 = vmatpush.msrb.mxu2 %v2708_v4  ;;  %569 = vmatpush.msrb.mxu3 %v2712_v5 }
  0x4f   :  { %510 = vmatpush.msrb.mxu0 %v2714_v6  ;;  %530 = vmatpush.msrb.mxu1 %v2718_v7 }
  0x50   :  { %550 = vmatpush.msrb.mxu2 %v2720_v8  ;;  %570 = vmatpush.msrb.mxu3 %v2724_v9 }
  0x51   :  { %511 = vmatpush.msrb.mxu0 %v2726_v10  ;;  %531 = vmatpush.msrb.mxu1 %v3580_v2 }
  0x52   :  { %551 = vmatpush.msrb.mxu2 %v2732_v12  ;;  %571 = vmatpush.msrb.mxu3 %v2736_v13 }
  0x53   :  { %512 = vmatpush.msrb.mxu0 %v2743_v14  ;;  %532 = vmatpush.msrb.mxu1 %v2745_v15 }
  0x54   :  { %552 = vmatpush.msrb.mxu2 %v2749_v16  ;;  %572 = vmatpush.msrb.mxu3 %v2751_v20 }
  0x8e   :  { %v277_v1 = vpop.permute.xlu0 %276 }
  0x8f   :  { %v280_v4 = vsel %vm279_vm1, %v271_v11, %v277_v1  ;;  %v3581_v1 = vld [vmem:[#allocation20_spill] sm:$0xff]  ;;  %v3583_v11 = vld [vmem:[#allocation23_spill] sm:$0xff] }
  0x90   :  { %297 = vmatmul.f32.vlgmr.msra.gmra.mxu0 %v280_v4  ;;  %317 = vmatmul.f32.vlgmr.msra.gmra.mxu1 %v280_v4 }
  0x91   :  { %337 = vmatmul.f32.vlgmr.msra.gmra.mxu2 %v280_v4  ;;  %357 = vmatmul.f32.vlgmr.msra.gmra.mxu3 %v280_v4  ;;  %v3582_v4 = vld [vmem:[#allocation21_spill] sm:$0xff] }
  0x92   :  { %706 = vmatpush.msra.mxu0 %v2562_v17  ;;  %726 = vmatpush.msra.mxu1 %v2564_v18 }
  0x93   :  { %746 = vmatpush.msra.mxu2 %v2566_v19  ;;  %766 = vmatpush.msra.mxu3 %v2570_v21 }
  0x94   :  { %707 = vmatpush.msra.mxu0 %v2572_v22  ;;  %727 = vmatpush.msra.mxu1 %v2576_v23 }
  0x95   :  { %747 = vmatpush.msra.mxu2 %v2578_v24  ;;  %767 = vmatpush.msra.mxu3 %v2580_v25 }
  0x96   :  { %708 = vmatpush.msra.mxu0 %v2584_v26  ;;  %728 = vmatpush.msra.mxu1 %v2586_v27 }
  0x97   :  { %748 = vmatpush.msra.mxu2 %v2588_v28  ;;  %768 = vmatpush.msra.mxu3 %v2592_v29 }
  0x98   :  { %709 = vmatpush.msra.mxu0 %v2594_v30  ;;  %729 = vmatpush.msra.mxu1 %v2598_v31 }
  0x99   :  { %749 = vmatpush.msra.mxu2 %v2600_v32  ;;  %769 = vmatpush.msra.mxu3 %v2604_v33 }
  0x9a   :  { %710 = vmatpush.msra.mxu0 %v2606_v34  ;;  %730 = vmatpush.msra.mxu1 %v2610_v35 }
  0x9b   :  { %750 = vmatpush.msra.mxu2 %v2612_v36  ;;  %770 = vmatpush.msra.mxu3 %v2616_v37 }
  0x9c   :  { %711 = vmatpush.msra.mxu0 %v2618_v38  ;;  %731 = vmatpush.msra.mxu1 %v2622_v39 }
  0x9d   :  { %751 = vmatpush.msra.mxu2 %v2624_v40  ;;  %771 = vmatpush.msra.mxu3 %v2628_v41 }
  0x9e   :  { %712 = vmatpush.msra.mxu0 %v2630_v42  ;;  %732 = vmatpush.msra.mxu1 %v2634_v43 }
  0x9f   :  { %752 = vmatpush.msra.mxu2 %v2636_v44  ;;  %772 = vmatpush.msra.mxu3 %v2640_v45 }
  0xa0   :  { %713 = vmatpush.msra.mxu0 %v2642_v46  ;;  %733 = vmatpush.msra.mxu1 %v2646_v47 }
  0xa1   :  { %753 = vmatpush.msra.mxu2 %v2648_v48  ;;  %773 = vmatpush.msra.mxu3 %v2652_v49 }
  0xa2   :  { %714 = vmatpush.msra.mxu0 %v2654_v50  ;;  %734 = vmatpush.msra.mxu1 %v2658_v51 }
  0xa3   :  { %754 = vmatpush.msra.mxu2 %v2660_v52  ;;  %774 = vmatpush.msra.mxu3 %v2664_v53 }
  0xa4   :  { %715 = vmatpush.msra.mxu0 %v2666_v54  ;;  %735 = vmatpush.msra.mxu1 %v2670_v55 }
  0xa5   :  { %755 = vmatpush.msra.mxu2 %v2672_v56  ;;  %775 = vmatpush.msra.mxu3 %v2676_v57 }
  0xa6   :  { %716 = vmatpush.msra.mxu0 %v2678_v58  ;;  %736 = vmatpush.msra.mxu1 %v2682_v59 }
  0xa7   :  { %756 = vmatpush.msra.mxu2 %v2684_v60  ;;  %776 = vmatpush.msra.mxu3 %v2688_v61 }
  0xa8   :  { %717 = vmatpush.msra.mxu0 %v2690_v62  ;;  %737 = vmatpush.msra.mxu1 %v2694_v63 }
  0xa9   :  { %757 = vmatpush.msra.mxu2 %v2696_v0  ;;  %777 = vmatpush.msra.mxu3 %v3581_v1 }
  0xaa   :  { %718 = vmatpush.msra.mxu0 %v3582_v4  ;;  %738 = vmatpush.msra.mxu1 %v2706_v3 }
  0xab   :  { %758 = vmatpush.msra.mxu2 %v3583_v11  ;;  %778 = vmatpush.msra.mxu3 %v2712_v5 }
  0xac   :  { %719 = vmatpush.msra.mxu0 %v2714_v6  ;;  %739 = vmatpush.msra.mxu1 %v2718_v7  ;;  %v361_v7 = vld [vmem:[#allocation6] sm:$0xf]  ;;  %v371_v6 = vld [vmem:[#allocation7 + $0x1c] sm:$0xf] }
  0xad   :  { %759 = vmatpush.msra.mxu2 %v2720_v8  ;;  %779 = vmatpush.msra.mxu3 %v2724_v9  ;;  %363 = vst [vmem:[#allocation1] ss:$4 sm:$0xff] %v361_v7 }
  0xae   :  { %720 = vmatpush.msra.mxu0 %v2726_v10  ;;  %740 = vmatpush.msra.mxu1 %v3580_v2 }
  0xaf   :  { %760 = vmatpush.msra.mxu2 %v2732_v12  ;;  %780 = vmatpush.msra.mxu3 %v2736_v13 }
  0xb0   :  { %721 = vmatpush.msra.mxu0 %v2743_v14  ;;  %741 = vmatpush.msra.mxu1 %v2745_v15 }
  0xb1   :  { %761 = vmatpush.msra.mxu2 %v2749_v16  ;;  %781 = vmatpush.msra.mxu3 %v2751_v20 }
  0xb4   :  { %v364_v8 = vld.sshfl [vmem:[#allocation1] sm:$0xff pattern:$0x73625140]  ;;  %v365_v9 = vld.sshfl [vmem:[#allocation1 + $0x8] sm:$0xff pattern:$0x73625140] }
  0xb5   :  { %373 = vst [vmem:[#allocation1] ss:$4 sm:$0xff] %v371_v6 }
  0xbc   :  { %v374_v12 = vld.sshfl [vmem:[#allocation1] sm:$0xff pattern:$0x73625140] }
 0x10d   :  { %v298_v10 = vpop.f32.mrf.mxu0  ;;  %v318_v16 = vpop.f32.mrf.mxu1 }
 0x10e   :  { %v368_v2 = vadd.f32 %v364_v8, %v298_v10  ;;  %v369_v1 = vadd.f32 %v365_v9, %v318_v16 }
 0x110   :  { %v2044_v5 = vmul.f32 -1.442695, %v368_v2  ;;  %v375_v2 = vld.sshfl [vmem:[#allocation1 + $0x8] sm:$0xff pattern:$0x73625140] }
 0x112   :  { %2097 = vpow2.f32 %v2044_v5 }
 0x114   :  { %v338_v13 = vpop.f32.mrf.mxu2  ;;  %v358_v8 = vpop.f32.mrf.mxu3 }
 0x115   :  { %v378_v11 = vadd.f32 %v374_v12, %v338_v13 }
 0x117   :  { %v2046_v14 = vmul.f32 -1.442695, %v378_v11  ;;  %v379_v11 = vadd.f32 %v375_v2, %v358_v8 }
 0x118   :  { %v2098_v3 = vpop.eup %2097 }
 0x119   :  { %v386_v15 = vadd.f32 1.0, %v2098_v3  ;;  %2099 = vpow2.f32 %v2046_v14 }
 0x11b   :  { %2101 = vrcp.f32 %v386_v15  ;;  %v399_v5 = vand.u32 2147483648, %v386_v15  ;;  %v397_v12 = vand.u32 2147483647, %v386_v15  ;;  %vm393_vm3 = vweird.f32 %v386_v15 }
 0x11d   :  { %v400_v14 = vor.u32 1.1754944e-38, %v399_v5  ;;  %vm398_vm5 = vcmp.eq.f32.partialorder %v397_v12, 8.507059e+37 }
 0x11f   :  { %v2100_v20 = vpop.eup %2099 }
 0x120   :  { %v438_v4 = vadd.f32 1.0, %v2100_v20 }
 0x121   :  { %v2102_v7 = vpop.eup %2101 }
 0x122   :  { %2103 = vrcp.f32 %v438_v4  ;;  %v389_v0 = vmul.f32 %v2102_v7, %v386_v15  ;;  %vm394_vm2 = vweird.f32 %v2102_v7  ;;  %v451_v61 = vand.u32 2147483648, %v438_v4 }
 0x123   :  { %2105 = vtanh.f32 %v369_v1  ;;  %vm395_vm4 = vmor %vm393_vm3, %vm394_vm2  ;;  %vm445_vm7 = vweird.f32 %v438_v4 }
 0x124   :  { %v390_v6 = vsub.f32 1.0, %v389_v0  ;;  %2107 = vtanh.f32 %v379_v11  ;;  %v452_v15 = vor.u32 1.1754944e-38, %v451_v61 }
 0x126   :  { %v391_v10 = vmul.f32 %v2102_v7, %v390_v6  ;;  %v449_v6 = vand.u32 2147483647, %v438_v4 }
 0x128   :  { %v2104_v13 = vpop.eup %2103  ;;  %v392_v3 = vadd.f32 %v2102_v7, %v391_v10  ;;  %vm450_vm9 = vcmp.eq.f32.partialorder %v449_v6, 8.507059e+37  ;;  %v274_v10 = vld [vmem:[#allocation5] sm:$0x3] }
 0x129   :  { %v441_v63 = vmul.f32 %v2104_v13, %v438_v4  ;;  %v2106_v9 = vpop.eup %2105  ;;  %vm446_vm6 = vweird.f32 %v2104_v13 }
 0x12a   :  { %v396_v20 = vsel %vm395_vm4, %v2102_v7, %v392_v3  ;;  %vm447_vm8 = vmor %vm445_vm7, %vm446_vm6  ;;  %v2108_v2 = vpop.eup %2107 }
 0x12b   :  { %v401_v16 = vsel %vm398_vm5, %v400_v14, %v396_v20  ;;  %v442_v62 = vsub.f32 1.0, %v441_v63  ;;  %v2045_v63 = vmul.f32 -1.442695, %v369_v1  ;;  %v421_v14 = vpop.permute.xlu0 %420 }
 0x12c   :  { %v424_v0 = vmul.f32 %v2106_v9, %v401_v16 }
 0x12d   :  { %v443_v60 = vmul.f32 %v2104_v13, %v442_v62  ;;  %2109 = vpow2.f32 %v2045_v63 }
 0x12e   :  { %426 = vrot.lane.b32.xlu1 %v424_v0, %s2473_s1 }
 0x12f   :  { %v444_v59 = vadd.f32 %v2104_v13, %v443_v60 }
 0x131   :  { %v448_v8 = vsel %vm447_vm8, %v2104_v13, %v444_v59  ;;  %v423_v59 = vmul.f32 %v421_v14, %v401_v16  ;;  %v2047_v16 = vmul.f32 -1.442695, %v379_v11 }
 0x132   :  { %v453_v7 = vsel %vm450_vm9, %v452_v15, %v448_v8 }
 0x133   :  { %v476_v5 = vmul.f32 %v2108_v2, %v453_v7  ;;  %v2110_v62 = vpop.eup %2109 }
 0x134   :  { %v387_v12 = vadd.f32 1.0, %v2110_v62 }
 0x135   :  { %478 = vrot.lane.b32.xlu2 %v476_v5, %s2473_s1 }
 0x136   :  { %472 = vrot.lane.b32.xlu1 %v274_v10, %s2473_s1  ;;  %2111 = vrcp.f32 %v387_v12  ;;  %v414_v0 = vand.u32 2147483648, %v387_v12  ;;  %vm408_vm11 = vweird.f32 %v387_v12  ;;  %v412_v1 = vand.u32 2147483647, %v387_v12 }
 0x138   :  { %v415_v15 = vor.u32 1.1754944e-38, %v414_v0  ;;  %vm413_vm13 = vcmp.eq.f32.partialorder %v412_v1, 8.507059e+37 }
 0x13c   :  { %v2112_v3 = vpop.eup %2111 }
 0x13d   :  { %v404_v60 = vmul.f32 %v2112_v3, %v387_v12  ;;  %vm409_vm10 = vweird.f32 %v2112_v3 }
 0x13e   :  { %vm410_vm12 = vmor %vm408_vm11, %vm409_vm10 }
 0x13f   :  { %v405_v4 = vsub.f32 1.0, %v404_v60 }
 0x141   :  { %v406_v61 = vmul.f32 %v2112_v3, %v405_v4 }
 0x143   :  { %v407_v9 = vadd.f32 %v2112_v3, %v406_v61 }
 0x145   :  { %v411_v6 = vsel %vm410_vm12, %v2112_v3, %v407_v9 }
 0x146   :  { %v416_v2 = vsel %vm413_vm13, %v415_v15, %v411_v6 }
 0x18f   :  { %v479_v12 = vpop.permute.xlu2 %478 }
 0x1a0   :  { %v427_v13 = vpop.permute.xlu1 %426 }
 0x1a1   :  { %v2888_v20 = vadd.f32 %v427_v13, %v423_v59 }
 0x1a3   :  { %2113 = vtanh.f32 %v2888_v20 }
 0x1a4   :  { %2115 = vpow2.f32 %v2047_v16 }
 0x1a8   :  { %v473_v4 = vpop.permute.xlu1 %472 }
 0x1a9   :  { %v2114_v8 = vpop.eup %2113  ;;  %v475_v14 = vmul.f32 %v473_v4, %v453_v7 }
 0x1aa   :  { %v431_v5 = vmul.f32 %v2114_v8, %v416_v2  ;;  %v2116_v10 = vpop.eup %2115 }
 0x1ab   :  { %v439_v63 = vadd.f32 1.0, %v2116_v10  ;;  %v2892_v59 = vadd.f32 %v479_v12, %v475_v14 }
 0x1ac   :  { %485 = vrot.lane.b32.xlu2 %v431_v5, %s2473_s1 }
 0x1ad   :  { %2117 = vrcp.f32 %v439_v63  ;;  %v466_v9 = vand.u32 2147483648, %v439_v63  ;;  %vm460_vm15 = vweird.f32 %v439_v63  ;;  %v464_v11 = vand.u32 2147483647, %v439_v63 }
 0x1ae   :  { %2119 = vtanh.f32 %v2892_v59 }
 0x1af   :  { %v467_v6 = vor.u32 1.1754944e-38, %v466_v9  ;;  %vm465_vm3 = vcmp.eq.f32.partialorder %v464_v11, 8.507059e+37 }
 0x1b3   :  { %v2118_v62 = vpop.eup %2117 }
 0x1b4   :  { %v456_v60 = vmul.f32 %v2118_v62, %v439_v63  ;;  %vm461_vm14 = vweird.f32 %v2118_v62  ;;  %v2120_v1 = vpop.eup %2119 }
 0x1b5   :  { %vm462_vm2 = vmor %vm460_vm15, %vm461_vm14 }
 0x1b6   :  { %v457_v61 = vsub.f32 1.0, %v456_v60 }
 0x1b8   :  { %v458_v3 = vmul.f32 %v2118_v62, %v457_v61 }
 0x1ba   :  { %v459_v13 = vadd.f32 %v2118_v62, %v458_v3 }
 0x1bc   :  { %v463_v0 = vsel %vm462_vm2, %v2118_v62, %v459_v13 }
 0x1bd   :  { %v468_v15 = vsel %vm465_vm3, %v467_v6, %v463_v0 }
 0x1be   :  { %v2895_v8 = vmul.f32 %v2120_v1, %v468_v15 }
 0x1c0   :  { %3584 = vst [vmem:[#allocation37_spill] sm:$0xff] %v2895_v8 }
 0x206   :  { %v486_v7 = vpop.permute.xlu2 %485 }
 0x207   :  { %489 = vst.msk [vmem:[%s3473_s3] sm:$0x3] %vm202_vm0, %v486_v7  ;;  %v496_v2 = vsel %vm279_vm1, %v486_v7, %v2895_v8  ;;  %v3166_v8 = vld [vmem:[#allocation8] sm:$0xff] }
 0x208   :  { %513 = vmatmul.f32.vlgmr.msrb.gmra.mxu0 %v496_v2  ;;  %533 = vmatmul.f32.vlgmr.msrb.gmra.mxu1 %v496_v2 }
 0x209   :  { %553 = vmatmul.f32.vlgmr.msrb.gmra.mxu2 %v496_v2  ;;  %573 = vmatmul.f32.vlgmr.msrb.gmra.mxu3 %v496_v2 }
 0x20a   :  { %915 = vmatpush.msrb.mxu0 %v2562_v17  ;;  %935 = vmatpush.msrb.mxu1 %v2564_v18  ;;  %v3585_v17 = vld [vmem:[#allocation14_spill] sm:$0xff]  ;;  %v3586_v18 = vld [vmem:[#allocation15_spill] sm:$0xff] }
 0x20b   :  { %955 = vmatpush.msrb.mxu2 %v2566_v19  ;;  %975 = vmatpush.msrb.mxu3 %v2570_v21  ;;  %v3587_v19 = vld [vmem:[#allocation16_spill] sm:$0xff]  ;;  %v3588_v21 = vld [vmem:[#allocation17_spill] sm:$0xff] }
 0x20c   :  { %916 = vmatpush.msrb.mxu0 %v2572_v22  ;;  %936 = vmatpush.msrb.mxu1 %v2576_v23  ;;  %v3589_v22 = vld [vmem:[#allocation18_spill] sm:$0xff]  ;;  %v3590_v23 = vld [vmem:[#allocation19_spill] sm:$0xff] }
 0x20d   :  { %956 = vmatpush.msrb.mxu2 %v2578_v24  ;;  %976 = vmatpush.msrb.mxu3 %v2580_v25  ;;  %v3591_v24 = vld [vmem:[#allocation20_spill] sm:$0xff]  ;;  %v3592_v25 = vld [vmem:[#allocation21_spill] sm:$0xff] }
 0x20e   :  { %917 = vmatpush.msrb.mxu0 %v2584_v26  ;;  %937 = vmatpush.msrb.mxu1 %v2586_v27  ;;  %v3593_v26 = vld [vmem:[#allocation22_spill] sm:$0xff]  ;;  %v3594_v27 = vld [vmem:[#allocation23_spill] sm:$0xff] }
 0x20f   :  { %957 = vmatpush.msrb.mxu2 %v2588_v28  ;;  %977 = vmatpush.msrb.mxu3 %v2592_v29  ;;  %v3595_v28 = vld [vmem:[#allocation24_spill] sm:$0xff]  ;;  %v3596_v29 = vld [vmem:[#allocation25_spill] sm:$0xff] }
 0x210   :  { %918 = vmatpush.msrb.mxu0 %v2594_v30  ;;  %938 = vmatpush.msrb.mxu1 %v2598_v31  ;;  %v3597_v30 = vld [vmem:[#allocation26_spill] sm:$0xff]  ;;  %v3598_v31 = vld [vmem:[#allocation27_spill] sm:$0xff] }
 0x211   :  { %958 = vmatpush.msrb.mxu2 %v2600_v32  ;;  %978 = vmatpush.msrb.mxu3 %v2604_v33  ;;  %v3599_v32 = vld [vmem:[#allocation28_spill] sm:$0xff]  ;;  %v3600_v33 = vld [vmem:[#allocation29_spill] sm:$0xff] }
 0x212   :  { %919 = vmatpush.msrb.mxu0 %v2606_v34  ;;  %939 = vmatpush.msrb.mxu1 %v2610_v35  ;;  %v3601_v34 = vld [vmem:[#allocation30_spill] sm:$0xff]  ;;  %v3602_v35 = vld [vmem:[#allocation31_spill] sm:$0xff] }
 0x213   :  { %959 = vmatpush.msrb.mxu2 %v2612_v36  ;;  %979 = vmatpush.msrb.mxu3 %v2616_v37  ;;  %v3603_v36 = vld [vmem:[#allocation32_spill] sm:$0xff]  ;;  %v3604_v37 = vld [vmem:[#allocation33_spill] sm:$0xff] }
 0x214   :  { %920 = vmatpush.msrb.mxu0 %v2618_v38  ;;  %940 = vmatpush.msrb.mxu1 %v2622_v39  ;;  %v3605_v38 = vld [vmem:[#allocation34_spill] sm:$0xff]  ;;  %v3606_v39 = vld [vmem:[#allocation35_spill] sm:$0xff] }
 0x215   :  { %960 = vmatpush.msrb.mxu2 %v2624_v40  ;;  %980 = vmatpush.msrb.mxu3 %v2628_v41  ;;  %v3607_v40 = vld [vmem:[#allocation36_spill] sm:$0xff]  ;;  %v578_v41 = vld [vmem:[#allocation6 + $0x4] sm:$0xf] }
 0x216   :  { %921 = vmatpush.msrb.mxu0 %v2630_v42  ;;  %941 = vmatpush.msrb.mxu1 %v2634_v43  ;;  %580 = vst [vmem:[#allocation1] ss:$4 sm:$0xff] %v578_v41 }
 0x217   :  { %961 = vmatpush.msrb.mxu2 %v2636_v44  ;;  %981 = vmatpush.msrb.mxu3 %v2640_v45  ;;  %v588_v44 = vld [vmem:[#allocation7 + $0x18] sm:$0xf]  ;;  %3630 = vst [vmem:[#allocation36_spill] sm:$0xff] %v3166_v8 }
 0x218   :  { %922 = vmatpush.msrb.mxu0 %v2642_v46  ;;  %942 = vmatpush.msrb.mxu1 %v2646_v47 }
 0x219   :  { %962 = vmatpush.msrb.mxu2 %v2648_v48  ;;  %982 = vmatpush.msrb.mxu3 %v2652_v49 }
 0x21a   :  { %923 = vmatpush.msrb.mxu0 %v2654_v50  ;;  %943 = vmatpush.msrb.mxu1 %v2658_v51 }
 0x21b   :  { %963 = vmatpush.msrb.mxu2 %v2660_v52  ;;  %983 = vmatpush.msrb.mxu3 %v2664_v53 }
 0x21c   :  { %924 = vmatpush.msrb.mxu0 %v2666_v54  ;;  %944 = vmatpush.msrb.mxu1 %v2670_v55 }
 0x21d   :  { %964 = vmatpush.msrb.mxu2 %v2672_v56  ;;  %984 = vmatpush.msrb.mxu3 %v2676_v57  ;;  %v581_v42 = vld.sshfl [vmem:[#allocation1] sm:$0xff pattern:$0x73625140]  ;;  %v582_v43 = vld.sshfl [vmem:[#allocation1 + $0x8] sm:$0xff pattern:$0x73625140] }
 0x21e   :  { %925 = vmatpush.msrb.mxu0 %v2678_v58  ;;  %945 = vmatpush.msrb.mxu1 %v3585_v17  ;;  %590 = vst [vmem:[#allocation1] ss:$4 sm:$0xff] %v588_v44 }
 0x21f   :  { %965 = vmatpush.msrb.mxu2 %v3586_v18  ;;  %985 = vmatpush.msrb.mxu3 %v3587_v19 }
 0x220   :  { %926 = vmatpush.msrb.mxu0 %v3588_v21  ;;  %946 = vmatpush.msrb.mxu1 %v3589_v22 }
 0x221   :  { %966 = vmatpush.msrb.mxu2 %v3590_v23  ;;  %986 = vmatpush.msrb.mxu3 %v3591_v24 }
 0x222   :  { %927 = vmatpush.msrb.mxu0 %v3592_v25  ;;  %947 = vmatpush.msrb.mxu1 %v3593_v26 }
 0x223   :  { %967 = vmatpush.msrb.mxu2 %v3594_v27  ;;  %987 = vmatpush.msrb.mxu3 %v3595_v28 }
 0x224   :  { %928 = vmatpush.msrb.mxu0 %v3596_v29  ;;  %948 = vmatpush.msrb.mxu1 %v3597_v30 }
 0x225   :  { %968 = vmatpush.msrb.mxu2 %v3598_v31  ;;  %988 = vmatpush.msrb.mxu3 %v3599_v32  ;;  %v591_v48 = vld.sshfl [vmem:[#allocation1] sm:$0xff pattern:$0x73625140]  ;;  %v592_v63 = vld.sshfl [vmem:[#allocation1 + $0x8] sm:$0xff pattern:$0x73625140] }
 0x226   :  { %929 = vmatpush.msrb.mxu0 %v3600_v33  ;;  %949 = vmatpush.msrb.mxu1 %v3601_v34 }
 0x227   :  { %969 = vmatpush.msrb.mxu2 %v3602_v35  ;;  %989 = vmatpush.msrb.mxu3 %v3603_v36 }
 0x228   :  { %930 = vmatpush.msrb.mxu0 %v3604_v37  ;;  %950 = vmatpush.msrb.mxu1 %v3605_v38 }
 0x229   :  { %970 = vmatpush.msrb.mxu2 %v3606_v39  ;;  %990 = vmatpush.msrb.mxu3 %v3607_v40 }
 0x285   :  { %v514_v45 = vpop.f32.mrf.mxu0  ;;  %v534_v54 = vpop.f32.mrf.mxu1 }
 0x286   :  { %v585_v46 = vadd.f32 %v581_v42, %v514_v45  ;;  %v586_v58 = vadd.f32 %v582_v43, %v534_v54 }
 0x288   :  { %v2049_v47 = vmul.f32 -1.442695, %v585_v46  ;;  %v2050_v24 = vmul.f32 -1.442695, %v586_v58 }
 0x28a   :  { %2121 = vpow2.f32 %v2049_v47 }
 0x28c   :  { %v554_v49 = vpop.f32.mrf.mxu2  ;;  %v574_v10 = vpop.f32.mrf.mxu3 }
 0x28d   :  { %v595_v50 = vadd.f32 %v591_v48, %v554_v49  ;;  %v596_v61 = vadd.f32 %v592_v63, %v574_v10  ;;  %v2989_v10 = vld [vmem:[#allocation8 + $0x1e8] sm:$0xff]  ;;  %v2992_v63 = vld [vmem:[#allocation8 + $0x1f0] sm:$0xff] }
 0x28f   :  { %v2051_v51 = vmul.f32 -1.442695, %v595_v50 }
 0x290   :  { %v2122_v52 = vpop.eup %2121 }
 0x291   :  { %v603_v53 = vadd.f32 1.0, %v2122_v52  ;;  %2123 = vpow2.f32 %v2051_v51 }
 0x293   :  { %2125 = vrcp.f32 %v603_v53  ;;  %v616_v62 = vand.u32 2147483648, %v603_v53  ;;  %v614_v4 = vand.u32 2147483647, %v603_v53  ;;  %vm610_vm5 = vweird.f32 %v603_v53 }
 0x295   :  { %v617_v13 = vor.u32 1.1754944e-38, %v616_v62  ;;  %vm615_vm7 = vcmp.eq.f32.partialorder %v614_v4, 8.507059e+37  ;;  %v2995_v62 = vld [vmem:[#allocation8 + $0x1f8] sm:$0xff]  ;;  %v3001_v4 = vld [vmem:[#allocation8 + $0x1c8] sm:$0xff] }
 0x297   :  { %v2124_v55 = vpop.eup %2123 }
 0x298   :  { %v651_v56 = vadd.f32 1.0, %v2124_v55 }
 0x299   :  { %v2126_v57 = vpop.eup %2125 }
 0x29a   :  { %v606_v5 = vmul.f32 %v2126_v57, %v603_v53  ;;  %2127 = vrcp.f32 %v651_v56  ;;  %vm611_vm4 = vweird.f32 %v2126_v57  ;;  %v664_v15 = vand.u32 2147483648, %v651_v56 }
 0x29b   :  { %2129 = vtanh.f32 %v586_v58  ;;  %vm612_vm6 = vmor %vm610_vm5, %vm611_vm4  ;;  %v662_v2 = vand.u32 2147483647, %v651_v56  ;;  %vm658_vm9 = vweird.f32 %v651_v56 }
 0x29c   :  { %v607_v16 = vsub.f32 1.0, %v606_v5  ;;  %2131 = vtanh.f32 %v596_v61  ;;  %v665_v18 = vor.u32 1.1754944e-38, %v664_v15  ;;  %v3034_v15 = vld [vmem:[#allocation8 + $0x160] sm:$0xff] }
 0x29d   :  { %vm663_vm11 = vcmp.eq.f32.partialorder %v662_v2, 8.507059e+37  ;;  %2133 = vpow2.f32 %v2050_v24  ;;  %v3040_v2 = vld [vmem:[#allocation8 + $0x170] sm:$0xff]  ;;  %v3061_v24 = vld [vmem:[#allocation8 + $0x128] sm:$0xff] }
 0x29e   :  { %v608_v60 = vmul.f32 %v2126_v57, %v607_v16  ;;  %v2986_v16 = vld [vmem:[#allocation8 + $0x1e0] sm:$0xff] }
 0x2a0   :  { %v2128_v14 = vpop.eup %2127  ;;  %v609_v12 = vadd.f32 %v2126_v57, %v608_v60  ;;  %v2998_v60 = vld [vmem:[#allocation8 + $0x1c0] sm:$0xff] }
 0x2a1   :  { %v654_v3 = vmul.f32 %v2128_v14, %v651_v56  ;;  %v2130_v11 = vpop.eup %2129  ;;  %vm659_vm8 = vweird.f32 %v2128_v14 }
 0x2a2   :  { %v613_v9 = vsel %vm612_vm6, %v2126_v57, %v609_v12  ;;  %vm660_vm10 = vmor %vm658_vm9, %vm659_vm8  ;;  %v2132_v21 = vpop.eup %2131  ;;  %v3010_v12 = vld [vmem:[#allocation8 + $0x1a0] sm:$0xff] }
 0x2a3   :  { %v618_v0 = vsel %vm615_vm7, %v617_v13, %v613_v9  ;;  %v655_v1 = vsub.f32 1.0, %v654_v3  ;;  %v2134_v25 = vpop.eup %2133  ;;  %v3013_v3 = vld [vmem:[#allocation8 + $0x1a8] sm:$0xff]  ;;  %v3016_v13 = vld [vmem:[#allocation8 + $0x1b0] sm:$0xff]  ;;  %v3019_v9 = vld [vmem:[#allocation8 + $0x1b8] sm:$0xff] }
 0x2a4   :  { %v637_v6 = vmul.f32 %v2130_v11, %v618_v0  ;;  %v604_v26 = vadd.f32 1.0, %v2134_v25  ;;  %v636_v31 = vmul.f32 %v618_v0, %v2888_v20  ;;  %v2052_v20 = vmul.f32 -1.442695, %v596_v61  ;;  %v3007_v61 = vld [vmem:[#allocation8 + $0x1d8] sm:$0xff]  ;;  %v3022_v11 = vld [vmem:[#allocation8 + $0x180] sm:$0xff]  ;;  %v3025_v0 = vld [vmem:[#allocation8 + $0x188] sm:$0xff] }
 0x2a5   :  { %v656_v7 = vmul.f32 %v2128_v14, %v655_v1  ;;  %v3028_v1 = vld [vmem:[#allocation8 + $0x190] sm:$0xff] }
 0x2a6   :  { %639 = vrot.lane.b32.xlu0 %v637_v6, %s2473_s1  ;;  %2135 = vrcp.f32 %v604_v26  ;;  %v631_v35 = vand.u32 2147483648, %v604_v26  ;;  %vm625_vm13 = vweird.f32 %v604_v26  ;;  %v629_v36 = vand.u32 2147483647, %v604_v26  ;;  %v3031_v6 = vld [vmem:[#allocation8 + $0x198] sm:$0xff]  ;;  %v3064_v25 = vld [vmem:[#allocation8 + $0x130] sm:$0xff] }
 0x2a7   :  { %v657_v17 = vadd.f32 %v2128_v14, %v656_v7  ;;  %v3037_v7 = vld [vmem:[#allocation8 + $0x168] sm:$0xff] }
 0x2a8   :  { %v632_v38 = vor.u32 1.1754944e-38, %v631_v35  ;;  %vm630_vm15 = vcmp.eq.f32.partialorder %v629_v36, 8.507059e+37  ;;  %v3091_v35 = vld [vmem:[#allocation8 + $0xf8] sm:$0xff]  ;;  %v3094_v36 = vld [vmem:[#allocation8 + $0xc0] sm:$0xff] }
 0x2a9   :  { %v661_v19 = vsel %vm660_vm10, %v2128_v14, %v657_v17  ;;  %v3004_v14 = vld [vmem:[#allocation8 + $0x1d0] sm:$0xff]  ;;  %v3043_v17 = vld [vmem:[#allocation8 + $0x178] sm:$0xff] }
 0x2aa   :  { %v666_v22 = vsel %vm663_vm11, %v665_v18, %v661_v19  ;;  %v3046_v18 = vld [vmem:[#allocation8 + $0x140] sm:$0xff]  ;;  %v3049_v19 = vld [vmem:[#allocation8 + $0x148] sm:$0xff] }
 0x2ab   :  { %v685_v23 = vmul.f32 %v2132_v21, %v666_v22  ;;  %v684_v48 = vmul.f32 %v666_v22, %v2892_v59  ;;  %v3052_v21 = vld [vmem:[#allocation8 + $0x150] sm:$0xff]  ;;  %v3055_v22 = vld [vmem:[#allocation8 + $0x158] sm:$0xff] }
 0x2ac   :  { %v2136_v27 = vpop.eup %2135 }
 0x2ad   :  { %687 = vrot.lane.b32.xlu1 %v685_v23, %s2473_s1  ;;  %v621_v28 = vmul.f32 %v2136_v27, %v604_v26  ;;  %vm626_vm12 = vweird.f32 %v2136_v27  ;;  %v3058_v23 = vld [vmem:[#allocation8 + $0x120] sm:$0xff]  ;;  %v3067_v26 = vld [vmem:[#allocation8 + $0x138] sm:$0xff] }
 0x2ae   :  { %vm627_vm14 = vmor %vm625_vm13, %vm626_vm12 }
 0x2af   :  { %v622_v29 = vsub.f32 1.0, %v621_v28  ;;  %v3073_v28 = vld [vmem:[#allocation8 + $0x108] sm:$0xff] }
 0x2b1   :  { %v623_v30 = vmul.f32 %v2136_v27, %v622_v29  ;;  %v3076_v29 = vld [vmem:[#allocation8 + $0x110] sm:$0xff] }
 0x2b3   :  { %v624_v34 = vadd.f32 %v2136_v27, %v623_v30  ;;  %v3079_v30 = vld [vmem:[#allocation8 + $0x118] sm:$0xff] }
 0x2b5   :  { %v628_v37 = vsel %vm627_vm14, %v2136_v27, %v624_v34  ;;  %v3070_v27 = vld [vmem:[#allocation8 + $0x100] sm:$0xff]  ;;  %v3088_v34 = vld [vmem:[#allocation8 + $0xf0] sm:$0xff] }
 0x2b6   :  { %v633_v40 = vsel %vm630_vm15, %v632_v38, %v628_v37  ;;  %v3097_v37 = vld [vmem:[#allocation8 + $0xc8] sm:$0xff]  ;;  %v3100_v38 = vld [vmem:[#allocation8 + $0xd0] sm:$0xff] }
 0x318   :  { %v640_v32 = vpop.permute.xlu0 %639 }
 0x319   :  { %v2970_v33 = vadd.f32 %v640_v32, %v636_v31  ;;  %v3082_v31 = vld [vmem:[#allocation8 + $0xe0] sm:$0xff]  ;;  %v3085_v32 = vld [vmem:[#allocation8 + $0xe8] sm:$0xff] }
 0x31b   :  { %2137 = vtanh.f32 %v2970_v33 }
 0x31c   :  { %2139 = vpow2.f32 %v2052_v20  ;;  %v3112_v20 = vld [vmem:[#allocation8 + $0xb0] sm:$0xff] }
 0x31d   :  { %3612 = vst [vmem:[#allocation18_spill] sm:$0xff] %v3112_v20 }
 0x31f   :  { %v688_v47 = vpop.permute.xlu1 %687 }
 0x320   :  { %v2975_v49 = vadd.f32 %v688_v47, %v684_v48  ;;  %v3130_v47 = vld [vmem:[#allocation8 + $0x60] sm:$0xff]  ;;  %v3133_v48 = vld [vmem:[#allocation8 + $0x68] sm:$0xff] }
 0x321   :  { %v2138_v39 = vpop.eup %2137  ;;  %3618 = vst [vmem:[#allocation24_spill] sm:$0xff] %v3130_v47 }
 0x322   :  { %v644_v41 = vmul.f32 %v2138_v39, %v633_v40  ;;  %v2140_v42 = vpop.eup %2139  ;;  %v3103_v39 = vld [vmem:[#allocation8 + $0xd8] sm:$0xff]  ;;  %v3106_v40 = vld [vmem:[#allocation8 + $0xa0] sm:$0xff]  ;;  %3619 = vst [vmem:[#allocation25_spill] sm:$0xff] %v3133_v48 }
 0x323   :  { %v652_v43 = vadd.f32 1.0, %v2140_v42  ;;  %3609 = vst [vmem:[#allocation15_spill] sm:$0xff] %v3103_v39  ;;  %v3115_v42 = vld [vmem:[#allocation8 + $0xb8] sm:$0xff] }
 0x324   :  { %694 = vrot.lane.b32.xlu2 %v644_v41, %s2473_s1  ;;  %3610 = vst [vmem:[#allocation16_spill] sm:$0xff] %v3106_v40  ;;  %v3109_v41 = vld [vmem:[#allocation8 + $0xa8] sm:$0xff] }
 0x325   :  { %2141 = vrcp.f32 %v652_v43  ;;  %v679_v52 = vand.u32 2147483648, %v652_v43  ;;  %vm673_vm3 = vweird.f32 %v652_v43  ;;  %v677_v53 = vand.u32 2147483647, %v652_v43  ;;  %3611 = vst [vmem:[#allocation17_spill] sm:$0xff] %v3109_v41 }
 0x326   :  { %2143 = vtanh.f32 %v2975_v49  ;;  %3613 = vst [vmem:[#allocation19_spill] sm:$0xff] %v3115_v42 }
 0x327   :  { %v680_v56 = vor.u32 1.1754944e-38, %v679_v52  ;;  %vm678_vm5 = vcmp.eq.f32.partialorder %v677_v53, 8.507059e+37  ;;  %v3142_v52 = vld [vmem:[#allocation8 + $0x40] sm:$0xff]  ;;  %v3145_v53 = vld [vmem:[#allocation8 + $0x48] sm:$0xff] }
 0x328   :  { %3622 = vst [vmem:[#allocation28_spill] sm:$0xff] %v3142_v52 }
 0x329   :  { %3623 = vst [vmem:[#allocation29_spill] sm:$0xff] %v3145_v53 }
 0x32b   :  { %v2142_v44 = vpop.eup %2141 }
 0x32c   :  { %v669_v45 = vmul.f32 %v2142_v44, %v652_v43  ;;  %vm674_vm2 = vweird.f32 %v2142_v44  ;;  %v2144_v55 = vpop.eup %2143  ;;  %v3118_v43 = vld [vmem:[#allocation8 + $0x80] sm:$0xff] }
 0x32d   :  { %vm675_vm4 = vmor %vm673_vm3, %vm674_vm2  ;;  %3614 = vst [vmem:[#allocation20_spill] sm:$0xff] %v3118_v43 }
 0x32e   :  { %v670_v46 = vsub.f32 1.0, %v669_v45  ;;  %v3124_v45 = vld [vmem:[#allocation8 + $0x90] sm:$0xff] }
 0x32f   :  { %3616 = vst [vmem:[#allocation22_spill] sm:$0xff] %v3124_v45 }
 0x330   :  { %v671_v50 = vmul.f32 %v2142_v44, %v670_v46  ;;  %v3127_v46 = vld [vmem:[#allocation8 + $0x98] sm:$0xff] }
 0x331   :  { %3617 = vst [vmem:[#allocation23_spill] sm:$0xff] %v3127_v46 }
 0x332   :  { %v672_v51 = vadd.f32 %v2142_v44, %v671_v50  ;;  %v3136_v50 = vld [vmem:[#allocation8 + $0x70] sm:$0xff] }
 0x333   :  { %3620 = vst [vmem:[#allocation26_spill] sm:$0xff] %v3136_v50 }
 0x334   :  { %v676_v54 = vsel %vm675_vm4, %v2142_v44, %v672_v51  ;;  %v3121_v44 = vld [vmem:[#allocation8 + $0x88] sm:$0xff]  ;;  %v3139_v51 = vld [vmem:[#allocation8 + $0x78] sm:$0xff] }
 0x335   :  { %v681_v57 = vsel %vm678_vm5, %v680_v56, %v676_v54  ;;  %3615 = vst [vmem:[#allocation21_spill] sm:$0xff] %v3121_v44  ;;  %v3148_v54 = vld [vmem:[#allocation8 + $0x50] sm:$0xff]  ;;  %v3154_v56 = vld [vmem:[#allocation8 + $0x20] sm:$0xff] }
 0x336   :  { %v2978_v58 = vmul.f32 %v2144_v55, %v681_v57  ;;  %3621 = vst [vmem:[#allocation27_spill] sm:$0xff] %v3139_v51  ;;  %v3151_v55 = vld [vmem:[#allocation8 + $0x58] sm:$0xff]  ;;  %v3157_v57 = vld [vmem:[#allocation8 + $0x28] sm:$0xff] }
 0x337   :  { %3624 = vst [vmem:[#allocation30_spill] sm:$0xff] %v3148_v54 }
 0x338   :  { %3608 = vst [vmem:[#allocation14_spill] sm:$0xff] %v2978_v58 }
 0x339   :  { %3625 = vst [vmem:[#allocation31_spill] sm:$0xff] %v3151_v55 }
 0x33a   :  { %3626 = vst [vmem:[#allocation32_spill] sm:$0xff] %v3154_v56 }
 0x33b   :  { %3627 = vst [vmem:[#allocation33_spill] sm:$0xff] %v3157_v57 }
 0x37e   :  { %v695_v5 = vpop.permute.xlu2 %694 }
 0x37f   :  { %2053 = vst.msk [vmem:[%s3473_s3 + $0x2] sm:$0x3] %vm202_vm0, %v695_v5  ;;  %v705_v59 = vsel %vm279_vm1, %v695_v5, %v2978_v58  ;;  %v3160_v5 = vld [vmem:[#allocation8 + $0x30] sm:$0xff]  ;;  %v3169_v58 = vld [vmem:[#allocation8 + $0x8] sm:$0xff] }
 0x380   :  { %722 = vmatmul.f32.vlgmr.msra.gmra.mxu0 %v705_v59  ;;  %742 = vmatmul.f32.vlgmr.msra.gmra.mxu1 %v705_v59  ;;  %3628 = vst [vmem:[#allocation34_spill] sm:$0xff] %v3160_v5 }
 0x381   :  { %762 = vmatmul.f32.vlgmr.msra.gmra.mxu2 %v705_v59  ;;  %782 = vmatmul.f32.vlgmr.msra.gmra.mxu3 %v705_v59  ;;  %v3163_v59 = vld [vmem:[#allocation8 + $0x38] sm:$0xff]  ;;  %3631 = vst [vmem:[#allocation38_spill] sm:$0xff] %v3169_v58 }
 0x382   :  { %1124 = vmatpush.msra.mxu0 %v2986_v16  ;;  %1144 = vmatpush.msra.mxu1 %v2989_v10  ;;  %3629 = vst [vmem:[#allocation35_spill] sm:$0xff] %v3163_v59 }
 0x383   :  { %1164 = vmatpush.msra.mxu2 %v2992_v63  ;;  %1184 = vmatpush.msra.mxu3 %v2995_v62 }
 0x384   :  { %1125 = vmatpush.msra.mxu0 %v2998_v60  ;;  %1145 = vmatpush.msra.mxu1 %v3001_v4 }
 0x385   :  { %1165 = vmatpush.msra.mxu2 %v3004_v14  ;;  %1185 = vmatpush.msra.mxu3 %v3007_v61 }
 0x386   :  { %1126 = vmatpush.msra.mxu0 %v3010_v12  ;;  %1146 = vmatpush.msra.mxu1 %v3013_v3 }
 0x387   :  { %1166 = vmatpush.msra.mxu2 %v3016_v13  ;;  %1186 = vmatpush.msra.mxu3 %v3019_v9 }
 0x388   :  { %1127 = vmatpush.msra.mxu0 %v3022_v11  ;;  %1147 = vmatpush.msra.mxu1 %v3025_v0 }
 0x389   :  { %1167 = vmatpush.msra.mxu2 %v3028_v1  ;;  %1187 = vmatpush.msra.mxu3 %v3031_v6 }
 0x38a   :  { %1128 = vmatpush.msra.mxu0 %v3034_v15  ;;  %1148 = vmatpush.msra.mxu1 %v3037_v7 }
 0x38b   :  { %1168 = vmatpush.msra.mxu2 %v3040_v2  ;;  %1188 = vmatpush.msra.mxu3 %v3043_v17 }
 0x38c   :  { %1129 = vmatpush.msra.mxu0 %v3046_v18  ;;  %1149 = vmatpush.msra.mxu1 %v3049_v19 }
 0x38d   :  { %1169 = vmatpush.msra.mxu2 %v3052_v21  ;;  %1189 = vmatpush.msra.mxu3 %v3055_v22 }
 0x38e   :  { %1130 = vmatpush.msra.mxu0 %v3058_v23  ;;  %1150 = vmatpush.msra.mxu1 %v3061_v24 }
 0x38f   :  { %1170 = vmatpush.msra.mxu2 %v3064_v25  ;;  %1190 = vmatpush.msra.mxu3 %v3067_v26 }
 0x390   :  { %1131 = vmatpush.msra.mxu0 %v3070_v27  ;;  %1151 = vmatpush.msra.mxu1 %v3073_v28 }
 0x391   :  { %1171 = vmatpush.msra.mxu2 %v3076_v29  ;;  %1191 = vmatpush.msra.mxu3 %v3079_v30 }
 0x392   :  { %1132 = vmatpush.msra.mxu0 %v3082_v31  ;;  %1152 = vmatpush.msra.mxu1 %v3085_v32 }
 0x393   :  { %1172 = vmatpush.msra.mxu2 %v3088_v34  ;;  %1192 = vmatpush.msra.mxu3 %v3091_v35 }
 0x394   :  { %1133 = vmatpush.msra.mxu0 %v3094_v36  ;;  %1153 = vmatpush.msra.mxu1 %v3097_v37 }
 0x395   :  { %1173 = vmatpush.msra.mxu2 %v3100_v38  ;;  %1193 = vmatpush.msra.mxu3 %v3103_v39 }
 0x396   :  { %1134 = vmatpush.msra.mxu0 %v3106_v40  ;;  %1154 = vmatpush.msra.mxu1 %v3109_v41 }
 0x397   :  { %1174 = vmatpush.msra.mxu2 %v3112_v20  ;;  %1194 = vmatpush.msra.mxu3 %v3115_v42 }
 0x398   :  { %1135 = vmatpush.msra.mxu0 %v3118_v43  ;;  %1155 = vmatpush.msra.mxu1 %v3121_v44 }
 0x399   :  { %1175 = vmatpush.msra.mxu2 %v3124_v45  ;;  %1195 = vmatpush.msra.mxu3 %v3127_v46 }
 0x39a   :  { %1136 = vmatpush.msra.mxu0 %v3130_v47  ;;  %1156 = vmatpush.msra.mxu1 %v3133_v48 }
 0x39b   :  { %1176 = vmatpush.msra.mxu2 %v3136_v50  ;;  %1196 = vmatpush.msra.mxu3 %v3139_v51 }
 0x39c   :  { %1137 = vmatpush.msra.mxu0 %v3142_v52  ;;  %1157 = vmatpush.msra.mxu1 %v3145_v53 }
 0x39d   :  { %1177 = vmatpush.msra.mxu2 %v3148_v54  ;;  %1197 = vmatpush.msra.mxu3 %v3151_v55  ;;  %v797_v54 = vld [vmem:[#allocation7 + $0x14] sm:$0xf] }
 0x39e   :  { %1138 = vmatpush.msra.mxu0 %v3154_v56  ;;  %1158 = vmatpush.msra.mxu1 %v3157_v57  ;;  %v3172_v56 = vld [vmem:[#allocation8 + $0x10] sm:$0xff]  ;;  %v3175_v57 = vld [vmem:[#allocation8 + $0x18] sm:$0xff] }
 0x39f   :  { %1178 = vmatpush.msra.mxu2 %v3160_v5  ;;  %1198 = vmatpush.msra.mxu3 %v3163_v59  ;;  %3632 = vst [vmem:[#allocation39_spill] sm:$0xff] %v3172_v56  ;;  %v787_v5 = vld [vmem:[#allocation6 + $0x8] sm:$0xf] }
 0x3a0   :  { %1139 = vmatpush.msra.mxu0 %v3166_v8  ;;  %1159 = vmatpush.msra.mxu1 %v3169_v58  ;;  %3633 = vst [vmem:[#allocation40_spill] sm:$0xff] %v3175_v57 }
 0x3a1   :  { %1179 = vmatpush.msra.mxu2 %v3172_v56  ;;  %1199 = vmatpush.msra.mxu3 %v3175_v57  ;;  %789 = vst [vmem:[#allocation1] ss:$4 sm:$0xff] %v787_v5 }
 0x3a8   :  { %v790_v55 = vld.sshfl [vmem:[#allocation1] sm:$0xff pattern:$0x73625140]  ;;  %v791_v59 = vld.sshfl [vmem:[#allocation1 + $0x8] sm:$0xff pattern:$0x73625140] }
 0x3a9   :  { %799 = vst [vmem:[#allocation1] ss:$4 sm:$0xff] %v797_v54 }
 0x3b0   :  { %v800_v51 = vld.sshfl [vmem:[#allocation1] sm:$0xff pattern:$0x73625140] }
 0x3fd   :  { %v723_v53 = vpop.f32.mrf.mxu0  ;;  %v743_v46 = vpop.f32.mrf.mxu1 }
 0x3fe   :  { %v794_v8 = vadd.f32 %v790_v55, %v723_v53  ;;  %v795_v44 = vadd.f32 %v791_v59, %v743_v46 }
 0x400   :  { %v2055_v52 = vmul.f32 -1.442695, %v794_v8  ;;  %v801_v8 = vld.sshfl [vmem:[#allocation1 + $0x8] sm:$0xff pattern:$0x73625140] }
 0x402   :  { %2145 = vpow2.f32 %v2055_v52 }
 0x404   :  { %v763_v58 = vpop.f32.mrf.mxu2  ;;  %v783_v53 = vpop.f32.mrf.mxu3 }
 0x405   :  { %v804_v50 = vadd.f32 %v800_v51, %v763_v58  ;;  %v805_v51 = vadd.f32 %v801_v8, %v783_v53 }
 0x407   :  { %v2057_v48 = vmul.f32 -1.442695, %v804_v50 }
 0x408   :  { %v2146_v47 = vpop.eup %2145 }
 0x409   :  { %v812_v56 = vadd.f32 1.0, %v2146_v47  ;;  %2147 = vpow2.f32 %v2057_v48 }
 0x40b   :  { %2149 = vrcp.f32 %v812_v56  ;;  %v825_v52 = vand.u32 2147483648, %v812_v56  ;;  %v823_v58 = vand.u32 2147483647, %v812_v56  ;;  %vm819_vm7 = vweird.f32 %v812_v56 }
 0x40d   :  { %v826_v42 = vor.u32 1.1754944e-38, %v825_v52  ;;  %vm824_vm9 = vcmp.eq.f32.partialorder %v823_v58, 8.507059e+37 }
 0x40f   :  { %v2148_v57 = vpop.eup %2147 }
 0x410   :  { %v860_v45 = vadd.f32 1.0, %v2148_v57 }
 0x411   :  { %v2150_v5 = vpop.eup %2149 }
 0x412   :  { %v815_v43 = vmul.f32 %v2150_v5, %v812_v56  ;;  %2151 = vrcp.f32 %v860_v45  ;;  %vm820_vm6 = vweird.f32 %v2150_v5  ;;  %v873_v41 = vand.u32 2147483648, %v860_v45 }
 0x413   :  { %2153 = vtanh.f32 %v795_v44  ;;  %vm821_vm8 = vmor %vm819_vm7, %vm820_vm6  ;;  %vm867_vm11 = vweird.f32 %v860_v45 }
 0x414   :  { %v816_v54 = vsub.f32 1.0, %v815_v43  ;;  %2155 = vtanh.f32 %v805_v51  ;;  %v874_v56 = vor.u32 1.1754944e-38, %v873_v41 }
 0x416   :  { %v817_v55 = vmul.f32 %v2150_v5, %v816_v54  ;;  %v871_v54 = vand.u32 2147483647, %v860_v45 }
 0x418   :  { %v2152_v50 = vpop.eup %2151  ;;  %v818_v47 = vadd.f32 %v2150_v5, %v817_v55  ;;  %vm872_vm13 = vcmp.eq.f32.partialorder %v871_v54, 8.507059e+37 }
 0x419   :  { %v863_v48 = vmul.f32 %v2152_v50, %v860_v45  ;;  %v2154_v46 = vpop.eup %2153  ;;  %vm868_vm10 = vweird.f32 %v2152_v50 }
 0x41a   :  { %v822_v57 = vsel %vm821_vm8, %v2150_v5, %v818_v47  ;;  %vm869_vm12 = vmor %vm867_vm11, %vm868_vm10  ;;  %v2156_v8 = vpop.eup %2155 }
 0x41b   :  { %v827_v59 = vsel %vm824_vm9, %v826_v42, %v822_v57  ;;  %v864_v20 = vsub.f32 1.0, %v863_v48  ;;  %v2056_v42 = vmul.f32 -1.442695, %v795_v44 }
 0x41c   :  { %v846_v43 = vmul.f32 %v2154_v46, %v827_v59 }
 0x41d   :  { %v865_v40 = vmul.f32 %v2152_v50, %v864_v20  ;;  %2157 = vpow2.f32 %v2056_v42 }
 0x41e   :  { %848 = vrot.lane.b32.xlu0 %v846_v43, %s2473_s1 }
 0x41f   :  { %v866_v39 = vadd.f32 %v2152_v50, %v865_v40  ;;  %v845_v40 = vmul.f32 %v827_v59, %v2970_v33  ;;  %v2058_v33 = vmul.f32 -1.442695, %v805_v51 }
 0x421   :  { %v870_v53 = vsel %vm869_vm12, %v2152_v50, %v866_v39 }
 0x422   :  { %v875_v5 = vsel %vm872_vm13, %v874_v56, %v870_v53 }
 0x423   :  { %v894_v52 = vmul.f32 %v2156_v8, %v875_v5  ;;  %v2158_v55 = vpop.eup %2157 }
 0x424   :  { %v813_v58 = vadd.f32 1.0, %v2158_v55 }
 0x425   :  { %896 = vrot.lane.b32.xlu1 %v894_v52, %s2473_s1 }
 0x426   :  { %2159 = vrcp.f32 %v813_v58  ;;  %v840_v50 = vand.u32 2147483648, %v813_v58  ;;  %vm834_vm15 = vweird.f32 %v813_v58  ;;  %v838_v44 = vand.u32 2147483647, %v813_v58 }
 0x428   :  { %v841_v43 = vor.u32 1.1754944e-38, %v840_v50  ;;  %vm839_vm3 = vcmp.eq.f32.partialorder %v838_v44, 8.507059e+37 }
 0x42c   :  { %v2160_v20 = vpop.eup %2159 }
 0x42d   :  { %v830_v47 = vmul.f32 %v2160_v20, %v813_v58  ;;  %vm835_vm14 = vweird.f32 %v2160_v20  ;;  %v893_v58 = vmul.f32 %v875_v5, %v2975_v49  ;;  %v3635_v5 = vld [vmem:[#allocation15_spill] sm:$0xff] }
 0x42e   :  { %vm836_vm2 = vmor %vm834_vm15, %vm835_vm14 }
 0x42f   :  { %v831_v48 = vsub.f32 1.0, %v830_v47 }
 0x431   :  { %v832_v57 = vmul.f32 %v2160_v20, %v831_v48 }
 0x433   :  { %v833_v39 = vadd.f32 %v2160_v20, %v832_v57 }
 0x435   :  { %v837_v46 = vsel %vm836_vm2, %v2160_v20, %v833_v39 }
 0x436   :  { %v842_v56 = vsel %vm839_vm3, %v841_v43, %v837_v46 }
 0x490   :  { %v849_v45 = vpop.permute.xlu0 %848 }
 0x491   :  { %v3181_v41 = vadd.f32 %v849_v45, %v845_v40 }
 0x493   :  { %2161 = vtanh.f32 %v3181_v41 }
 0x494   :  { %2163 = vpow2.f32 %v2058_v33  ;;  %v3639_v33 = vld [vmem:[#allocation19_spill] sm:$0xff] }
 0x497   :  { %v897_v47 = vpop.permute.xlu1 %896 }
 0x498   :  { %v3186_v48 = vadd.f32 %v897_v47, %v893_v58  ;;  %v3645_v47 = vld [vmem:[#allocation25_spill] sm:$0xff]  ;;  %v3646_v58 = vld [vmem:[#allocation26_spill] sm:$0xff] }
 0x499   :  { %v2162_v54 = vpop.eup %2161 }
 0x49a   :  { %v853_v53 = vmul.f32 %v2162_v54, %v842_v56  ;;  %v2164_v59 = vpop.eup %2163  ;;  %v3636_v54 = vld [vmem:[#allocation16_spill] sm:$0xff]  ;;  %v3637_v56 = vld [vmem:[#allocation17_spill] sm:$0xff] }
 0x49b   :  { %v861_v8 = vadd.f32 1.0, %v2164_v59  ;;  %v3640_v59 = vld [vmem:[#allocation20_spill] sm:$0xff] }
 0x49c   :  { %903 = vrot.lane.b32.xlu2 %v853_v53, %s2473_s1  ;;  %v3638_v53 = vld [vmem:[#allocation18_spill] sm:$0xff] }
 0x49d   :  { %2165 = vrcp.f32 %v861_v8  ;;  %v888_v40 = vand.u32 2147483648, %v861_v8  ;;  %vm882_vm5 = vweird.f32 %v861_v8  ;;  %v886_v51 = vand.u32 2147483647, %v861_v8 }
 0x49e   :  { %2167 = vtanh.f32 %v3186_v48 }
 0x49f   :  { %v889_v50 = vor.u32 1.1754944e-38, %v888_v40  ;;  %vm887_vm7 = vcmp.eq.f32.partialorder %v886_v51, 8.507059e+37  ;;  %v3649_v40 = vld [vmem:[#allocation29_spill] sm:$0xff]  ;;  %v3650_v51 = vld [vmem:[#allocation30_spill] sm:$0xff] }
 0x4a3   :  { %v2166_v52 = vpop.eup %2165 }
 0x4a4   :  { %v878_v42 = vmul.f32 %v2166_v52, %v861_v8  ;;  %vm883_vm4 = vweird.f32 %v2166_v52  ;;  %v2168_v39 = vpop.eup %2167  ;;  %v3641_v8 = vld [vmem:[#allocation21_spill] sm:$0xff] }
 0x4a5   :  { %vm884_vm6 = vmor %vm882_vm5, %vm883_vm4 }
 0x4a6   :  { %v879_v55 = vsub.f32 1.0, %v878_v42  ;;  %v3643_v42 = vld [vmem:[#allocation23_spill] sm:$0xff] }
 0x4a8   :  { %v880_v20 = vmul.f32 %v2166_v52, %v879_v55  ;;  %v3644_v55 = vld [vmem:[#allocation24_spill] sm:$0xff] }
 0x4aa   :  { %v881_v57 = vadd.f32 %v2166_v52, %v880_v20  ;;  %v3647_v20 = vld [vmem:[#allocation27_spill] sm:$0xff] }
 0x4ac   :  { %v885_v45 = vsel %vm884_vm6, %v2166_v52, %v881_v57  ;;  %v3642_v52 = vld [vmem:[#allocation22_spill] sm:$0xff]  ;;  %v3648_v57 = vld [vmem:[#allocation28_spill] sm:$0xff] }
 0x4ad   :  { %v890_v44 = vsel %vm887_vm7, %v889_v50, %v885_v45  ;;  %v3651_v45 = vld [vmem:[#allocation31_spill] sm:$0xff]  ;;  %v3653_v50 = vld [vmem:[#allocation33_spill] sm:$0xff] }
 0x4ae   :  { %v3189_v46 = vmul.f32 %v2168_v39, %v890_v44  ;;  %v3652_v39 = vld [vmem:[#allocation32_spill] sm:$0xff]  ;;  %v3654_v44 = vld [vmem:[#allocation34_spill] sm:$0xff] }
 0x4b0   :  { %3634 = vst [vmem:[#allocation41_spill] sm:$0xff] %v3189_v46 }
 0x4f6   :  { %v904_v43 = vpop.permute.xlu2 %903 }
 0x4f7   :  { %2059 = vst.msk [vmem:[%s3473_s3 + $0x4] sm:$0x3] %vm202_vm0, %v904_v43  ;;  %v914_v49 = vsel %vm279_vm1, %v904_v43, %v3189_v46  ;;  %v3655_v43 = vld [vmem:[#allocation35_spill] sm:$0xff]  ;;  %v3657_v46 = vld [vmem:[#allocation38_spill] sm:$0xff] }
 0x4f8   :  { %931 = vmatmul.f32.vlgmr.msrb.gmra.mxu0 %v914_v49  ;;  %951 = vmatmul.f32.vlgmr.msrb.gmra.mxu1 %v914_v49 }
 0x4f9   :  { %971 = vmatmul.f32.vlgmr.msrb.gmra.mxu2 %v914_v49  ;;  %991 = vmatmul.f32.vlgmr.msrb.gmra.mxu3 %v914_v49  ;;  %v3656_v49 = vld [vmem:[#allocation36_spill] sm:$0xff] }
 0x4fa   :  { %1333 = vmatpush.msrb.mxu0 %v2986_v16  ;;  %1353 = vmatpush.msrb.mxu1 %v2989_v10 }
 0x4fb   :  { %1373 = vmatpush.msrb.mxu2 %v2992_v63  ;;  %1393 = vmatpush.msrb.mxu3 %v2995_v62 }
 0x4fc   :  { %1334 = vmatpush.msrb.mxu0 %v2998_v60  ;;  %1354 = vmatpush.msrb.mxu1 %v3001_v4 }
 0x4fd   :  { %1374 = vmatpush.msrb.mxu2 %v3004_v14  ;;  %1394 = vmatpush.msrb.mxu3 %v3007_v61 }
 0x4fe   :  { %1335 = vmatpush.msrb.mxu0 %v3010_v12  ;;  %1355 = vmatpush.msrb.mxu1 %v3013_v3 }
 0x4ff   :  { %1375 = vmatpush.msrb.mxu2 %v3016_v13  ;;  %1395 = vmatpush.msrb.mxu3 %v3019_v9 }
 0x500   :  { %1336 = vmatpush.msrb.mxu0 %v3022_v11  ;;  %1356 = vmatpush.msrb.mxu1 %v3025_v0 }
 0x501   :  { %1376 = vmatpush.msrb.mxu2 %v3028_v1  ;;  %1396 = vmatpush.msrb.mxu3 %v3031_v6 }
 0x502   :  { %1337 = vmatpush.msrb.mxu0 %v3034_v15  ;;  %1357 = vmatpush.msrb.mxu1 %v3037_v7 }
 0x503   :  { %1377 = vmatpush.msrb.mxu2 %v3040_v2  ;;  %1397 = vmatpush.msrb.mxu3 %v3043_v17 }
 0x504   :  { %1338 = vmatpush.msrb.mxu0 %v3046_v18  ;;  %1358 = vmatpush.msrb.mxu1 %v3049_v19 }
 0x505   :  { %1378 = vmatpush.msrb.mxu2 %v3052_v21  ;;  %1398 = vmatpush.msrb.mxu3 %v3055_v22 }
 0x506   :  { %1339 = vmatpush.msrb.mxu0 %v3058_v23  ;;  %1359 = vmatpush.msrb.mxu1 %v3061_v24 }
 0x507   :  { %1379 = vmatpush.msrb.mxu2 %v3064_v25  ;;  %1399 = vmatpush.msrb.mxu3 %v3067_v26 }
 0x508   :  { %1340 = vmatpush.msrb.mxu0 %v3070_v27  ;;  %1360 = vmatpush.msrb.mxu1 %v3073_v28 }
 0x509   :  { %1380 = vmatpush.msrb.mxu2 %v3076_v29  ;;  %1400 = vmatpush.msrb.mxu3 %v3079_v30 }
 0x50a   :  { %1341 = vmatpush.msrb.mxu0 %v3082_v31  ;;  %1361 = vmatpush.msrb.mxu1 %v3085_v32 }
 0x50b   :  { %1381 = vmatpush.msrb.mxu2 %v3088_v34  ;;  %1401 = vmatpush.msrb.mxu3 %v3091_v35 }
 0x50c   :  { %1342 = vmatpush.msrb.mxu0 %v3094_v36  ;;  %1362 = vmatpush.msrb.mxu1 %v3097_v37 }
 0x50d   :  { %1382 = vmatpush.msrb.mxu2 %v3100_v38  ;;  %1402 = vmatpush.msrb.mxu3 %v3635_v5 }
 0x50e   :  { %1343 = vmatpush.msrb.mxu0 %v3636_v54  ;;  %1363 = vmatpush.msrb.mxu1 %v3637_v56 }
 0x50f   :  { %1383 = vmatpush.msrb.mxu2 %v3638_v53  ;;  %1403 = vmatpush.msrb.mxu3 %v3639_v33 }
 0x510   :  { %1344 = vmatpush.msrb.mxu0 %v3640_v59  ;;  %1364 = vmatpush.msrb.mxu1 %v3641_v8 }
 0x511   :  { %1384 = vmatpush.msrb.mxu2 %v3642_v52  ;;  %1404 = vmatpush.msrb.mxu3 %v3643_v42 }
 0x512   :  { %1345 = vmatpush.msrb.mxu0 %v3644_v55  ;;  %1365 = vmatpush.msrb.mxu1 %v3645_v47 }
 0x513   :  { %1385 = vmatpush.msrb.mxu2 %v3646_v58  ;;  %1405 = vmatpush.msrb.mxu3 %v3647_v20  ;;  %v3658_v20 = vld [vmem:[#allocation39_spill] sm:$0xff] }
 0x514   :  { %1346 = vmatpush.msrb.mxu0 %v3648_v57  ;;  %1366 = vmatpush.msrb.mxu1 %v3649_v40  ;;  %v3659_v57 = vld [vmem:[#allocation40_spill] sm:$0xff]  ;;  %v996_v40 = vld [vmem:[#allocation6 + $0xc] sm:$0xf]  ;;  %v1006_v58 = vld [vmem:[#allocation7 + $0x10] sm:$0xf] }
 0x515   :  { %1386 = vmatpush.msrb.mxu2 %v3650_v51  ;;  %1406 = vmatpush.msrb.mxu3 %v3651_v45  ;;  %998 = vst [vmem:[#allocation1] ss:$4 sm:$0xff] %v996_v40 }
 0x516   :  { %1347 = vmatpush.msrb.mxu0 %v3652_v39  ;;  %1367 = vmatpush.msrb.mxu1 %v3653_v50 }
 0x517   :  { %1387 = vmatpush.msrb.mxu2 %v3654_v44  ;;  %1407 = vmatpush.msrb.mxu3 %v3655_v43 }
 0x518   :  { %1348 = vmatpush.msrb.mxu0 %v3656_v49  ;;  %1368 = vmatpush.msrb.mxu1 %v3657_v46 }
 0x519   :  { %1388 = vmatpush.msrb.mxu2 %v3658_v20  ;;  %1408 = vmatpush.msrb.mxu3 %v3659_v57 }
 0x51c   :  { %v999_v51 = vld.sshfl [vmem:[#allocation1] sm:$0xff pattern:$0x73625140]  ;;  %v1000_v45 = vld.sshfl [vmem:[#allocation1 + $0x8] sm:$0xff pattern:$0x73625140] }
 0x51d   :  { %1008 = vst [vmem:[#allocation1] ss:$4 sm:$0xff] %v1006_v58 }
 0x524   :  { %v1009_v44 = vld.sshfl [vmem:[#allocation1] sm:$0xff pattern:$0x73625140] }
 0x575   :  { %v932_v39 = vpop.f32.mrf.mxu0  ;;  %v952_v20 = vpop.f32.mrf.mxu1 }
 0x576   :  { %v1003_v50 = vadd.f32 %v999_v51, %v932_v39  ;;  %v1004_v8 = vadd.f32 %v1000_v45, %v952_v20  ;;  %v1010_v39 = vld.sshfl [vmem:[#allocation1 + $0x8] sm:$0xff pattern:$0x73625140] }
 0x578   :  { %v2061_v47 = vmul.f32 -1.442695, %v1003_v50 }
 0x57a   :  { %2169 = vpow2.f32 %v2061_v47 }
 0x57c   :  { %v972_v43 = vpop.f32.mrf.mxu2  ;;  %v992_v51 = vpop.f32.mrf.mxu3 }
 0x57d   :  { %v1013_v55 = vadd.f32 %v1009_v44, %v972_v43  ;;  %v1014_v43 = vadd.f32 %v1010_v39, %v992_v51 }
 0x57f   :  { %v2063_v49 = vmul.f32 -1.442695, %v1013_v55 }
 0x580   :  { %v2170_v42 = vpop.eup %2169 }
 0x581   :  { %v1021_v46 = vadd.f32 1.0, %v2170_v42  ;;  %2171 = vpow2.f32 %v2063_v49 }
 0x583   :  { %2173 = vrcp.f32 %v1021_v46  ;;  %v1034_v47 = vand.u32 2147483648, %v1021_v46  ;;  %v1032_v44 = vand.u32 2147483647, %v1021_v46  ;;  %vm1028_vm9 = vweird.f32 %v1021_v46 }
 0x585   :  { %v1035_v33 = vor.u32 1.1754944e-38, %v1034_v47  ;;  %vm1033_vm11 = vcmp.eq.f32.partialorder %v1032_v44, 8.507059e+37 }
 0x587   :  { %v2172_v57 = vpop.eup %2171 }
 0x588   :  { %v1069_v52 = vadd.f32 1.0, %v2172_v57 }
 0x589   :  { %v2174_v40 = vpop.eup %2173 }
 0x58a   :  { %v1024_v59 = vmul.f32 %v2174_v40, %v1021_v46  ;;  %2175 = vrcp.f32 %v1069_v52  ;;  %vm1029_vm8 = vweird.f32 %v2174_v40  ;;  %v1082_v56 = vand.u32 2147483648, %v1069_v52 }
 0x58b   :  { %2177 = vtanh.f32 %v1004_v8  ;;  %vm1030_vm10 = vmor %vm1028_vm9, %vm1029_vm8  ;;  %vm1076_vm13 = vweird.f32 %v1069_v52 }
 0x58c   :  { %v1025_v58 = vsub.f32 1.0, %v1024_v59  ;;  %2179 = vtanh.f32 %v1014_v43  ;;  %v1083_v46 = vor.u32 1.1754944e-38, %v1082_v56 }
 0x58e   :  { %v1026_v50 = vmul.f32 %v2174_v40, %v1025_v58  ;;  %v1080_v58 = vand.u32 2147483647, %v1069_v52 }
 0x590   :  { %v2176_v55 = vpop.eup %2175  ;;  %v1027_v42 = vadd.f32 %v2174_v40, %v1026_v50  ;;  %vm1081_vm15 = vcmp.eq.f32.partialorder %v1080_v58, 8.507059e+37 }
 0x591   :  { %v1072_v49 = vmul.f32 %v2176_v55, %v1069_v52  ;;  %v2178_v20 = vpop.eup %2177  ;;  %vm1077_vm12 = vweird.f32 %v2176_v55 }
 0x592   :  { %v1031_v57 = vsel %vm1030_vm10, %v2174_v40, %v1027_v42  ;;  %vm1078_vm14 = vmor %vm1076_vm13, %vm1077_vm12  ;;  %v2180_v39 = vpop.eup %2179 }
 0x593   :  { %v1036_v45 = vsel %vm1033_vm11, %v1035_v33, %v1031_v57  ;;  %v1073_v53 = vsub.f32 1.0, %v1072_v49  ;;  %v2062_v33 = vmul.f32 -1.442695, %v1004_v8 }
 0x594   :  { %v1055_v59 = vmul.f32 %v2178_v20, %v1036_v45 }
 0x595   :  { %v1074_v54 = vmul.f32 %v2176_v55, %v1073_v53  ;;  %2181 = vpow2.f32 %v2062_v33 }
 0x596   :  { %1057 = vrot.lane.b32.xlu0 %v1055_v59, %s2473_s1 }
 0x597   :  { %v1075_v5 = vadd.f32 %v2176_v55, %v1074_v54  ;;  %v1054_v54 = vmul.f32 %v1036_v45, %v3181_v41  ;;  %v2064_v41 = vmul.f32 -1.442695, %v1014_v43 }
 0x599   :  { %v1079_v51 = vsel %vm1078_vm14, %v2176_v55, %v1075_v5 }
 0x59a   :  { %v1084_v40 = vsel %vm1081_vm15, %v1083_v46, %v1079_v51 }
 0x59b   :  { %v1103_v47 = vmul.f32 %v2180_v39, %v1084_v40  ;;  %v2182_v50 = vpop.eup %2181 }
 0x59c   :  { %v1022_v44 = vadd.f32 1.0, %v2182_v50 }
 0x59d   :  { %1105 = vrot.lane.b32.xlu1 %v1103_v47, %s2473_s1 }
 0x59e   :  { %2183 = vrcp.f32 %v1022_v44  ;;  %v1049_v55 = vand.u32 2147483648, %v1022_v44  ;;  %vm1043_vm3 = vweird.f32 %v1022_v44  ;;  %v1047_v8 = vand.u32 2147483647, %v1022_v44 }
 0x5a0   :  { %v1050_v59 = vor.u32 1.1754944e-38, %v1049_v55  ;;  %vm1048_vm5 = vcmp.eq.f32.partialorder %v1047_v8, 8.507059e+37 }
 0x5a4   :  { %v2184_v53 = vpop.eup %2183 }
 0x5a5   :  { %v1039_v42 = vmul.f32 %v2184_v53, %v1022_v44  ;;  %vm1044_vm2 = vweird.f32 %v2184_v53  ;;  %v1102_v44 = vmul.f32 %v1084_v40, %v3186_v48 }
 0x5a6   :  { %vm1045_vm4 = vmor %vm1043_vm3, %vm1044_vm2 }
 0x5a7   :  { %v1040_v49 = vsub.f32 1.0, %v1039_v42 }
 0x5a9   :  { %v1041_v57 = vmul.f32 %v2184_v53, %v1040_v49 }
 0x5ab   :  { %v1042_v5 = vadd.f32 %v2184_v53, %v1041_v57 }
 0x5ad   :  { %v1046_v20 = vsel %vm1045_vm4, %v2184_v53, %v1042_v5 }
 0x5ae   :  { %v1051_v46 = vsel %vm1048_vm5, %v1050_v59, %v1046_v20 }
 0x608   :  { %v1058_v52 = vpop.permute.xlu0 %1057 }
 0x609   :  { %v3264_v56 = vadd.f32 %v1058_v52, %v1054_v54 }
 0x60b   :  { %2185 = vtanh.f32 %v3264_v56 }
 0x60c   :  { %2187 = vpow2.f32 %v2064_v41 }
 0x60f   :  { %v1106_v42 = vpop.permute.xlu1 %1105 }
 0x610   :  { %v3269_v49 = vadd.f32 %v1106_v42, %v1102_v44 }
 0x611   :  { %v2186_v58 = vpop.eup %2185 }
 0x612   :  { %v1062_v51 = vmul.f32 %v2186_v58, %v1051_v46  ;;  %v2188_v45 = vpop.eup %2187 }
 0x613   :  { %v1070_v39 = vadd.f32 1.0, %v2188_v45 }
 0x614   :  { %1112 = vrot.lane.b32.xlu2 %v1062_v51, %s2473_s1 }
 0x615   :  { %2189 = vrcp.f32 %v1070_v39  ;;  %v1097_v54 = vand.u32 2147483648, %v1070_v39  ;;  %vm1091_vm7 = vweird.f32 %v1070_v39  ;;  %v1095_v43 = vand.u32 2147483647, %v1070_v39 }
 0x616   :  { %2191 = vtanh.f32 %v3269_v49 }
 0x617   :  { %v1098_v55 = vor.u32 1.1754944e-38, %v1097_v54  ;;  %vm1096_vm9 = vcmp.eq.f32.partialorder %v1095_v43, 8.507059e+37 }
 0x61b   :  { %v2190_v47 = vpop.eup %2189 }
 0x61c   :  { %v1087_v33 = vmul.f32 %v2190_v47, %v1070_v39  ;;  %vm1092_vm6 = vweird.f32 %v2190_v47  ;;  %v2192_v5 = vpop.eup %2191 }
 0x61d   :  { %vm1093_vm8 = vmor %vm1091_vm7, %vm1092_vm6 }
 0x61e   :  { %v1088_v50 = vsub.f32 1.0, %v1087_v33 }
 0x620   :  { %v1089_v53 = vmul.f32 %v2190_v47, %v1088_v50 }
 0x622   :  { %v1090_v57 = vadd.f32 %v2190_v47, %v1089_v53 }
 0x624   :  { %v1094_v52 = vsel %vm1093_vm8, %v2190_v47, %v1090_v57 }
 0x625   :  { %v1099_v8 = vsel %vm1096_vm9, %v1098_v55, %v1094_v52 }
 0x626   :  { %v3272_v20 = vmul.f32 %v2192_v5, %v1099_v8 }
 0x66e   :  { %v1113_v59 = vpop.permute.xlu2 %1112 }
 0x66f   :  { %2065 = vst.msk [vmem:[%s3473_s3 + $0x6] sm:$0x3] %vm202_vm0, %v1113_v59  ;;  %v1123_v48 = vsel %vm279_vm1, %v1113_v59, %v3272_v20 }
 0x670   :  { %1140 = vmatmul.f32.vlgmr.msra.gmra.mxu0 %v1123_v48  ;;  %1160 = vmatmul.f32.vlgmr.msra.gmra.mxu1 %v1123_v48 }
 0x671   :  { %1180 = vmatmul.f32.vlgmr.msra.gmra.mxu2 %v1123_v48  ;;  %1200 = vmatmul.f32.vlgmr.msra.gmra.mxu3 %v1123_v48 }
 0x672   :  { %1542 = vmatpush.msra.mxu0 %v2986_v16  ;;  %1562 = vmatpush.msra.mxu1 %v2989_v10  ;;  %v3660_v16 = vld [vmem:[#allocation15_spill] sm:$0xff]  ;;  %v3661_v10 = vld [vmem:[#allocation16_spill] sm:$0xff] }
 0x673   :  { %1582 = vmatpush.msra.mxu2 %v2992_v63  ;;  %1602 = vmatpush.msra.mxu3 %v2995_v62  ;;  %v3662_v63 = vld [vmem:[#allocation17_spill] sm:$0xff]  ;;  %v3663_v62 = vld [vmem:[#allocation18_spill] sm:$0xff] }
 0x674   :  { %1543 = vmatpush.msra.mxu0 %v2998_v60  ;;  %1563 = vmatpush.msra.mxu1 %v3001_v4  ;;  %v3664_v60 = vld [vmem:[#allocation19_spill] sm:$0xff]  ;;  %v3665_v4 = vld [vmem:[#allocation20_spill] sm:$0xff] }
 0x675   :  { %1583 = vmatpush.msra.mxu2 %v3004_v14  ;;  %1603 = vmatpush.msra.mxu3 %v3007_v61  ;;  %v3666_v14 = vld [vmem:[#allocation21_spill] sm:$0xff]  ;;  %v3667_v61 = vld [vmem:[#allocation22_spill] sm:$0xff] }
 0x676   :  { %1544 = vmatpush.msra.mxu0 %v3010_v12  ;;  %1564 = vmatpush.msra.mxu1 %v3013_v3  ;;  %v3668_v12 = vld [vmem:[#allocation23_spill] sm:$0xff]  ;;  %v3669_v3 = vld [vmem:[#allocation24_spill] sm:$0xff] }
 0x677   :  { %1584 = vmatpush.msra.mxu2 %v3016_v13  ;;  %1604 = vmatpush.msra.mxu3 %v3019_v9  ;;  %v3670_v13 = vld [vmem:[#allocation25_spill] sm:$0xff]  ;;  %v3671_v9 = vld [vmem:[#allocation26_spill] sm:$0xff] }
 0x678   :  { %1545 = vmatpush.msra.mxu0 %v3022_v11  ;;  %1565 = vmatpush.msra.mxu1 %v3025_v0  ;;  %v3672_v11 = vld [vmem:[#allocation27_spill] sm:$0xff]  ;;  %v3673_v0 = vld [vmem:[#allocation28_spill] sm:$0xff] }
 0x679   :  { %1585 = vmatpush.msra.mxu2 %v3028_v1  ;;  %1605 = vmatpush.msra.mxu3 %v3031_v6  ;;  %v3674_v1 = vld [vmem:[#allocation29_spill] sm:$0xff]  ;;  %v3675_v6 = vld [vmem:[#allocation30_spill] sm:$0xff] }
 0x67a   :  { %1546 = vmatpush.msra.mxu0 %v3034_v15  ;;  %1566 = vmatpush.msra.mxu1 %v3037_v7  ;;  %v3676_v15 = vld [vmem:[#allocation31_spill] sm:$0xff]  ;;  %v3677_v7 = vld [vmem:[#allocation32_spill] sm:$0xff] }
 0x67b   :  { %1586 = vmatpush.msra.mxu2 %v3040_v2  ;;  %1606 = vmatpush.msra.mxu3 %v3043_v17  ;;  %v3678_v2 = vld [vmem:[#allocation33_spill] sm:$0xff]  ;;  %v3679_v17 = vld [vmem:[#allocation34_spill] sm:$0xff] }
 0x67c   :  { %1547 = vmatpush.msra.mxu0 %v3046_v18  ;;  %1567 = vmatpush.msra.mxu1 %v3049_v19  ;;  %v3680_v18 = vld [vmem:[#allocation35_spill] sm:$0xff]  ;;  %v3681_v19 = vld [vmem:[#allocation36_spill] sm:$0xff] }
 0x67d   :  { %1587 = vmatpush.msra.mxu2 %v3052_v21  ;;  %1607 = vmatpush.msra.mxu3 %v3055_v22  ;;  %v3682_v21 = vld [vmem:[#allocation38_spill] sm:$0xff]  ;;  %v3683_v22 = vld [vmem:[#allocation39_spill] sm:$0xff] }
 0x67e   :  { %1548 = vmatpush.msra.mxu0 %v3058_v23  ;;  %1568 = vmatpush.msra.mxu1 %v3061_v24  ;;  %v3684_v23 = vld [vmem:[#allocation40_spill] sm:$0xff]  ;;  %v1205_v24 = vld [vmem:[#allocation6 + $0x10] sm:$0xf] }
 0x67f   :  { %1588 = vmatpush.msra.mxu2 %v3064_v25  ;;  %1608 = vmatpush.msra.mxu3 %v3067_v26  ;;  %1207 = vst [vmem:[#allocation1] ss:$4 sm:$0xff] %v1205_v24 }
 0x680   :  { %1549 = vmatpush.msra.mxu0 %v3070_v27  ;;  %1569 = vmatpush.msra.mxu1 %v3073_v28  ;;  %v1215_v27 = vld [vmem:[#allocation7 + $0xc] sm:$0xf] }
 0x681   :  { %1589 = vmatpush.msra.mxu2 %v3076_v29  ;;  %1609 = vmatpush.msra.mxu3 %v3079_v30 }
 0x682   :  { %1550 = vmatpush.msra.mxu0 %v3082_v31  ;;  %1570 = vmatpush.msra.mxu1 %v3085_v32 }
 0x683   :  { %1590 = vmatpush.msra.mxu2 %v3088_v34  ;;  %1610 = vmatpush.msra.mxu3 %v3091_v35 }
 0x684   :  { %1551 = vmatpush.msra.mxu0 %v3094_v36  ;;  %1571 = vmatpush.msra.mxu1 %v3097_v37 }
 0x685   :  { %1591 = vmatpush.msra.mxu2 %v3100_v38  ;;  %1611 = vmatpush.msra.mxu3 %v3660_v16 }
 0x686   :  { %1552 = vmatpush.msra.mxu0 %v3661_v10  ;;  %1572 = vmatpush.msra.mxu1 %v3662_v63  ;;  %v1208_v25 = vld.sshfl [vmem:[#allocation1] sm:$0xff pattern:$0x73625140]  ;;  %v1209_v26 = vld.sshfl [vmem:[#allocation1 + $0x8] sm:$0xff pattern:$0x73625140] }
 0x687   :  { %1592 = vmatpush.msra.mxu2 %v3663_v62  ;;  %1612 = vmatpush.msra.mxu3 %v3664_v60  ;;  %1217 = vst [vmem:[#allocation1] ss:$4 sm:$0xff] %v1215_v27 }
 0x688   :  { %1553 = vmatpush.msra.mxu0 %v3665_v4  ;;  %1573 = vmatpush.msra.mxu1 %v3666_v14 }
 0x689   :  { %1593 = vmatpush.msra.mxu2 %v3667_v61  ;;  %1613 = vmatpush.msra.mxu3 %v3668_v12 }
 0x68a   :  { %1554 = vmatpush.msra.mxu0 %v3669_v3  ;;  %1574 = vmatpush.msra.mxu1 %v3670_v13 }
 0x68b   :  { %1594 = vmatpush.msra.mxu2 %v3671_v9  ;;  %1614 = vmatpush.msra.mxu3 %v3672_v11 }
 0x68c   :  { %1555 = vmatpush.msra.mxu0 %v3673_v0  ;;  %1575 = vmatpush.msra.mxu1 %v3674_v1 }
 0x68d   :  { %1595 = vmatpush.msra.mxu2 %v3675_v6  ;;  %1615 = vmatpush.msra.mxu3 %v3676_v15 }
 0x68e   :  { %1556 = vmatpush.msra.mxu0 %v3677_v7  ;;  %1576 = vmatpush.msra.mxu1 %v3678_v2  ;;  %v1218_v31 = vld.sshfl [vmem:[#allocation1] sm:$0xff pattern:$0x73625140]  ;;  %v1219_v47 = vld.sshfl [vmem:[#allocation1 + $0x8] sm:$0xff pattern:$0x73625140] }
 0x68f   :  { %1596 = vmatpush.msra.mxu2 %v3679_v17  ;;  %1616 = vmatpush.msra.mxu3 %v3680_v18 }
 0x690   :  { %1557 = vmatpush.msra.mxu0 %v3681_v19  ;;  %1577 = vmatpush.msra.mxu1 %v3682_v21 }
 0x691   :  { %1597 = vmatpush.msra.mxu2 %v3683_v22  ;;  %1617 = vmatpush.msra.mxu3 %v3684_v23 }
 0x6ed   :  { %v1141_v28 = vpop.f32.mrf.mxu0  ;;  %v1161_v38 = vpop.f32.mrf.mxu1 }
 0x6ee   :  { %v1212_v29 = vadd.f32 %v1208_v25, %v1141_v28  ;;  %v1213_v51 = vadd.f32 %v1209_v26, %v1161_v38 }
 0x6f0   :  { %v2067_v30 = vmul.f32 -1.442695, %v1212_v29  ;;  %v2068_v12 = vmul.f32 -1.442695, %v1213_v51 }
 0x6f2   :  { %2193 = vpow2.f32 %v2067_v30 }
 0x6f4   :  { %v1181_v32 = vpop.f32.mrf.mxu2  ;;  %v1201_v39 = vpop.f32.mrf.mxu3 }
 0x6f5   :  { %v1222_v34 = vadd.f32 %v1218_v31, %v1181_v32  ;;  %v1223_v53 = vadd.f32 %v1219_v47, %v1201_v39  ;;  %v2354_v39 = vld [vmem:[#allocation8 + $0x1e8] sm:$0xff]  ;;  %v2355_v47 = vld [vmem:[#allocation8 + $0x1f0] sm:$0xff] }
 0x6f7   :  { %v2069_v35 = vmul.f32 -1.442695, %v1222_v34 }
 0x6f8   :  { %v2194_v36 = vpop.eup %2193 }
 0x6f9   :  { %v1230_v37 = vadd.f32 1.0, %v2194_v36  ;;  %2195 = vpow2.f32 %v2069_v35 }
 0x6fb   :  { %2197 = vrcp.f32 %v1230_v37  ;;  %v1243_v33 = vand.u32 2147483648, %v1230_v37  ;;  %v1241_v42 = vand.u32 2147483647, %v1230_v37  ;;  %vm1237_vm11 = vweird.f32 %v1230_v37 }
 0x6fd   :  { %v1244_v43 = vor.u32 1.1754944e-38, %v1243_v33  ;;  %vm1242_vm13 = vcmp.eq.f32.partialorder %v1241_v42, 8.507059e+37  ;;  %v2356_v33 = vld [vmem:[#allocation8 + $0x1f8] sm:$0xff]  ;;  %v2358_v42 = vld [vmem:[#allocation8 + $0x1c8] sm:$0xff] }
 0x6ff   :  { %v2196_v40 = vpop.eup %2195 }
 0x700   :  { %v1278_v58 = vadd.f32 1.0, %v2196_v40 }
 0x701   :  { %v2198_v46 = vpop.eup %2197 }
 0x702   :  { %v1233_v41 = vmul.f32 %v2198_v46, %v1230_v37  ;;  %2199 = vrcp.f32 %v1278_v58  ;;  %vm1238_vm10 = vweird.f32 %v2198_v46  ;;  %v1291_v48 = vand.u32 2147483648, %v1278_v58 }
 0x703   :  { %2201 = vtanh.f32 %v1213_v51  ;;  %vm1239_vm12 = vmor %vm1237_vm11, %vm1238_vm10  ;;  %v1289_v10 = vand.u32 2147483647, %v1278_v58  ;;  %vm1285_vm15 = vweird.f32 %v1278_v58 }
 0x704   :  { %v1234_v45 = vsub.f32 1.0, %v1233_v41  ;;  %2203 = vtanh.f32 %v1223_v53  ;;  %v1292_v62 = vor.u32 1.1754944e-38, %v1291_v48  ;;  %v2369_v48 = vld [vmem:[#allocation8 + $0x160] sm:$0xff] }
 0x705   :  { %vm1290_vm3 = vcmp.eq.f32.partialorder %v1289_v10, 8.507059e+37  ;;  %2205 = vpow2.f32 %v2068_v12  ;;  %v2371_v10 = vld [vmem:[#allocation8 + $0x170] sm:$0xff]  ;;  %v2378_v12 = vld [vmem:[#allocation8 + $0x128] sm:$0xff] }
 0x706   :  { %v1235_v50 = vmul.f32 %v2198_v46, %v1234_v45  ;;  %v2353_v45 = vld [vmem:[#allocation8 + $0x1e0] sm:$0xff] }
 0x708   :  { %v2200_v44 = vpop.eup %2199  ;;  %v1236_v57 = vadd.f32 %v2198_v46, %v1235_v50  ;;  %v2357_v50 = vld [vmem:[#allocation8 + $0x1c0] sm:$0xff] }
 0x709   :  { %v1281_v54 = vmul.f32 %v2200_v44, %v1278_v58  ;;  %v2202_v5 = vpop.eup %2201  ;;  %vm1286_vm14 = vweird.f32 %v2200_v44 }
 0x70a   :  { %v1240_v52 = vsel %vm1239_vm12, %v2198_v46, %v1236_v57  ;;  %vm1287_vm2 = vmor %vm1285_vm15, %vm1286_vm14  ;;  %v2204_v4 = vpop.eup %2203  ;;  %v2361_v57 = vld [vmem:[#allocation8 + $0x1a0] sm:$0xff] }
 0x70b   :  { %v1245_v55 = vsel %vm1242_vm13, %v1244_v43, %v1240_v52  ;;  %v1282_v8 = vsub.f32 1.0, %v1281_v54  ;;  %v2206_v3 = vpop.eup %2205  ;;  %v2362_v54 = vld [vmem:[#allocation8 + $0x1a8] sm:$0xff]  ;;  %v2363_v43 = vld [vmem:[#allocation8 + $0x1b0] sm:$0xff]  ;;  %v2364_v52 = vld [vmem:[#allocation8 + $0x1b8] sm:$0xff] }
 0x70c   :  { %v1264_v59 = vmul.f32 %v2202_v5, %v1245_v55  ;;  %v1231_v13 = vadd.f32 1.0, %v2206_v3  ;;  %v1263_v6 = vmul.f32 %v1245_v55, %v3264_v56  ;;  %v2070_v56 = vmul.f32 -1.442695, %v1223_v53  ;;  %v2360_v53 = vld [vmem:[#allocation8 + $0x1d8] sm:$0xff]  ;;  %v2365_v5 = vld [vmem:[#allocation8 + $0x180] sm:$0xff]  ;;  %v2366_v55 = vld [vmem:[#allocation8 + $0x188] sm:$0xff] }
 0x70d   :  { %v1283_v16 = vmul.f32 %v2200_v44, %v1282_v8  ;;  %v2367_v8 = vld [vmem:[#allocation8 + $0x190] sm:$0xff] }
 0x70e   :  { %1266 = vrot.lane.b32.xlu0 %v1264_v59, %s2473_s1  ;;  %2207 = vrcp.f32 %v1231_v13  ;;  %v1258_v17 = vand.u32 2147483648, %v1231_v13  ;;  %vm1252_vm5 = vweird.f32 %v1231_v13  ;;  %v1256_v18 = vand.u32 2147483647, %v1231_v13  ;;  %v2368_v59 = vld [vmem:[#allocation8 + $0x198] sm:$0xff]  ;;  %v2379_v3 = vld [vmem:[#allocation8 + $0x130] sm:$0xff] }
 0x70f   :  { %v1284_v63 = vadd.f32 %v2200_v44, %v1283_v16  ;;  %v2370_v16 = vld [vmem:[#allocation8 + $0x168] sm:$0xff] }
 0x710   :  { %v1259_v21 = vor.u32 1.1754944e-38, %v1258_v17  ;;  %vm1257_vm7 = vcmp.eq.f32.partialorder %v1256_v18, 8.507059e+37  ;;  %v2388_v17 = vld [vmem:[#allocation8 + $0xf8] sm:$0xff]  ;;  %v2389_v18 = vld [vmem:[#allocation8 + $0xc0] sm:$0xff] }
 0x711   :  { %v1288_v60 = vsel %vm1287_vm2, %v2200_v44, %v1284_v63  ;;  %v2359_v44 = vld [vmem:[#allocation8 + $0x1d0] sm:$0xff]  ;;  %v2372_v63 = vld [vmem:[#allocation8 + $0x178] sm:$0xff] }
 0x712   :  { %v1293_v14 = vsel %vm1290_vm3, %v1292_v62, %v1288_v60  ;;  %v2373_v62 = vld [vmem:[#allocation8 + $0x140] sm:$0xff]  ;;  %v2374_v60 = vld [vmem:[#allocation8 + $0x148] sm:$0xff] }
 0x713   :  { %v1312_v61 = vmul.f32 %v2204_v4, %v1293_v14  ;;  %v1311_v31 = vmul.f32 %v1293_v14, %v3269_v49  ;;  %v2375_v4 = vld [vmem:[#allocation8 + $0x150] sm:$0xff]  ;;  %v2376_v14 = vld [vmem:[#allocation8 + $0x158] sm:$0xff] }
 0x714   :  { %v2208_v9 = vpop.eup %2207 }
 0x715   :  { %1314 = vrot.lane.b32.xlu1 %v1312_v61, %s2473_s1  ;;  %v1248_v11 = vmul.f32 %v2208_v9, %v1231_v13  ;;  %vm1253_vm4 = vweird.f32 %v2208_v9  ;;  %v2377_v61 = vld [vmem:[#allocation8 + $0x120] sm:$0xff]  ;;  %v2380_v13 = vld [vmem:[#allocation8 + $0x138] sm:$0xff] }
 0x716   :  { %vm1254_vm6 = vmor %vm1252_vm5, %vm1253_vm4 }
 0x717   :  { %v1249_v0 = vsub.f32 1.0, %v1248_v11  ;;  %v2382_v11 = vld [vmem:[#allocation8 + $0x108] sm:$0xff] }
 0x719   :  { %v1250_v1 = vmul.f32 %v2208_v9, %v1249_v0  ;;  %v2383_v0 = vld [vmem:[#allocation8 + $0x110] sm:$0xff] }
 0x71b   :  { %v1251_v2 = vadd.f32 %v2208_v9, %v1250_v1  ;;  %v2384_v1 = vld [vmem:[#allocation8 + $0x118] sm:$0xff] }
 0x71d   :  { %v1255_v19 = vsel %vm1254_vm6, %v2208_v9, %v1251_v2  ;;  %v2381_v9 = vld [vmem:[#allocation8 + $0x100] sm:$0xff]  ;;  %v2387_v2 = vld [vmem:[#allocation8 + $0xf0] sm:$0xff] }
 0x71e   :  { %v1260_v23 = vsel %vm1257_vm7, %v1259_v21, %v1255_v19  ;;  %v2390_v19 = vld [vmem:[#allocation8 + $0xc8] sm:$0xff]  ;;  %v2391_v21 = vld [vmem:[#allocation8 + $0xd0] sm:$0xff] }
 0x780   :  { %v1267_v15 = vpop.permute.xlu0 %1266 }
 0x781   :  { %v3347_v7 = vadd.f32 %v1267_v15, %v1263_v6  ;;  %v2385_v6 = vld [vmem:[#allocation8 + $0xe0] sm:$0xff]  ;;  %v2386_v15 = vld [vmem:[#allocation8 + $0xe8] sm:$0xff] }
 0x783   :  { %2209 = vtanh.f32 %v3347_v7 }
 0x784   :  { %2211 = vpow2.f32 %v2070_v56  ;;  %v2395_v56 = vld [vmem:[#allocation8 + $0xb0] sm:$0xff] }
 0x787   :  { %v1315_v30 = vpop.permute.xlu1 %1314 }
 0x788   :  { %v3352_v32 = vadd.f32 %v1315_v30, %v1311_v31  ;;  %v2401_v30 = vld [vmem:[#allocation8 + $0x60] sm:$0xff]  ;;  %v2402_v31 = vld [vmem:[#allocation8 + $0x68] sm:$0xff] }
 0x789   :  { %v2210_v22 = vpop.eup %2209 }
 0x78a   :  { %v1271_v24 = vmul.f32 %v2210_v22, %v1260_v23  ;;  %v2212_v25 = vpop.eup %2211  ;;  %v2392_v22 = vld [vmem:[#allocation8 + $0xd8] sm:$0xff]  ;;  %v2393_v23 = vld [vmem:[#allocation8 + $0xa0] sm:$0xff] }
 0x78b   :  { %v1279_v26 = vadd.f32 1.0, %v2212_v25  ;;  %v2396_v25 = vld [vmem:[#allocation8 + $0xb8] sm:$0xff] }
 0x78c   :  { %1321 = vrot.lane.b32.xlu2 %v1271_v24, %s2473_s1  ;;  %v2394_v24 = vld [vmem:[#allocation8 + $0xa8] sm:$0xff] }
 0x78d   :  { %2213 = vrcp.f32 %v1279_v26  ;;  %v1306_v36 = vand.u32 2147483648, %v1279_v26  ;;  %vm1300_vm9 = vweird.f32 %v1279_v26  ;;  %v1304_v37 = vand.u32 2147483647, %v1279_v26 }
 0x78e   :  { %2215 = vtanh.f32 %v3352_v32 }
 0x78f   :  { %v1307_v58 = vor.u32 1.1754944e-38, %v1306_v36  ;;  %vm1305_vm11 = vcmp.eq.f32.partialorder %v1304_v37, 8.507059e+37  ;;  %v2405_v36 = vld [vmem:[#allocation8 + $0x40] sm:$0xff]  ;;  %v2406_v37 = vld [vmem:[#allocation8 + $0x48] sm:$0xff] }
 0x793   :  { %v2214_v27 = vpop.eup %2213 }
 0x794   :  { %v1296_v28 = vmul.f32 %v2214_v27, %v1279_v26  ;;  %vm1301_vm8 = vweird.f32 %v2214_v27  ;;  %v2216_v40 = vpop.eup %2215  ;;  %v2397_v26 = vld [vmem:[#allocation8 + $0x80] sm:$0xff] }
 0x795   :  { %vm1302_vm10 = vmor %vm1300_vm9, %vm1301_vm8 }
 0x796   :  { %v1297_v29 = vsub.f32 1.0, %v1296_v28  ;;  %v2399_v28 = vld [vmem:[#allocation8 + $0x90] sm:$0xff] }
 0x798   :  { %v1298_v34 = vmul.f32 %v2214_v27, %v1297_v29  ;;  %v2400_v29 = vld [vmem:[#allocation8 + $0x98] sm:$0xff] }
 0x79a   :  { %v1299_v35 = vadd.f32 %v2214_v27, %v1298_v34  ;;  %v2403_v34 = vld [vmem:[#allocation8 + $0x70] sm:$0xff] }
 0x79c   :  { %v1303_v38 = vsel %vm1302_vm10, %v2214_v27, %v1299_v35  ;;  %v2398_v27 = vld [vmem:[#allocation8 + $0x88] sm:$0xff]  ;;  %v2404_v35 = vld [vmem:[#allocation8 + $0x78] sm:$0xff] }
 0x79d   :  { %v1308_v46 = vsel %vm1305_vm11, %v1307_v58, %v1303_v38  ;;  %v2407_v38 = vld [vmem:[#allocation8 + $0x50] sm:$0xff]  ;;  %v2409_v58 = vld [vmem:[#allocation8 + $0x20] sm:$0xff] }
 0x79e   :  { %v3355_v51 = vmul.f32 %v2216_v40, %v1308_v46  ;;  %v2408_v40 = vld [vmem:[#allocation8 + $0x58] sm:$0xff]  ;;  %v2410_v46 = vld [vmem:[#allocation8 + $0x28] sm:$0xff] }
 0x7e6   :  { %v1322_v41 = vpop.permute.xlu2 %1321 }
 0x7e7   :  { %2071 = vst.msk [vmem:[%s3473_s3 + $0x8] sm:$0x3] %vm202_vm0, %v1322_v41  ;;  %v1332_v49 = vsel %vm279_vm1, %v1322_v41, %v3355_v51  ;;  %v2411_v41 = vld [vmem:[#allocation8 + $0x30] sm:$0xff] }
 0x7e8   :  { %1349 = vmatmul.f32.vlgmr.msrb.gmra.mxu0 %v1332_v49  ;;  %1369 = vmatmul.f32.vlgmr.msrb.gmra.mxu1 %v1332_v49 }
 0x7e9   :  { %1389 = vmatmul.f32.vlgmr.msrb.gmra.mxu2 %v1332_v49  ;;  %1409 = vmatmul.f32.vlgmr.msrb.gmra.mxu3 %v1332_v49  ;;  %v2412_v49 = vld [vmem:[#allocation8 + $0x38] sm:$0xff] }
 0x7ea   :  { %1751 = vmatpush.msrb.mxu0 %v2353_v45  ;;  %1771 = vmatpush.msrb.mxu1 %v2354_v39  ;;  %v2413_v45 = vld [vmem:[#allocation8] sm:$0xff]  ;;  %v2414_v39 = vld [vmem:[#allocation8 + $0x8] sm:$0xff] }
 0x7eb   :  { %1791 = vmatpush.msrb.mxu2 %v2355_v47  ;;  %1811 = vmatpush.msrb.mxu3 %v2356_v33  ;;  %v2415_v47 = vld [vmem:[#allocation8 + $0x10] sm:$0xff]  ;;  %v2416_v33 = vld [vmem:[#allocation8 + $0x18] sm:$0xff] }
 0x7ec   :  { %1752 = vmatpush.msrb.mxu0 %v2357_v50  ;;  %1772 = vmatpush.msrb.mxu1 %v2358_v42  ;;  %v1414_v50 = vld [vmem:[#allocation6 + $0x14] sm:$0xf] }
 0x7ed   :  { %1792 = vmatpush.msrb.mxu2 %v2359_v44  ;;  %1812 = vmatpush.msrb.mxu3 %v2360_v53  ;;  %1416 = vst [vmem:[#allocation1] ss:$4 sm:$0xff] %v1414_v50  ;;  %v1424_v53 = vld [vmem:[#allocation7 + $0x8] sm:$0xf] }
 0x7ee   :  { %1753 = vmatpush.msrb.mxu0 %v2361_v57  ;;  %1773 = vmatpush.msrb.mxu1 %v2362_v54 }
 0x7ef   :  { %1793 = vmatpush.msrb.mxu2 %v2363_v43  ;;  %1813 = vmatpush.msrb.mxu3 %v2364_v52 }
 0x7f0   :  { %1754 = vmatpush.msrb.mxu0 %v2365_v5  ;;  %1774 = vmatpush.msrb.mxu1 %v2366_v55 }
 0x7f1   :  { %1794 = vmatpush.msrb.mxu2 %v2367_v8  ;;  %1814 = vmatpush.msrb.mxu3 %v2368_v59 }
 0x7f2   :  { %1755 = vmatpush.msrb.mxu0 %v2369_v48  ;;  %1775 = vmatpush.msrb.mxu1 %v2370_v16 }
 0x7f3   :  { %1795 = vmatpush.msrb.mxu2 %v2371_v10  ;;  %1815 = vmatpush.msrb.mxu3 %v2372_v63 }
 0x7f4   :  { %1756 = vmatpush.msrb.mxu0 %v2373_v62  ;;  %1776 = vmatpush.msrb.mxu1 %v2374_v60  ;;  %v1417_v42 = vld.sshfl [vmem:[#allocation1] sm:$0xff pattern:$0x73625140]  ;;  %v1418_v44 = vld.sshfl [vmem:[#allocation1 + $0x8] sm:$0xff pattern:$0x73625140] }
 0x7f5   :  { %1796 = vmatpush.msrb.mxu2 %v2375_v4  ;;  %1816 = vmatpush.msrb.mxu3 %v2376_v14  ;;  %1426 = vst [vmem:[#allocation1] ss:$4 sm:$0xff] %v1424_v53 }
 0x7f6   :  { %1757 = vmatpush.msrb.mxu0 %v2377_v61  ;;  %1777 = vmatpush.msrb.mxu1 %v2378_v12 }
 0x7f7   :  { %1797 = vmatpush.msrb.mxu2 %v2379_v3  ;;  %1817 = vmatpush.msrb.mxu3 %v2380_v13 }
 0x7f8   :  { %1758 = vmatpush.msrb.mxu0 %v2381_v9  ;;  %1778 = vmatpush.msrb.mxu1 %v2382_v11 }
 0x7f9   :  { %1798 = vmatpush.msrb.mxu2 %v2383_v0  ;;  %1818 = vmatpush.msrb.mxu3 %v2384_v1 }
 0x7fa   :  { %1759 = vmatpush.msrb.mxu0 %v2385_v6  ;;  %1779 = vmatpush.msrb.mxu1 %v2386_v15 }
 0x7fb   :  { %1799 = vmatpush.msrb.mxu2 %v2387_v2  ;;  %1819 = vmatpush.msrb.mxu3 %v2388_v17 }
 0x7fc   :  { %1760 = vmatpush.msrb.mxu0 %v2389_v18  ;;  %1780 = vmatpush.msrb.mxu1 %v2390_v19  ;;  %v1427_v52 = vld.sshfl [vmem:[#allocation1] sm:$0xff pattern:$0x73625140]  ;;  %v1428_v12 = vld.sshfl [vmem:[#allocation1 + $0x8] sm:$0xff pattern:$0x73625140] }
 0x7fd   :  { %1800 = vmatpush.msrb.mxu2 %v2391_v21  ;;  %1820 = vmatpush.msrb.mxu3 %v2392_v22 }
 0x7fe   :  { %1761 = vmatpush.msrb.mxu0 %v2393_v23  ;;  %1781 = vmatpush.msrb.mxu1 %v2394_v24 }
 0x7ff   :  { %1801 = vmatpush.msrb.mxu2 %v2395_v56  ;;  %1821 = vmatpush.msrb.mxu3 %v2396_v25 }
 0x800   :  { %1762 = vmatpush.msrb.mxu0 %v2397_v26  ;;  %1782 = vmatpush.msrb.mxu1 %v2398_v27 }
 0x801   :  { %1802 = vmatpush.msrb.mxu2 %v2399_v28  ;;  %1822 = vmatpush.msrb.mxu3 %v2400_v29 }
 0x802   :  { %1763 = vmatpush.msrb.mxu0 %v2401_v30  ;;  %1783 = vmatpush.msrb.mxu1 %v2402_v31 }
 0x803   :  { %1803 = vmatpush.msrb.mxu2 %v2403_v34  ;;  %1823 = vmatpush.msrb.mxu3 %v2404_v35 }
 0x804   :  { %1764 = vmatpush.msrb.mxu0 %v2405_v36  ;;  %1784 = vmatpush.msrb.mxu1 %v2406_v37 }
 0x805   :  { %1804 = vmatpush.msrb.mxu2 %v2407_v38  ;;  %1824 = vmatpush.msrb.mxu3 %v2408_v40 }
 0x806   :  { %1765 = vmatpush.msrb.mxu0 %v2409_v58  ;;  %1785 = vmatpush.msrb.mxu1 %v2410_v46 }
 0x807   :  { %1805 = vmatpush.msrb.mxu2 %v2411_v41  ;;  %1825 = vmatpush.msrb.mxu3 %v2412_v49 }
 0x808   :  { %1766 = vmatpush.msrb.mxu0 %v2413_v45  ;;  %1786 = vmatpush.msrb.mxu1 %v2414_v39 }
 0x809   :  { %1806 = vmatpush.msrb.mxu2 %v2415_v47  ;;  %1826 = vmatpush.msrb.mxu3 %v2416_v33 }
 0x865   :  { %v1350_v57 = vpop.f32.mrf.mxu0  ;;  %v1370_v16 = vpop.f32.mrf.mxu1 }
 0x866   :  { %v1421_v54 = vadd.f32 %v1417_v42, %v1350_v57  ;;  %v1422_v60 = vadd.f32 %v1418_v44, %v1370_v16 }
 0x868   :  { %v2073_v43 = vmul.f32 -1.442695, %v1421_v54  ;;  %v2074_v30 = vmul.f32 -1.442695, %v1422_v60 }
 0x86a   :  { %2217 = vpow2.f32 %v2073_v43 }
 0x86c   :  { %v1390_v5 = vpop.f32.mrf.mxu2  ;;  %v1410_v61 = vpop.f32.mrf.mxu3 }
 0x86d   :  { %v1431_v55 = vadd.f32 %v1427_v52, %v1390_v5  ;;  %v1432_v0 = vadd.f32 %v1428_v12, %v1410_v61  ;;  %v1623_v61 = vld [vmem:[#allocation6 + $0x18] sm:$0xf] }
 0x86e   :  { %1625 = vst [vmem:[#allocation1] ss:$4 sm:$0xff] %v1623_v61 }
 0x86f   :  { %v2075_v8 = vmul.f32 -1.442695, %v1431_v55 }
 0x870   :  { %v2218_v59 = vpop.eup %2217 }
 0x871   :  { %v1439_v48 = vadd.f32 1.0, %v2218_v59  ;;  %2219 = vpow2.f32 %v2075_v8 }
 0x873   :  { %2221 = vrcp.f32 %v1439_v48  ;;  %v1452_v3 = vand.u32 2147483648, %v1439_v48  ;;  %v1450_v9 = vand.u32 2147483647, %v1439_v48  ;;  %vm1446_vm13 = vweird.f32 %v1439_v48 }
 0x875   :  { %v1453_v15 = vor.u32 1.1754944e-38, %v1452_v3  ;;  %vm1451_vm15 = vcmp.eq.f32.partialorder %v1450_v9, 8.507059e+37  ;;  %v1626_v12 = vld.sshfl [vmem:[#allocation1] sm:$0xff pattern:$0x73625140] }
 0x876   :  { %v1627_v3 = vld.sshfl [vmem:[#allocation1 + $0x8] sm:$0xff pattern:$0x73625140] }
 0x877   :  { %v2220_v10 = vpop.eup %2219 }
 0x878   :  { %v1487_v63 = vadd.f32 1.0, %v2220_v10 }
 0x879   :  { %v2222_v62 = vpop.eup %2221 }
 0x87a   :  { %v1442_v4 = vmul.f32 %v2222_v62, %v1439_v48  ;;  %2223 = vrcp.f32 %v1487_v63  ;;  %vm1447_vm12 = vweird.f32 %v2222_v62  ;;  %v1500_v22 = vand.u32 2147483648, %v1487_v63 }
 0x87b   :  { %2225 = vtanh.f32 %v1422_v60  ;;  %vm1448_vm14 = vmor %vm1446_vm13, %vm1447_vm12  ;;  %v1498_v24 = vand.u32 2147483647, %v1487_v63  ;;  %vm1494_vm3 = vweird.f32 %v1487_v63 }
 0x87c   :  { %v1443_v14 = vsub.f32 1.0, %v1442_v4  ;;  %2227 = vtanh.f32 %v1432_v0  ;;  %v1501_v25 = vor.u32 1.1754944e-38, %v1500_v22 }
 0x87d   :  { %vm1499_vm5 = vcmp.eq.f32.partialorder %v1498_v24, 8.507059e+37  ;;  %2229 = vpow2.f32 %v2074_v30 }
 0x87e   :  { %v1444_v13 = vmul.f32 %v2222_v62, %v1443_v14 }
 0x880   :  { %v2224_v11 = vpop.eup %2223  ;;  %v1445_v1 = vadd.f32 %v2222_v62, %v1444_v13  ;;  %v1633_v13 = vld [vmem:[#allocation7 + $0x4] sm:$0xf] }
 0x881   :  { %v1490_v6 = vmul.f32 %v2224_v11, %v1487_v63  ;;  %v2226_v17 = vpop.eup %2225  ;;  %vm1495_vm2 = vweird.f32 %v2224_v11  ;;  %1635 = vst [vmem:[#allocation1] ss:$4 sm:$0xff] %v1633_v13 }
 0x882   :  { %v1449_v2 = vsel %vm1448_vm14, %v2222_v62, %v1445_v1  ;;  %vm1496_vm4 = vmor %vm1494_vm3, %vm1495_vm2  ;;  %v2228_v27 = vpop.eup %2227 }
 0x883   :  { %v1454_v18 = vsel %vm1451_vm15, %v1453_v15, %v1449_v2  ;;  %v1491_v19 = vsub.f32 1.0, %v1490_v6  ;;  %v2230_v31 = vpop.eup %2229 }
 0x884   :  { %v1473_v21 = vmul.f32 %v2226_v17, %v1454_v18  ;;  %v1440_v34 = vadd.f32 1.0, %v2230_v31  ;;  %v1472_v40 = vmul.f32 %v1454_v18, %v3347_v7  ;;  %v2076_v7 = vmul.f32 -1.442695, %v1432_v0 }
 0x885   :  { %v1492_v23 = vmul.f32 %v2224_v11, %v1491_v19 }
 0x886   :  { %1475 = vrot.lane.b32.xlu0 %v1473_v21, %s2473_s1  ;;  %2231 = vrcp.f32 %v1440_v34  ;;  %v1467_v49 = vand.u32 2147483648, %v1440_v34  ;;  %vm1461_vm7 = vweird.f32 %v1440_v34  ;;  %v1465_v45 = vand.u32 2147483647, %v1440_v34 }
 0x887   :  { %v1493_v56 = vadd.f32 %v2224_v11, %v1492_v23 }
 0x888   :  { %v1468_v47 = vor.u32 1.1754944e-38, %v1467_v49  ;;  %vm1466_vm9 = vcmp.eq.f32.partialorder %v1465_v45, 8.507059e+37  ;;  %v1636_v1 = vld.sshfl [vmem:[#allocation1] sm:$0xff pattern:$0x73625140] }
 0x889   :  { %v1497_v26 = vsel %vm1496_vm4, %v2224_v11, %v1493_v56 }
 0x88a   :  { %v1502_v28 = vsel %vm1499_vm5, %v1501_v25, %v1497_v26 }
 0x88b   :  { %v1521_v29 = vmul.f32 %v2228_v27, %v1502_v28  ;;  %v1520_v5 = vmul.f32 %v1502_v28, %v3352_v32  ;;  %v1637_v27 = vld.sshfl [vmem:[#allocation1 + $0x8] sm:$0xff pattern:$0x73625140] }
 0x88c   :  { %v2232_v35 = vpop.eup %2231 }
 0x88d   :  { %1523 = vrot.lane.b32.xlu1 %v1521_v29, %s2473_s1  ;;  %v1457_v36 = vmul.f32 %v2232_v35, %v1440_v34  ;;  %vm1462_vm6 = vweird.f32 %v2232_v35 }
 0x88e   :  { %vm1463_vm8 = vmor %vm1461_vm7, %vm1462_vm6 }
 0x88f   :  { %v1458_v37 = vsub.f32 1.0, %v1457_v36 }
 0x891   :  { %v1459_v38 = vmul.f32 %v2232_v35, %v1458_v37 }
 0x893   :  { %v1460_v41 = vadd.f32 %v2232_v35, %v1459_v38 }
 0x895   :  { %v1464_v39 = vsel %vm1463_vm8, %v2232_v35, %v1460_v41 }
 0x896   :  { %v1469_v50 = vsel %vm1466_vm9, %v1468_v47, %v1464_v39 }
 0x8f8   :  { %v1476_v58 = vpop.permute.xlu0 %1475 }
 0x8f9   :  { %v3366_v46 = vadd.f32 %v1476_v58, %v1472_v40 }
 0x8fb   :  { %2233 = vtanh.f32 %v3366_v46 }
 0x8fc   :  { %2235 = vpow2.f32 %v2076_v7 }
 0x8ff   :  { %v1524_v52 = vpop.permute.xlu1 %1523 }
 0x900   :  { %v3371_v55 = vadd.f32 %v1524_v52, %v1520_v5 }
 0x901   :  { %v2234_v33 = vpop.eup %2233 }
 0x902   :  { %v1480_v42 = vmul.f32 %v2234_v33, %v1469_v50  ;;  %v2236_v44 = vpop.eup %2235 }
 0x903   :  { %v1488_v53 = vadd.f32 1.0, %v2236_v44 }
 0x904   :  { %1530 = vrot.lane.b32.xlu2 %v1480_v42, %s2473_s1 }
 0x905   :  { %2237 = vrcp.f32 %v1488_v53  ;;  %v1515_v48 = vand.u32 2147483648, %v1488_v53  ;;  %vm1509_vm11 = vweird.f32 %v1488_v53  ;;  %v1513_v16 = vand.u32 2147483647, %v1488_v53 }
 0x906   :  { %2239 = vtanh.f32 %v3371_v55 }
 0x907   :  { %v1516_v62 = vor.u32 1.1754944e-38, %v1515_v48  ;;  %vm1514_vm13 = vcmp.eq.f32.partialorder %v1513_v16, 8.507059e+37 }
 0x90b   :  { %v2238_v57 = vpop.eup %2237 }
 0x90c   :  { %v1505_v54 = vmul.f32 %v2238_v57, %v1488_v53  ;;  %vm1510_vm10 = vweird.f32 %v2238_v57  ;;  %v2240_v63 = vpop.eup %2239 }
 0x90d   :  { %vm1511_vm12 = vmor %vm1509_vm11, %vm1510_vm10 }
 0x90e   :  { %v1506_v43 = vsub.f32 1.0, %v1505_v54 }
 0x910   :  { %v1507_v8 = vmul.f32 %v2238_v57, %v1506_v43 }
 0x912   :  { %v1508_v59 = vadd.f32 %v2238_v57, %v1507_v8 }
 0x914   :  { %v1512_v10 = vsel %vm1511_vm12, %v2238_v57, %v1508_v59 }
 0x915   :  { %v1517_v60 = vsel %vm1514_vm13, %v1516_v62, %v1512_v10 }
 0x916   :  { %v3374_v4 = vmul.f32 %v2240_v63, %v1517_v60 }
 0x95e   :  { %v1531_v14 = vpop.permute.xlu2 %1530 }
 0x95f   :  { %2077 = vst.msk [vmem:[%s3473_s3 + $0xa] sm:$0x3] %vm202_vm0, %v1531_v14  ;;  %v1541_v32 = vsel %vm279_vm1, %v1531_v14, %v3374_v4 }
 0x960   :  { %1558 = vmatmul.f32.vlgmr.msra.gmra.mxu0 %v1541_v32  ;;  %1578 = vmatmul.f32.vlgmr.msra.gmra.mxu1 %v1541_v32 }
 0x961   :  { %1598 = vmatmul.f32.vlgmr.msra.gmra.mxu2 %v1541_v32  ;;  %1618 = vmatmul.f32.vlgmr.msra.gmra.mxu3 %v1541_v32 }
 0x9dd   :  { %v1559_v9 = vpop.f32.mrf.mxu0  ;;  %v1579_v19 = vpop.f32.mrf.mxu1 }
 0x9de   :  { %v1630_v11 = vadd.f32 %v1626_v12, %v1559_v9  ;;  %v1631_v24 = vadd.f32 %v1627_v3, %v1579_v19 }
 0x9e0   :  { %v2079_v0 = vmul.f32 -1.442695, %v1630_v11  ;;  %v2080_v57 = vmul.f32 -1.442695, %v1631_v24 }
 0x9e2   :  { %2241 = vpow2.f32 %v2079_v0 }
 0x9e4   :  { %v1599_v6 = vpop.f32.mrf.mxu2  ;;  %v1619_v26 = vpop.f32.mrf.mxu3 }
 0x9e5   :  { %v1640_v15 = vadd.f32 %v1636_v1, %v1599_v6  ;;  %v1641_v34 = vadd.f32 %v1637_v27, %v1619_v26 }
 0x9e7   :  { %v2081_v2 = vmul.f32 -1.442695, %v1640_v15  ;;  %v2082_v13 = vmul.f32 -1.442695, %v1641_v34 }
 0x9e8   :  { %v2242_v17 = vpop.eup %2241 }
 0x9e9   :  { %v1648_v18 = vadd.f32 1.0, %v2242_v17  ;;  %2243 = vpow2.f32 %v2081_v2 }
 0x9eb   :  { %2245 = vrcp.f32 %v1648_v18  ;;  %v1661_v28 = vand.u32 2147483648, %v1648_v18  ;;  %v1659_v30 = vand.u32 2147483647, %v1648_v18  ;;  %vm1655_vm15 = vweird.f32 %v1648_v18 }
 0x9ed   :  { %v1662_v37 = vor.u32 1.1754944e-38, %v1661_v28  ;;  %vm1660_vm3 = vcmp.eq.f32.partialorder %v1659_v30, 8.507059e+37 }
 0x9ef   :  { %v2244_v21 = vpop.eup %2243 }
 0x9f0   :  { %v1696_v22 = vadd.f32 1.0, %v2244_v21 }
 0x9f1   :  { %v2246_v23 = vpop.eup %2245 }
 0x9f2   :  { %v1651_v56 = vmul.f32 %v2246_v23, %v1648_v18  ;;  %2247 = vrcp.f32 %v1696_v22  ;;  %vm1656_vm14 = vweird.f32 %v2246_v23  ;;  %v1709_v45 = vand.u32 2147483648, %v1696_v22 }
 0x9f3   :  { %2249 = vtanh.f32 %v1631_v24  ;;  %vm1657_vm2 = vmor %vm1655_vm15, %vm1656_vm14  ;;  %v1707_v47 = vand.u32 2147483647, %v1696_v22  ;;  %vm1703_vm5 = vweird.f32 %v1696_v22 }
 0x9f4   :  { %v1652_v25 = vsub.f32 1.0, %v1651_v56  ;;  %2251 = vtanh.f32 %v1641_v34  ;;  %v1710_v50 = vor.u32 1.1754944e-38, %v1709_v45  ;;  %v1841_v34 = vld [vmem:[#allocation7] sm:$0xf] }
 0x9f5   :  { %vm1708_vm7 = vcmp.eq.f32.partialorder %v1707_v47, 8.507059e+37  ;;  %2253 = vpow2.f32 %v2080_v57 }
 0x9f6   :  { %v1653_v29 = vmul.f32 %v2246_v23, %v1652_v25 }
 0x9f8   :  { %v2248_v31 = vpop.eup %2247  ;;  %v1654_v35 = vadd.f32 %v2246_v23, %v1653_v29  ;;  %v1832_v29 = vld [vmem:[#allocation6 + $0x1c] sm:$0xf] }
 0x9f9   :  { %v1699_v36 = vmul.f32 %v2248_v31, %v1696_v22  ;;  %v2250_v40 = vpop.eup %2249  ;;  %vm1704_vm4 = vweird.f32 %v2248_v31  ;;  %1834 = vst [vmem:[#allocation1] ss:$4 sm:$0xff] %v1832_v29 }
 0x9fa   :  { %v1658_v38 = vsel %vm1657_vm2, %v2246_v23, %v1654_v35  ;;  %vm1705_vm6 = vmor %vm1703_vm5, %vm1704_vm4  ;;  %v2252_v7 = vpop.eup %2251 }
 0x9fb   :  { %v1663_v58 = vsel %vm1660_vm3, %v1662_v37, %v1658_v38  ;;  %v1700_v41 = vsub.f32 1.0, %v1699_v36  ;;  %v2254_v54 = vpop.eup %2253 }
 0x9fc   :  { %v1682_v49 = vmul.f32 %v2250_v40, %v1663_v58  ;;  %v1649_v43 = vadd.f32 1.0, %v2254_v54  ;;  %v1681_v48 = vmul.f32 %v1663_v58, %v3366_v46  ;;  %v3685_v46 = vld [vmem:[#allocation14_spill] sm:$0xff] }
 0x9fd   :  { %v1701_v39 = vmul.f32 %v2248_v31, %v1700_v41 }
 0x9fe   :  { %1684 = vrot.lane.b32.xlu0 %v1682_v49, %s2473_s1  ;;  %2255 = vrcp.f32 %v1649_v43  ;;  %v1676_v62 = vand.u32 2147483648, %v1649_v43  ;;  %vm1670_vm9 = vweird.f32 %v1649_v43  ;;  %v1674_v60 = vand.u32 2147483647, %v1649_v43 }
 0x9ff   :  { %v1702_v33 = vadd.f32 %v2248_v31, %v1701_v39 }
 0xa00   :  { %v1677_v32 = vor.u32 1.1754944e-38, %v1676_v62  ;;  %vm1675_vm11 = vcmp.eq.f32.partialorder %v1674_v60, 8.507059e+37  ;;  %v1835_v30 = vld.sshfl [vmem:[#allocation1] sm:$0xff pattern:$0x73625140] }
 0xa01   :  { %v1706_v42 = vsel %vm1705_vm6, %v2248_v31, %v1702_v33  ;;  %v1836_v31 = vld.sshfl [vmem:[#allocation1 + $0x8] sm:$0xff pattern:$0x73625140] }
 0xa02   :  { %v1711_v44 = vsel %vm1708_vm7, %v1710_v50, %v1706_v42  ;;  %1843 = vst [vmem:[#allocation1] ss:$4 sm:$0xff] %v1841_v34 }
 0xa03   :  { %v1730_v53 = vmul.f32 %v2252_v7, %v1711_v44  ;;  %v1729_v2 = vmul.f32 %v1711_v44, %v3371_v55 }
 0xa04   :  { %v2256_v52 = vpop.eup %2255 }
 0xa05   :  { %1732 = vrot.lane.b32.xlu1 %v1730_v53, %s2473_s1  ;;  %v1666_v5 = vmul.f32 %v2256_v52, %v1649_v43  ;;  %vm1671_vm8 = vweird.f32 %v2256_v52 }
 0xa06   :  { %vm1672_vm10 = vmor %vm1670_vm9, %vm1671_vm8 }
 0xa07   :  { %v1667_v8 = vsub.f32 1.0, %v1666_v5 }
 0xa09   :  { %v1668_v59 = vmul.f32 %v2256_v52, %v1667_v8  ;;  %v1844_v38 = vld.sshfl [vmem:[#allocation1] sm:$0xff pattern:$0x73625140]  ;;  %v1845_v57 = vld.sshfl [vmem:[#allocation1 + $0x8] sm:$0xff pattern:$0x73625140] }
 0xa0b   :  { %v1669_v63 = vadd.f32 %v2256_v52, %v1668_v59 }
 0xa0d   :  { %v1673_v14 = vsel %vm1672_vm10, %v2256_v52, %v1669_v63 }
 0xa0e   :  { %v1678_v12 = vsel %vm1675_vm11, %v1677_v32, %v1673_v14 }
 0xa70   :  { %v1685_v16 = vpop.permute.xlu0 %1684 }
 0xa71   :  { %v3385_v10 = vadd.f32 %v1685_v16, %v1681_v48 }
 0xa73   :  { %2257 = vtanh.f32 %v3385_v10 }
 0xa74   :  { %2259 = vpow2.f32 %v2082_v13 }
 0xa77   :  { %v1733_v15 = vpop.permute.xlu1 %1732 }
 0xa78   :  { %v3394_v17 = vadd.f32 %v1733_v15, %v1729_v2  ;;  %v3687_v15 = vld [vmem:[#allocation37_spill] sm:$0xff] }
 0xa79   :  { %v2258_v61 = vpop.eup %2257 }
 0xa7a   :  { %v1689_v3 = vmul.f32 %v2258_v61, %v1678_v12  ;;  %v2260_v9 = vpop.eup %2259 }
 0xa7b   :  { %v1697_v11 = vadd.f32 1.0, %v2260_v9 }
 0xa7c   :  { %1739 = vrot.lane.b32.xlu2 %v1689_v3, %s2473_s1 }
 0xa7d   :  { %2261 = vrcp.f32 %v1697_v11  ;;  %v1724_v21 = vand.u32 2147483648, %v1697_v11  ;;  %vm1718_vm13 = vweird.f32 %v1697_v11 }
 0xa7e   :  { %2263 = vtanh.f32 %v3394_v17 }
 0xa7f   :  { %v1725_v24 = vor.u32 1.1754944e-38, %v1724_v21 }
 0xa83   :  { %v2262_v0 = vpop.eup %2261 }
 0xa84   :  { %700 = vrot.lane.b32.xlu2 %v3685_v46, %s2473_s1  ;;  %v1714_v1 = vmul.f32 %v2262_v0, %v1697_v11  ;;  %vm1719_vm12 = vweird.f32 %v2262_v0  ;;  %v2264_v23 = vpop.eup %2263 }
 0xa85   :  { %vm1720_vm14 = vmor %vm1718_vm13, %vm1719_vm12 }
 0xa86   :  { %v1715_v6 = vsub.f32 1.0, %v1714_v1 }
 0xa88   :  { %v1716_v18 = vmul.f32 %v2262_v0, %v1715_v6  ;;  %v3686_v6 = vld [vmem:[#allocation41_spill] sm:$0xff] }
 0xa8a   :  { %v1717_v19 = vadd.f32 %v2262_v0, %v1716_v18 }
 0xa8c   :  { %1327 = vrot.lane.b32.xlu2 %v3355_v51, %s2473_s1  ;;  %v1722_v51 = vand.u32 2147483647, %v1697_v11  ;;  %v1721_v22 = vsel %vm1720_vm14, %v2262_v0, %v1717_v19 }
 0xa8e   :  { %vm1723_vm15 = vcmp.eq.f32.partialorder %v1722_v51, 8.507059e+37 }
 0xa8f   :  { %v1726_v56 = vsel %vm1723_vm15, %v1725_v24, %v1721_v22 }
 0xa90   :  { %v3397_v25 = vmul.f32 %v2264_v23, %v1726_v56 }
 0xad6   :  { %v1740_v26 = vpop.permute.xlu2 %1739 }
 0xad7   :  { %2083 = vst.msk [vmem:[%s3473_s3 + $0xc] sm:$0x3] %vm202_vm0, %v1740_v26  ;;  %v1750_v55 = vsel %vm279_vm1, %v1740_v26, %v3397_v25 }
 0xad8   :  { %1767 = vmatmul.f32.vlgmr.msrb.gmra.mxu0 %v1750_v55  ;;  %1787 = vmatmul.f32.vlgmr.msrb.gmra.mxu1 %v1750_v55 }
 0xad9   :  { %1807 = vmatmul.f32.vlgmr.msrb.gmra.mxu2 %v1750_v55  ;;  %1827 = vmatmul.f32.vlgmr.msrb.gmra.mxu3 %v1750_v55 }
 0xade   :  { %v701_v27 = vpop.permute.xlu2 %700 }
 0xadf   :  { %2054 = vst.msk [vmem:[%s3474_s4 + $0xc] sm:$0x3] %vm202_vm0, %v701_v27 }
 0xae6   :  { %v1328_v28 = vpop.permute.xlu2 %1327 }
 0xae7   :  { %2072 = vst.msk [vmem:[%s3474_s4 + $0x6] sm:$0x3] %vm202_vm0, %v1328_v28 }
 0xb55   :  { %v1768_v35 = vpop.f32.mrf.mxu0  ;;  %v1788_v39 = vpop.f32.mrf.mxu1 }
 0xb56   :  { %v1839_v36 = vadd.f32 %v1835_v30, %v1768_v35  ;;  %v1840_v42 = vadd.f32 %v1836_v31, %v1788_v39 }
 0xb58   :  { %v2085_v37 = vmul.f32 -1.442695, %v1839_v36  ;;  %v2086_v2 = vmul.f32 -1.442695, %v1840_v42 }
 0xb5a   :  { %2265 = vpow2.f32 %v2085_v37 }
 0xb5c   :  { %v1808_v40 = vpop.f32.mrf.mxu2  ;;  %v1828_v53 = vpop.f32.mrf.mxu3 }
 0xb5d   :  { %v1848_v58 = vadd.f32 %v1844_v38, %v1808_v40  ;;  %v1849_v8 = vadd.f32 %v1845_v57, %v1828_v53 }
 0xb5f   :  { %v2087_v41 = vmul.f32 -1.442695, %v1848_v58  ;;  %v2088_v18 = vmul.f32 -1.442695, %v1849_v8 }
 0xb60   :  { %v2266_v49 = vpop.eup %2265 }
 0xb61   :  { %v1856_v45 = vadd.f32 1.0, %v2266_v49  ;;  %2267 = vpow2.f32 %v2087_v41 }
 0xb63   :  { %2269 = vrcp.f32 %v1856_v45  ;;  %v1869_v54 = vand.u32 2147483648, %v1856_v45  ;;  %v1867_v52 = vand.u32 2147483647, %v1856_v45  ;;  %vm1863_vm2 = vweird.f32 %v1856_v45 }
 0xb65   :  { %v1870_v16 = vor.u32 1.1754944e-38, %v1869_v54  ;;  %vm1868_vm4 = vcmp.eq.f32.partialorder %v1867_v52, 8.507059e+37 }
 0xb67   :  { %v2268_v47 = vpop.eup %2267 }
 0xb68   :  { %v1904_v33 = vadd.f32 1.0, %v2268_v47 }
 0xb69   :  { %v2270_v50 = vpop.eup %2269 }
 0xb6a   :  { %v1859_v7 = vmul.f32 %v2270_v50, %v1856_v45  ;;  %2271 = vrcp.f32 %v1904_v33  ;;  %vm1864_vm1 = vweird.f32 %v2270_v50  ;;  %v1917_v61 = vand.u32 2147483648, %v1904_v33 }
 0xb6b   :  { %2273 = vtanh.f32 %v1840_v42  ;;  %vm1865_vm3 = vmor %vm1863_vm2, %vm1864_vm1  ;;  %v1915_v3 = vand.u32 2147483647, %v1904_v33  ;;  %vm1911_vm6 = vweird.f32 %v1904_v33 }
 0xb6c   :  { %v1860_v44 = vsub.f32 1.0, %v1859_v7  ;;  %2275 = vtanh.f32 %v1849_v8  ;;  %v1918_v13 = vor.u32 1.1754944e-38, %v1917_v61 }
 0xb6d   :  { %vm1916_vm8 = vcmp.eq.f32.partialorder %v1915_v3, 8.507059e+37  ;;  %2277 = vpow2.f32 %v2086_v2 }
 0xb6e   :  { %v1861_v43 = vmul.f32 %v2270_v50, %v1860_v44  ;;  %2279 = vpow2.f32 %v2088_v18 }
 0xb70   :  { %v2272_v5 = vpop.eup %2271  ;;  %v1862_v59 = vadd.f32 %v2270_v50, %v1861_v43 }
 0xb71   :  { %v1907_v48 = vmul.f32 %v2272_v5, %v1904_v33  ;;  %v2274_v62 = vpop.eup %2273  ;;  %vm1912_vm5 = vweird.f32 %v2272_v5 }
 0xb72   :  { %v1866_v63 = vsel %vm1865_vm3, %v2270_v50, %v1862_v59  ;;  %vm1913_vm7 = vmor %vm1911_vm6, %vm1912_vm5  ;;  %v2276_v11 = vpop.eup %2275 }
 0xb73   :  { %v1871_v60 = vsel %vm1868_vm4, %v1870_v16, %v1866_v63  ;;  %v1908_v14 = vsub.f32 1.0, %v1907_v48  ;;  %v2278_v19 = vpop.eup %2277 }
 0xb74   :  { %v1890_v32 = vmul.f32 %v2274_v62, %v1871_v60  ;;  %v1857_v21 = vadd.f32 1.0, %v2278_v19  ;;  %v2280_v51 = vpop.eup %2279 }
 0xb75   :  { %v1909_v12 = vmul.f32 %v2272_v5, %v1908_v14  ;;  %v1905_v22 = vadd.f32 1.0, %v2280_v51 }
 0xb76   :  { %1892 = vrot.lane.b32.xlu0 %v1890_v32, %s2473_s1  ;;  %2281 = vrcp.f32 %v1857_v21  ;;  %v1884_v30 = vand.u32 2147483648, %v1857_v21  ;;  %vm1878_vm10 = vweird.f32 %v1857_v21  ;;  %v1882_v31 = vand.u32 2147483647, %v1857_v21 }
 0xb77   :  { %v1910_v46 = vadd.f32 %v2272_v5, %v1909_v12  ;;  %2283 = vrcp.f32 %v1905_v22  ;;  %v1932_v39 = vand.u32 2147483648, %v1905_v22  ;;  %vm1926_vm14 = vweird.f32 %v1905_v22 }
 0xb78   :  { %v1885_v38 = vor.u32 1.1754944e-38, %v1884_v30  ;;  %vm1883_vm12 = vcmp.eq.f32.partialorder %v1882_v31, 8.507059e+37 }
 0xb79   :  { %v1914_v9 = vsel %vm1913_vm7, %v2272_v5, %v1910_v46  ;;  %v1933_v33 = vor.u32 1.1754944e-38, %v1932_v39 }
 0xb7a   :  { %v1919_v0 = vsel %vm1916_vm8, %v1918_v13, %v1914_v9 }
 0xb7b   :  { %v1938_v1 = vmul.f32 %v2276_v11, %v1919_v0  ;;  %v1937_v35 = vmul.f32 %v1919_v0, %v3394_v17  ;;  %v1930_v17 = vand.u32 2147483647, %v1905_v22 }
 0xb7c   :  { %v2282_v23 = vpop.eup %2281 }
 0xb7d   :  { %1940 = vrot.lane.b32.xlu1 %v1938_v1, %s2473_s1  ;;  %v1874_v24 = vmul.f32 %v2282_v23, %v1857_v21  ;;  %v2284_v56 = vpop.eup %2283  ;;  %vm1879_vm9 = vweird.f32 %v2282_v23  ;;  %vm1931_vm1 = vcmp.eq.f32.partialorder %v1930_v17, 8.507059e+37 }
 0xb7e   :  { %909 = vrot.lane.b32.xlu0 %v3686_v6, %s2473_s1  ;;  %v1922_v26 = vmul.f32 %v2284_v56, %v1905_v22  ;;  %vm1880_vm11 = vmor %vm1878_vm10, %vm1879_vm9  ;;  %vm1927_vm13 = vweird.f32 %v2284_v56 }
 0xb7f   :  { %vm1928_vm15 = vmor %vm1926_vm14, %vm1927_vm13 }
 0xb80   :  { %v1923_v28 = vsub.f32 1.0, %v1922_v26 }
 0xb82   :  { %v1924_v34 = vmul.f32 %v2284_v56, %v1923_v28 }
 0xb84   :  { %v1925_v49 = vadd.f32 %v2284_v56, %v1924_v34 }
 0xb85   :  { %491 = vrot.lane.b32.xlu1 %v3687_v15, %s2473_s1 }
 0xb86   :  { %1536 = vrot.lane.b32.xlu0 %v3374_v4, %s2473_s1  ;;  %v1875_v4 = vsub.f32 1.0, %v1874_v24  ;;  %v1929_v47 = vsel %vm1928_vm15, %v2284_v56, %v1925_v49 }
 0xb87   :  { %v1934_v44 = vsel %vm1931_vm1, %v1933_v33, %v1929_v47 }
 0xb88   :  { %v1876_v55 = vmul.f32 %v2282_v23, %v1875_v4 }
 0xb8a   :  { %v1877_v29 = vadd.f32 %v2282_v23, %v1876_v55 }
 0xb8c   :  { %v1881_v36 = vsel %vm1880_vm11, %v2282_v23, %v1877_v29 }
 0xb8d   :  { %1118 = vrot.lane.b32.xlu1 %v3272_v20, %s2473_s1  ;;  %v1889_v20 = vmul.f32 %v1871_v60, %v3385_v10  ;;  %v1886_v41 = vsel %vm1883_vm12, %v1885_v38, %v1881_v36 }
 0xb95   :  { %1745 = vrot.lane.b32.xlu1 %v3397_v25, %s2473_s1 }
 0xbe8   :  { %v1893_v27 = vpop.permute.xlu0 %1892 }
 0xbe9   :  { %v1895_v25 = vadd.f32 %v1893_v27, %v1889_v20 }
 0xbeb   :  { %2285 = vtanh.f32 %v1895_v25 }
 0xbef   :  { %v1941_v37 = vpop.permute.xlu1 %1940 }
 0xbf0   :  { %v1943_v40 = vadd.f32 %v1941_v37, %v1937_v35  ;;  %v910_v58 = vpop.permute.xlu0 %909 }
 0xbf1   :  { %v2286_v10 = vpop.eup %2285  ;;  %2060 = vst.msk [vmem:[%s3474_s4 + $0xa] sm:$0x3] %vm202_vm0, %v910_v58 }
 0xbf2   :  { %2287 = vtanh.f32 %v1943_v40  ;;  %v1897_v45 = vmul.f32 %v2286_v10, %v1886_v41 }
 0xbf4   :  { %1947 = vrot.lane.b32.xlu2 %v1897_v45, %s2473_s1 }
 0xbf7   :  { %v492_v50 = vpop.permute.xlu1 %491 }
 0xbf8   :  { %v2288_v42 = vpop.eup %2287  ;;  %2048 = vst.msk [vmem:[%s3474_s4 + $0xe] sm:$0x3] %vm202_vm0, %v492_v50  ;;  %v1537_v7 = vpop.permute.xlu0 %1536 }
 0xbf9   :  { %2078 = vst.msk [vmem:[%s3474_s4 + $0x4] sm:$0x3] %vm202_vm0, %v1537_v7  ;;  %v1945_v53 = vmul.f32 %v2288_v42, %v1934_v44 }
 0xbfb   :  { %1953 = vrot.lane.b32.xlu0 %v1945_v53, %s2473_s1 }
 0xbfc   :  { %1959 = vrot.lane.b32.xlu2 %v1895_v25, %s2473_s1 }
 0xbff   :  { %v1119_v57 = vpop.permute.xlu1 %1118 }
 0xc00   :  { %2066 = vst.msk [vmem:[%s3474_s4 + $0x8] sm:$0x3] %vm202_vm0, %v1119_v57 }
 0xc03   :  { %1965 = vrot.lane.b32.xlu0 %v1943_v40, %s2473_s1 }
 0xc07   :  { %v1746_v54 = vpop.permute.xlu1 %1745 }
 0xc08   :  { %2084 = vst.msk [vmem:[%s3474_s4 + $0x2] sm:$0x3] %vm202_vm0, %v1746_v54 }
 0xc4e   :  { %v1948_v43 = vpop.permute.xlu2 %1947 }
 0xc4f   :  { %2089 = vst.msk [vmem:[%s3473_s3 + $0xe] sm:$0x3] %vm202_vm0, %v1948_v43  ;;  %s2475_s3 = smov 2  }
 0xc50   :  { %1957 = vst.msk [vmem:[#allocation2] sm:$0x3] %vm202_vm0, %v1948_v43 }
 0xc51   :  { %1972 = vst.msk [vmem:[#allocation11] sm:$0x3] %vm202_vm0, %v1948_v43 }
 0xc56   :  { %v1960_v52 = vpop.permute.xlu2 %1959 }
 0xc57   :  { %1962 = vst.msk [vmem:[#allocation3] sm:$0x3] %vm202_vm0, %v1960_v52 }
 0xc6d   :  { %v1954_v5 = vpop.permute.xlu0 %1953 }
 0xc6e   :  { %1956 = vst.msk [vmem:[%s3474_s4] sm:$0x3] %vm202_vm0, %v1954_v5 }
 0xc6f   :  { %1963 = vst.msk [vmem:[#allocation4] sm:$0x3] %vm202_vm0, %v1954_v5 }
 0xc70   :  { %1974 = vst.msk [vmem:[#allocation11 + $0x2] sm:$0x3] %vm202_vm0, %v1954_v5 }
 0xc71   :  { %1999 = dma.vmem_to_hbm [thread:$0]  %s1992_s12, 64, %s1994_s10, [#allocation10], %s2471_s27, %s2471_s27, %s2475_s3  }
 0xc75   :  { %v1966_v8 = vpop.permute.xlu0 %1965 }
 0xc76   :  { %1968 = vst.msk [vmem:[#allocation5] sm:$0x3] %vm202_vm0, %v1966_v8 }
 0xc77   :  { %2467 = dma.done.wait [#allocation10], 64  }
 0xc78   :  { %2468 = vsyncadd [#allocation10], 4294967232 }
 0xc79   :  { %2014 = vsyncpa [#allocation9], 1 }
 0xc7a   :  { %2015 = vsyncpa [#allocation10], 1 }

</bundles_post_ra>
